<compile_context>
chip_gen: v6e
topology: v6e:2x2x1
jax: 0.10.0
libtpu: 0.0.40
codegen_flags: <defaults>
</compile_context>

<pallas_src>
import functools

import jax
import jax.numpy as jnp
from jax.experimental import pallas as pl
from jax.experimental.pallas import tpu as pltpu


def _round_up(x, m):
    return (x + m - 1) // m * m


def _pad2(a, rp, cp):
    r, c = a.shape
    if (r, c) == (rp, cp):
        return a
    return jnp.pad(a, ((0, rp - r), (0, cp - c)))


def _pad_row(v, np_):
    v = v.reshape(1, -1).astype(jnp.float32)
    if v.shape[1] != np_:
        v = jnp.pad(v, ((0, 0), (0, np_ - v.shape[1])))
    return v


def _default_vmem_limit():
    """Generation-aware scoped-VMEM limit: ~3/4 of per-core physical VMEM
    (=> ~96 MiB on v5e/v6e, ~48 MiB on v7x), 32 MiB fallback."""
    try:
        cap = int(pltpu.get_tpu_info().vmem_capacity_bytes)
        return max(16 * 1024 * 1024, min(96 * 1024 * 1024, (cap * 3) // 4))
    except Exception:
        return 32 * 1024 * 1024


_VMEM_LIMIT = _default_vmem_limit()


def _pick_tk(kp):
    """K tile: >=2 grid steps when possible so DMA overlaps the MXU."""
    for t in (512, 256):
        if kp > t and kp % t == 0:
            return t
    return kp


# ---------------------------------------------------------------------------
# Pallas kernels
# ---------------------------------------------------------------------------

def _matmul_bias_act_kernel(x_ref, w_ref, b_ref, o_ref, *, activation):
    """Y = X @ W + b (+ activation).  grid = (M tiles,), K un-tiled, no scratch."""
    y = jnp.dot(x_ref[...], w_ref[...],
                preferred_element_type=jnp.float32) + b_ref[...]
    if activation == "leaky":
        y = jnp.where(y > 0, y, 0.2 * y)
    elif activation == "sigmoid":
        y = jax.nn.sigmoid(y)
    o_ref[...] = y.astype(o_ref.dtype)


def _matmul_bn_lrelu_kernel(x_ref, w_ref, g_ref, be_ref, o_ref, acc_ref,
                            *, m_rows, eps):
    """Fused path: Y = X @ W (conv bias dropped: cancelled by BN mean),
    training-mode BatchNorm over the m_rows valid rows + LeakyReLU(0.2) in the
    epilogue.  grid = (N tiles [parallel], K tiles [arbitrary]); M resident."""
    k = pl.program_id(1)

    @pl.when(k == 0)
    def _():
        acc_ref[...] = jnp.zeros_like(acc_ref)

    acc_ref[...] += jnp.dot(x_ref[...], w_ref[...],
                            preferred_element_type=jnp.float32)

    @pl.when(k == pl.num_programs(1) - 1)
    def _():
        y = acc_ref[...]                                    # (Mp, tn) f32
        row_ids = jax.lax.broadcasted_iota(jnp.int32, y.shape, 0)
        valid = row_ids < m_rows
        inv_m = 1.0 / float(m_rows)
        ym = jnp.where(valid, y, 0.0)
        mean = jnp.sum(ym, axis=0, keepdims=True) * inv_m
        # two-pass (shifted) variance, biased (PyTorch training-mode BN)
        d = jnp.where(valid, y - mean, 0.0)
        var = jnp.sum(d * d, axis=0, keepdims=True) * inv_m
        inv_std = jax.lax.rsqrt(var + eps)
        z = (y - mean) * inv_std * g_ref[...] + be_ref[...]
        z = jnp.where(z > 0, z, 0.2 * z)
        o_ref[...] = z.astype(o_ref.dtype)


def _matmul_stats_kernel(x_ref, w_ref, y_ref, sum_ref, sq_ref, acc_ref,
                         *, m_rows, tm):
    """Fallback path (large M, e.g. big batches on v7x): M-tiled matmul that
    also accumulates per-channel sum / sum-of-squares across the M grid axis
    (which MUST be 'arbitrary': stats are global over the batch)."""
    i = pl.program_id(0)
    k = pl.program_id(1)

    @pl.when((i == 0) & (k == 0))
    def _():
        sum_ref[...] = jnp.zeros_like(sum_ref)
        sq_ref[...] = jnp.zeros_like(sq_ref)

    @pl.when(k == 0)
    def _():
        acc_ref[...] = jnp.zeros_like(acc_ref)

    acc_ref[...] += jnp.dot(x_ref[...], w_ref[...],
                            preferred_element_type=jnp.float32)

    @pl.when(k == pl.num_programs(1) - 1)
    def _():
        y = acc_ref[...]                                    # (tm, Np) f32
        row_ids = jax.lax.broadcasted_iota(jnp.int32, y.shape, 0) + i * tm
        valid = row_ids < m_rows
        ym = jnp.where(valid, y, 0.0)
        sum_ref[...] += jnp.sum(ym, axis=0, keepdims=True)
        sq_ref[...] += jnp.sum(ym * ym, axis=0, keepdims=True)
        y_ref[...] = y.astype(y_ref.dtype)


def _bn_lrelu_kernel(y_ref, mean_ref, inv_ref, g_ref, be_ref, o_ref):
    """Elementwise BN (precomputed mean / inv_std) + LeakyReLU(0.2)."""
    y = y_ref[...].astype(jnp.float32)
    z = (y - mean_ref[...]) * inv_ref[...] * g_ref[...] + be_ref[...]
    o_ref[...] = jnp.where(z > 0, z, 0.2 * z).astype(o_ref.dtype)


def _vec_dot_sigmoid_kernel(x_ref, w_ref, b_ref, o_ref):
    """out = sigmoid(x @ w + b) for a single output channel: bf16 VPU multiply,
    f32-accumulated lane reduction — no 128x-padded MXU weight tile."""
    prod = x_ref[...] * w_ref[...]                       # input dtype (bf16)
    s = jnp.sum(prod.astype(jnp.float32), axis=-1, keepdims=True) + b_ref[...]
    o_ref[...] = jax.nn.sigmoid(s)


# ---------------------------------------------------------------------------
# Pallas wrappers
# ---------------------------------------------------------------------------

def matmul_bias_act(x, w, b, activation="none", tm=1024):
    """x: (M, K), w: (K, N), b: (N,) -> (M, N) bf16.  bf16 MXU, f32 epilogue.
    K is NOT padded (full-dim last block is legal), no acc scratch."""
    M, K = x.shape
    _, N = w.shape
    Mp = _round_up(max(M, 16), 16)
    Np = _round_up(max(N, 128), 128)
    tm = _round_up(min(tm, Mp), 16)
    Mp = _round_up(Mp, tm)

    xp = _pad2(x.astype(jnp.bfloat16), Mp, K)
    wp = _pad2(w.astype(jnp.bfloat16), K, Np)
    bp = _pad_row(b, Np)

    out = pl.pallas_call(
        functools.partial(_matmul_bias_act_kernel, activation=activation),
        out_shape=jax.ShapeDtypeStruct((Mp, Np), jnp.bfloat16),
        grid_spec=pltpu.PrefetchScalarGridSpec(
            num_scalar_prefetch=0,
            grid=(Mp // tm,),
            in_specs=[
                pl.BlockSpec((tm, K), lambda i: (i, 0)),
                pl.BlockSpec((K, Np), lambda i: (0, 0)),
                pl.BlockSpec((1, Np), lambda i: (0, 0)),
            ],
            out_specs=pl.BlockSpec((tm, Np), lambda i: (i, 0)),
        ),
        compiler_params=pltpu.CompilerParams(
            dimension_semantics=("parallel",),
            vmem_limit_bytes=_VMEM_LIMIT),
    )(xp, wp, bp)
    return out[:M, :N]


def _matmul_bn_lrelu_split(xp, wp, gp, bep, M, N, Kp, Np, tk, eps, tm=512):
    """Fallback: M-tiled matmul + running stats, then elementwise BN+LReLU.
    Keeps VMEM constant in batch size (needed for big batches on v7x)."""
    Mp0 = xp.shape[0]
    tm = min(tm, Mp0)
    Mp = _round_up(Mp0, tm)
    if Mp != Mp0:
        xp = jnp.pad(xp, ((0, Mp - Mp0), (0, 0)))

    y, s, sq = pl.pallas_call(
        functools.partial(_matmul_stats_kernel, m_rows=M, tm=tm),
        out_shape=(jax.ShapeDtypeStruct((Mp, Np), jnp.bfloat16),
                   jax.ShapeDtypeStruct((1, Np), jnp.float32),
                   jax.ShapeDtypeStruct((1, Np), jnp.float32)),
        grid_spec=pltpu.PrefetchScalarGridSpec(
            num_scalar_prefetch=0,
            grid=(Mp // tm, Kp // tk),
            in_specs=[
                pl.BlockSpec((tm, tk), lambda i, k: (i, k)),
                pl.BlockSpec((tk, Np), lambda i, k: (k, 0)),
            ],
            out_specs=[
                pl.BlockSpec((tm, Np), lambda i, k: (i, 0)),
                pl.BlockSpec((1, Np), lambda i, k: (0, 0)),
                pl.BlockSpec((1, Np), lambda i, k: (0, 0)),
            ],
            scratch_shapes=[pltpu.VMEM((tm, Np), jnp.float32)],
        ),
        compiler_params=pltpu.CompilerParams(
            dimension_semantics=("arbitrary", "arbitrary"),
            vmem_limit_bytes=_VMEM_LIMIT),
    )(xp, wp)

    inv_m = 1.0 / float(M)
    mean = s * inv_m
    var = jnp.maximum(sq * inv_m - mean * mean, 0.0)     # biased, PyTorch train
    inv_std = jax.lax.rsqrt(var + eps)

    out = pl.pallas_call(
        _bn_lrelu_kernel,
        out_shape=jax.ShapeDtypeStruct((Mp, Np), jnp.bfloat16),
        grid_spec=pltpu.PrefetchScalarGridSpec(
            num_scalar_prefetch=0,
            grid=(Mp // tm,),
            in_specs=[
                pl.BlockSpec((tm, Np), lambda i: (i, 0)),
                pl.BlockSpec((1, Np), lambda i: (0, 0)),
                pl.BlockSpec((1, Np), lambda i: (0, 0)),
                pl.BlockSpec((1, Np), lambda i: (0, 0)),
                pl.BlockSpec((1, Np), lambda i: (0, 0)),
            ],
            out_specs=pl.BlockSpec((tm, Np), lambda i: (i, 0)),
        ),
        compiler_params=pltpu.CompilerParams(
            dimension_semantics=("parallel",),
            vmem_limit_bytes=_VMEM_LIMIT),
    )(y, mean, inv_std, gp, bep)
    return out[:M, :N]


def matmul_bn_lrelu(x, w, gamma, beta, eps=1e-5, force_split=False):
    """Conv-as-matmul with BatchNorm(train stats) + LeakyReLU fused.
    x: (M, K) im2col rows, w: (K, N), gamma/beta: (N,) -> (M, N) bf16.
    The conv bias is intentionally omitted (cancelled by BN mean subtraction)."""
    M, K = x.shape
    _, N = w.shape
    Mp = _round_up(max(M, 16), 16)
    Kp = _round_up(max(K, 128), 128)
    Np = _round_up(max(N, 128), 128)
    tk = _pick_tk(Kp)                       # >=2 K steps => DMA/compute overlap
    tn = 128 if Np > 128 else Np            # N parallel split (both v7x cores)

    xp = _pad2(x.astype(jnp.bfloat16), Mp, Kp)
    wp = _pad2(w.astype(jnp.bfloat16), Kp, Np)
    gp = _pad_row(gamma, Np)
    bep = _pad_row(beta, Np)

    # VMEM footprint of the fused (full-M-resident) path; fall back if too big.
    fused_bytes = (2 * Mp * tk * 2 + 2 * tk * tn * 2
                   + Mp * tn * 4 + 2 * Mp * tn * 2 + 4 * tn * 4)
    if force_split or fused_bytes > int(0.6 * _VMEM_LIMIT):
        return _matmul_bn_lrelu_split(xp, wp, gp, bep, M, N, Kp, Np, tk, eps)

    out = pl.pallas_call(
        functools.partial(_matmul_bn_lrelu_kernel, m_rows=M, eps=eps),
        out_shape=jax.ShapeDtypeStruct((Mp, Np), jnp.bfloat16),
        grid_spec=pltpu.PrefetchScalarGridSpec(
            num_scalar_prefetch=0,
            grid=(Np // tn, Kp // tk),
            in_specs=[
                pl.BlockSpec((Mp, tk), lambda n, k: (0, k)),
                pl.BlockSpec((tk, tn), lambda n, k: (k, n)),
                pl.BlockSpec((1, tn), lambda n, k: (0, n)),
                pl.BlockSpec((1, tn), lambda n, k: (0, n)),
            ],
            out_specs=pl.BlockSpec((Mp, tn), lambda n, k: (0, n)),
            scratch_shapes=[pltpu.VMEM((Mp, tn), jnp.float32)],
        ),
        compiler_params=pltpu.CompilerParams(
            dimension_semantics=("parallel", "arbitrary"),
            vmem_limit_bytes=_VMEM_LIMIT),
    )(xp, wp, gp, bep)
    return out[:M, :N]


def dot_sigmoid(x, w, b, tm=512):
    """x: (M, K), w: (K,), b: (1,) -> sigmoid(x @ w + b), shape (M, 1) f32."""
    M, K = x.shape
    Mp = _round_up(max(M, 8), 8)
    tm = _round_up(min(tm, Mp), 8)
    Mp = _round_up(Mp, tm)

    xp = _pad2(x.astype(jnp.bfloat16), Mp, K)
    wp = w.reshape(1, K).astype(jnp.bfloat16)
    bp = jnp.asarray(b, jnp.float32).reshape(1, 1)

    out = pl.pallas_call(
        _vec_dot_sigmoid_kernel,
        out_shape=jax.ShapeDtypeStruct((Mp, 1), jnp.float32),
        grid_spec=pltpu.PrefetchScalarGridSpec(
            num_scalar_prefetch=0,
            grid=(Mp // tm,),
            in_specs=[
                pl.BlockSpec((tm, K), lambda i: (i, 0)),
                pl.BlockSpec((1, K), lambda i: (0, 0)),
                pl.BlockSpec((1, 1), lambda i: (0, 0)),
            ],
            out_specs=pl.BlockSpec((tm, 1), lambda i: (i, 0)),
        ),
        compiler_params=pltpu.CompilerParams(
            dimension_semantics=("parallel",),
            vmem_limit_bytes=_VMEM_LIMIT),
    )(xp, wp, bp)
    return out[:M, :]


# ---------------------------------------------------------------------------
# im2col + forward pass (glue in plain JAX, bf16 activations)
# ---------------------------------------------------------------------------

def im2col(x_nhwc, kh, kw, stride, pad):
    # TODO(synk): move this gather into the matmul kernels (strided in-VMEM
    # reads of the resident NHWC activation) to kill the cols HBM round trip.
    B, H, W, C = x_nhwc.shape
    xpad = jnp.pad(x_nhwc, ((0, 0), (pad, pad), (pad, pad), (0, 0)))
    OH = (H + 2 * pad - kh) // stride + 1
    OW = (W + 2 * pad - kw) // stride + 1
    patches = []
    for i in range(kh):
        for j in range(kw):
            patches.append(
                xpad[:, i:i + stride * OH:stride, j:j + stride * OW:stride, :])
    cols = jnp.concatenate(patches, axis=-1)           # (B, OH, OW, kh*kw*C)
    return cols.reshape(B * OH * OW, kh * kw * C), (B, OH, OW)


def _w_to_mat(w_oihw):
    # PyTorch (Cout, Cin, KH, KW) -> (KH*KW*Cin, Cout), matching im2col ordering.
    return jnp.transpose(w_oihw, (2, 3, 1, 0)).reshape(-1, w_oihw.shape[0])


def init_params(key):
    def conv_init(key, cout, cin, k):
        kw_, kb_ = jax.random.split(key)
        w = 0.02 * jax.random.normal(kw_, (cout, cin, k, k), jnp.float32)
        b = 0.02 * jax.random.normal(kb_, (cout,), jnp.float32)
        return w, b

    k1, k2, k3, k4 = jax.random.split(key, 4)
    p = {}
    p["w1"], p["b1"] = conv_init(k1, 64, 3, 4)
    p["w2"], p["b2"] = conv_init(k2, 128, 64, 4)
    p["g2"], p["be2"] = jnp.ones((128,), jnp.float32), jnp.zeros((128,), jnp.float32)
    p["w3"], p["b3"] = conv_init(k3, 256, 128, 4)
    p["g3"], p["be3"] = jnp.ones((256,), jnp.float32), jnp.zeros((256,), jnp.float32)
    p["w4"], p["b4"] = conv_init(k4, 1, 256, 4)
    return p


def discriminator_forward(x_nchw, p):
    # NCHW -> NHWC, bf16 (feeds the bf16 MXU; f32 accumulation inside kernels)
    x = jnp.transpose(x_nchw, (0, 2, 3, 1)).astype(jnp.bfloat16)

    # Conv1 + LeakyReLU (fused epilogue; K=48 left unpadded)
    cols, (B, OH, OW) = im2col(x, 4, 4, 2, 1)
    y = matmul_bias_act(cols, _w_to_mat(p["w1"]), p["b1"], activation="leaky")
    x = y.reshape(B, OH, OW, 64)

    # Conv2 + BatchNorm(train stats) + LeakyReLU — bias dropped (cancelled by BN)
    cols, (B, OH, OW) = im2col(x, 4, 4, 2, 1)
    y = matmul_bn_lrelu(cols, _w_to_mat(p["w2"]), p["g2"], p["be2"])
    x = y.reshape(B, OH, OW, 128)

    # Conv3 + BatchNorm(train stats) + LeakyReLU — bias dropped (cancelled by BN)
    cols, (B, OH, OW) = im2col(x, 4, 4, 2, 1)
    y = matmul_bn_lrelu(cols, _w_to_mat(p["w3"]), p["g3"], p["be3"])
    x = y.reshape(B, OH, OW, 256)

    # Conv4 (Cout=1) + Sigmoid — VPU dot-reduce kernel
    cols, (B, OH, OW) = im2col(x, 4, 4, 1, 0)
    w4 = _w_to_mat(p["w4"]).reshape(-1)
    y = dot_sigmoid(cols, w4, p["b4"])
    out = y.reshape(B, OH, OW, 1).astype(jnp.float32)
    return jnp.transpose(out, (0, 3, 1, 2))             # back to NCHW


# ---------------------------------------------------------------------------
# Pure-JAX f32 reference (sanity check)
# ---------------------------------------------------------------------------

def _ref_forward(x_nchw, p):
    def conv(x, w, b, s, pad):
        w_hwio = jnp.transpose(w, (2, 3, 1, 0))
        y = jax.lax.conv_general_dilated(
            x, w_hwio, (s, s), [(pad, pad), (pad, pad)],
            dimension_numbers=("NHWC", "HWIO", "NHWC"))
        return y + b

    def bn_lrelu(x, g, b, eps=1e-5):
        m = jnp.mean(x, axis=(0, 1, 2))
        v = jnp.mean((x - m) ** 2, axis=(0, 1, 2))
        y = (x - m) / jnp.sqrt(v + eps) * g + b
        return jnp.where(y > 0, y, 0.2 * y)

    x = jnp.transpose(x_nchw, (0, 2, 3, 1)).astype(jnp.float32)
    y = conv(x, p["w1"], p["b1"], 2, 1)
    y = jnp.where(y > 0, y, 0.2 * y)
    # reference keeps the conv bias before BN (PyTorch semantics); it is
    # mathematically cancelled by the BN mean, so results must still match.
    y = bn_lrelu(conv(y, p["w2"], p["b2"], 2, 1), p["g2"], p["be2"])
    y = bn_lrelu(conv(y, p["w3"], p["b3"], 2, 1), p["g3"], p["be3"])
    y = jax.nn.sigmoid(conv(y, p["w4"], p["b4"], 1, 0))
    return jnp.transpose(y, (0, 3, 1, 2))


if __name__ == "__main__":
    key = jax.random.PRNGKey(0)
    kx, kp = jax.random.split(key)
    x = jax.random.normal(kx, (2, 3, 32, 32), jnp.float32)   # NCHW, like PyTorch
    params = init_params(kp)

    fwd = jax.jit(discriminator_forward)
    out = jax.block_until_ready(fwd(x, params))
    assert out.shape == (2, 1, 1, 1), out.shape

    ref = jax.block_until_ready(_ref_forward(x, params))
    assert jnp.allclose(out, ref, atol=2e-2, rtol=2e-2), (
        f"max abs diff {jnp.max(jnp.abs(out - ref))}")

    # Also validate the large-batch (M-tiled split) BN path against the fused
    # path / f32 reference so the v7x fallback is exercised, not just written.
    ks = jax.random.split(jax.random.PRNGKey(1), 4)
    xs = jax.random.normal(ks[0], (640, 1024), jnp.float32)
    ws = 0.03 * jax.random.normal(ks[1], (1024, 128), jnp.float32)
    gs = 1.0 + 0.1 * jax.random.normal(ks[2], (128,), jnp.float32)
    bs = 0.1 * jax.random.normal(ks[3], (128,), jnp.float32)

    def _bn_ref(a, w, g, be, eps=1e-5):
        y = a @ w
        m = y.mean(0)
        v = ((y - m) ** 2).mean(0)
        z = (y - m) / jnp.sqrt(v + eps) * g + be
        return jnp.where(z > 0, z, 0.2 * z)

    z_ref = _bn_ref(xs, ws, gs, bs)
    z_fused = matmul_bn_lrelu(xs, ws, gs, bs).astype(jnp.float32)
    z_split = matmul_bn_lrelu(xs, ws, gs, bs, force_split=True).astype(jnp.float32)
    jax.block_until_ready((z_fused, z_split))
    assert jnp.allclose(z_fused, z_ref, atol=3e-2, rtol=3e-2), (
        f"fused max abs diff {jnp.max(jnp.abs(z_fused - z_ref))}")
    assert jnp.allclose(z_split, z_ref, atol=3e-2, rtol=3e-2), (
        f"split max abs diff {jnp.max(jnp.abs(z_split - z_ref))}")

    print("KERNEL_OK")
</pallas_src>

<mosaic_0001>
module attributes {stable_mosaic.version = 11 : i64} {
  func.func @_matmul_bias_act_kernel(%arg0: i32, %arg1: memref<512x48xbf16, #tpu.memory_space<vmem>>, %arg2: memref<48x128xbf16, #tpu.memory_space<vmem>>, %arg3: memref<1x128xf32, #tpu.memory_space<vmem>>, %arg4: memref<512x128xbf16, #tpu.memory_space<vmem>>) attributes {dimension_semantics = [#tpu.dimension_semantics<parallel>], iteration_bounds = array<i64: 1>, scalar_prefetch = 0 : i64, scratch_operands = 0 : i64, tpu.core_type = #tpu.core_type<tc>, window_params = [{transform_indices = @transform_0, window_bounds = array<i64: 512, 48>}, {pipeline_mode = #tpu.pipeline_mode<synchronous>, transform_indices = @transform_1, window_bounds = array<i64: 48, 128>}, {pipeline_mode = #tpu.pipeline_mode<synchronous>, transform_indices = @transform_2, window_bounds = array<i64: 1, 128>}, {transform_indices = @transform_3, window_bounds = array<i64: 512, 128>}]} {
    %c0 = arith.constant 0 : index
    %c0_0 = arith.constant 0 : index
    %0 = vector.load %arg1[%c0, %c0_0] : memref<512x48xbf16, #tpu.memory_space<vmem>>, vector<512x48xbf16>
    %c0_1 = arith.constant 0 : index
    %c0_2 = arith.constant 0 : index
    %1 = vector.load %arg2[%c0_1, %c0_2] : memref<48x128xbf16, #tpu.memory_space<vmem>>, vector<48x128xbf16>
    %cst = arith.constant dense<0.000000e+00> : vector<512x128xf32>
    %2 = tpu.matmul %0, %1, %cst {dimension_numbers = #tpu.dot_dimension_numbers<[1], [0], [0], [1], [0, 0, 1, 1], [], []>} : vector<512x48xbf16>, vector<48x128xbf16>, vector<512x128xf32> -> vector<512x128xf32>
    %c0_3 = arith.constant 0 : index
    %c0_4 = arith.constant 0 : index
    %3 = vector.load %arg3[%c0_3, %c0_4] : memref<1x128xf32, #tpu.memory_space<vmem>>, vector<1x128xf32>
    %4 = vector.broadcast %3 : vector<1x128xf32> to vector<512x128xf32>
    %5 = arith.addf %2, %4 : vector<512x128xf32>
    %cst_5 = arith.constant 0.000000e+00 : f32
    %6 = vector.broadcast %cst_5 : f32 to vector<512x128xf32>
    %7 = arith.cmpf ogt, %5, %6 : vector<512x128xf32>
    %cst_6 = arith.constant 2.000000e-01 : f32
    %8 = vector.broadcast %cst_6 : f32 to vector<512x128xf32>
    %9 = arith.mulf %8, %5 : vector<512x128xf32>
    %10 = arith.select %7, %5, %9 : vector<512x128xi1>, vector<512x128xf32>
    %11 = arith.truncf %10 : vector<512x128xf32> to vector<512x128xbf16>
    %c0_7 = arith.constant 0 : index
    %c0_8 = arith.constant 0 : index
    %12 = vector.load %arg4[%c0_7, %c0_8] : memref<512x128xbf16, #tpu.memory_space<vmem>>, vector<512x128xbf16>
    tpu.vector_store %arg4[%c0_7, %c0_8], %11 {strides = array<i32>} : memref<512x128xbf16, #tpu.memory_space<vmem>>, vector<512x128xbf16>,
    return
  }
  func.func @transform_0(%arg0: i32) -> (i32, i32) {
    %c0_i32 = arith.constant 0 : i32
    %c0_i32_0 = arith.constant 0 : i32
    return %arg0, %c0_i32 : i32, i32
  }
  func.func @transform_1(%arg0: i32) -> (i32, i32) {
    %c0_i32 = arith.constant 0 : i32
    %c0_i32_0 = arith.constant 0 : i32
    %c0_i32_1 = arith.constant 0 : i32
    return %c0_i32, %c0_i32_0 : i32, i32
  }
  func.func @transform_2(%arg0: i32) -> (i32, i32) {
    %c0_i32 = arith.constant 0 : i32
    %c0_i32_0 = arith.constant 0 : i32
    %c0_i32_1 = arith.constant 0 : i32
    return %c0_i32, %c0_i32_0 : i32, i32
  }
  func.func @transform_3(%arg0: i32) -> (i32, i32) {
    %c0_i32 = arith.constant 0 : i32
    %c0_i32_0 = arith.constant 0 : i32
    return %arg0, %c0_i32 : i32, i32
  }
}

module attributes {stable_mosaic.version = 11 : i64} {
  func.func @_matmul_bn_lrelu_kernel(%arg0: i32, %arg1: i32, %arg2: memref<128x512xbf16, #tpu.memory_space<vmem>>, %arg3: memref<512x128xbf16, #tpu.memory_space<vmem>>, %arg4: memref<1x128xf32, #tpu.memory_space<vmem>>, %arg5: memref<1x128xf32, #tpu.memory_space<vmem>>, %arg6: memref<128x128xbf16, #tpu.memory_space<vmem>>, %arg7: memref<128x128xf32, #tpu.memory_space<vmem>>) attributes {dimension_semantics = [#tpu.dimension_semantics<parallel>, #tpu.dimension_semantics<arbitrary>], iteration_bounds = array<i64: 1, 2>, scalar_prefetch = 0 : i64, scratch_operands = 1 : i64, tpu.core_type = #tpu.core_type<tc>, window_params = [{transform_indices = @transform_0, window_bounds = array<i64: 128, 512>}, {transform_indices = @transform_1, window_bounds = array<i64: 512, 128>}, {transform_indices = @transform_2, window_bounds = array<i64: 1, 128>}, {transform_indices = @transform_3, window_bounds = array<i64: 1, 128>}, {transform_indices = @transform_4, window_bounds = array<i64: 128, 128>}]} {
    %c0_i32 = arith.constant 0 : i32
    %0 = arith.cmpi eq, %arg1, %c0_i32 : i32
    %1 = arith.extui %0 : i1 to i32
    %c0_i32_0 = arith.constant 0 : i32
    %2 = arith.cmpi ne, %1, %c0_i32_0 : i32
    scf.if %2 {
      %cst_9 = arith.constant 0.000000e+00 : f32
      %12 = vector.broadcast %cst_9 : f32 to vector<128x128xf32>
      %c0_10 = arith.constant 0 : index
      %c0_11 = arith.constant 0 : index
      %13 = vector.load %arg7[%c0_10, %c0_11] : memref<128x128xf32, #tpu.memory_space<vmem>>, vector<128x128xf32>
      tpu.vector_store %arg7[%c0_10, %c0_11], %12 {strides = array<i32>} : memref<128x128xf32, #tpu.memory_space<vmem>>, vector<128x128xf32>,
    } else {
    }
    %c0 = arith.constant 0 : index
    %c0_1 = arith.constant 0 : index
    %3 = vector.load %arg7[%c0, %c0_1] : memref<128x128xf32, #tpu.memory_space<vmem>>, vector<128x128xf32>
    %c0_2 = arith.constant 0 : index
    %c0_3 = arith.constant 0 : index
    %4 = vector.load %arg2[%c0_2, %c0_3] : memref<128x512xbf16, #tpu.memory_space<vmem>>, vector<128x512xbf16>
    %c0_4 = arith.constant 0 : index
    %c0_5 = arith.constant 0 : index
    %5 = vector.load %arg3[%c0_4, %c0_5] : memref<512x128xbf16, #tpu.memory_space<vmem>>, vector<512x128xbf16>
    %cst = arith.constant dense<0.000000e+00> : vector<128x128xf32>
    %6 = tpu.matmul %4, %5, %cst {dimension_numbers = #tpu.dot_dimension_numbers<[1], [0], [0], [1], [0, 0, 1, 1], [], []>} : vector<128x512xbf16>, vector<512x128xbf16>, vector<128x128xf32> -> vector<128x128xf32>
    %7 = arith.addf %3, %6 : vector<128x128xf32>
    %c0_6 = arith.constant 0 : index
    %c0_7 = arith.constant 0 : index
    %8 = vector.load %arg7[%c0_6, %c0_7] : memref<128x128xf32, #tpu.memory_space<vmem>>, vector<128x128xf32>
    tpu.vector_store %arg7[%c0_6, %c0_7], %7 {strides = array<i32>} : memref<128x128xf32, #tpu.memory_space<vmem>>, vector<128x128xf32>,
    %c1_i32 = arith.constant 1 : i32
    %9 = arith.cmpi eq, %arg1, %c1_i32 : i32
    %10 = arith.extui %9 : i1 to i32
    %c0_i32_8 = arith.constant 0 : i32
    %11 = arith.cmpi ne, %10, %c0_i32_8 : i32
    scf.if %11 {
      %c0_9 = arith.constant 0 : index
      %c0_10 = arith.constant 0 : index
      %12 = vector.load %arg7[%c0_9, %c0_10] : memref<128x128xf32, #tpu.memory_space<vmem>>, vector<128x128xf32>
      %13 = tpu.iota {dimensions = array<i32: 0>} : vector<128x128xi32>
      %c128_i32 = arith.constant 128 : i32
      %14 = vector.broadcast %c128_i32 : i32 to vector<128x128xi32>
      %15 = arith.cmpi slt, %13, %14 : vector<128x128xi32>
      %cst_11 = arith.constant 0.000000e+00 : f32
      %16 = vector.broadcast %cst_11 : f32 to vector<128x128xf32>
      %17 = arith.select %15, %12, %16 : vector<128x128xi1>, vector<128x128xf32>
      %cst_12 = arith.constant dense<0.000000e+00> : vector<128xf32>
      %18 = vector.multi_reduction <add>, %17, %cst_12 [0] : vector<128x128xf32> to vector<128xf32>
      %19 = vector.shape_cast %18 : vector<128xf32> to vector<1x128xf32>
      %cst_13 = arith.constant 7.812500e-03 : f32
      %20 = vector.broadcast %cst_13 : f32 to vector<1x128xf32>
      %21 = arith.mulf %19, %20 : vector<1x128xf32>
      %22 = vector.broadcast %21 : vector<1x128xf32> to vector<128x128xf32>
      %23 = arith.subf %12, %22 : vector<128x128xf32>
      %cst_14 = arith.constant 0.000000e+00 : f32
      %24 = vector.broadcast %cst_14 : f32 to vector<128x128xf32>
      %25 = arith.select %15, %23, %24 : vector<128x128xi1>, vector<128x128xf32>
      %26 = arith.mulf %25, %25 : vector<128x128xf32>
      %cst_15 = arith.constant dense<0.000000e+00> : vector<128xf32>
      %27 = vector.multi_reduction <add>, %26, %cst_15 [0] : vector<128x128xf32> to vector<128xf32>
      %28 = vector.shape_cast %27 : vector<128xf32> to vector<1x128xf32>
      %cst_16 = arith.constant 7.812500e-03 : f32
      %29 = vector.broadcast %cst_16 : f32 to vector<1x128xf32>
      %30 = arith.mulf %28, %29 : vector<1x128xf32>
      %cst_17 = arith.constant 9.99999974E-6 : f32
      %31 = vector.broadcast %cst_17 : f32 to vector<1x128xf32>
      %32 = arith.addf %30, %31 : vector<1x128xf32>
      %33 = math.rsqrt %32 : vector<1x128xf32>
      %34 = vector.broadcast %21 : vector<1x128xf32> to vector<128x128xf32>
      %35 = arith.subf %12, %34 : vector<128x128xf32>
      %36 = vector.broadcast %33 : vector<1x128xf32> to vector<128x128xf32>
      %37 = arith.mulf %35, %36 : vector<128x128xf32>
      %c0_18 = arith.constant 0 : index
      %c0_19 = arith.constant 0 : index
      %38 = vector.load %arg4[%c0_18, %c0_19] : memref<1x128xf32, #tpu.memory_space<vmem>>, vector<1x128xf32>
      %39 = vector.broadcast %38 : vector<1x128xf32> to vector<128x128xf32>
      %40 = arith.mulf %37, %39 : vector<128x128xf32>
      %c0_20 = arith.constant 0 : index
      %c0_21 = arith.constant 0 : index
      %41 = vector.load %arg5[%c0_20, %c0_21] : memref<1x128xf32, #tpu.memory_space<vmem>>, vector<1x128xf32>
      %42 = vector.broadcast %41 : vector<1x128xf32> to vector<128x128xf32>
      %43 = arith.addf %40, %42 : vector<128x128xf32>
      %cst_22 = arith.constant 0.000000e+00 : f32
      %44 = vector.broadcast %cst_22 : f32 to vector<128x128xf32>
      %45 = arith.cmpf ogt, %43, %44 : vector<128x128xf32>
      %cst_23 = arith.constant 2.000000e-01 : f32
      %46 = vector.broadcast %cst_23 : f32 to vector<128x128xf32>
      %47 = arith.mulf %46, %43 : vector<128x128xf32>
      %48 = arith.select %45, %43, %47 : vector<128x128xi1>, vector<128x128xf32>
      %49 = arith.truncf %48 : vector<128x128xf32> to vector<128x128xbf16>
      %c0_24 = arith.constant 0 : index
      %c0_25 = arith.constant 0 : index
      %50 = vector.load %arg6[%c0_24, %c0_25] : memref<128x128xbf16, #tpu.memory_space<vmem>>, vector<128x128xbf16>
      tpu.vector_store %arg6[%c0_24, %c0_25], %49 {strides = array<i32>} : memref<128x128xbf16, #tpu.memory_space<vmem>>, vector<128x128xbf16>,
    } else {
    }
    return
  }
  func.func @transform_0(%arg0: i32, %arg1: i32) -> (i32, i32) {
    %c0_i32 = arith.constant 0 : i32
    %c0_i32_0 = arith.constant 0 : i32
    return %c0_i32, %arg1 : i32, i32
  }
  func.func @transform_1(%arg0: i32, %arg1: i32) -> (i32, i32) {
    %c0_i32 = arith.constant 0 : i32
    return %arg1, %arg0 : i32, i32
  }
  func.func @transform_2(%arg0: i32, %arg1: i32) -> (i32, i32) {
    %c0_i32 = arith.constant 0 : i32
    %c0_i32_0 = arith.constant 0 : i32
    return %c0_i32, %arg0 : i32, i32
  }
  func.func @transform_3(%arg0: i32, %arg1: i32) -> (i32, i32) {
    %c0_i32 = arith.constant 0 : i32
    %c0_i32_0 = arith.constant 0 : i32
    return %c0_i32, %arg0 : i32, i32
  }
  func.func @transform_4(%arg0: i32, %arg1: i32) -> (i32, i32) {
    %c0_i32 = arith.constant 0 : i32
    %c0_i32_0 = arith.constant 0 : i32
    return %c0_i32, %arg0 : i32, i32
  }
}

module attributes {stable_mosaic.version = 11 : i64} {
  func.func @_matmul_bn_lrelu_kernel(%arg0: i32, %arg1: i32, %arg2: memref<32x512xbf16, #tpu.memory_space<vmem>>, %arg3: memref<512x128xbf16, #tpu.memory_space<vmem>>, %arg4: memref<1x128xf32, #tpu.memory_space<vmem>>, %arg5: memref<1x128xf32, #tpu.memory_space<vmem>>, %arg6: memref<32x128xbf16, #tpu.memory_space<vmem>>, %arg7: memref<32x128xf32, #tpu.memory_space<vmem>>) attributes {dimension_semantics = [#tpu.dimension_semantics<parallel>, #tpu.dimension_semantics<arbitrary>], iteration_bounds = array<i64: 2, 4>, scalar_prefetch = 0 : i64, scratch_operands = 1 : i64, tpu.core_type = #tpu.core_type<tc>, window_params = [{transform_indices = @transform_0, window_bounds = array<i64: 32, 512>}, {transform_indices = @transform_1, window_bounds = array<i64: 512, 128>}, {transform_indices = @transform_2, window_bounds = array<i64: 1, 128>}, {transform_indices = @transform_3, window_bounds = array<i64: 1, 128>}, {transform_indices = @transform_4, window_bounds = array<i64: 32, 128>}]} {
    %c0_i32 = arith.constant 0 : i32
    %0 = arith.cmpi eq, %arg1, %c0_i32 : i32
    %1 = arith.extui %0 : i1 to i32
    %c0_i32_0 = arith.constant 0 : i32
    %2 = arith.cmpi ne, %1, %c0_i32_0 : i32
    scf.if %2 {
      %cst_9 = arith.constant 0.000000e+00 : f32
      %12 = vector.broadcast %cst_9 : f32 to vector<32x128xf32>
      %c0_10 = arith.constant 0 : index
      %c0_11 = arith.constant 0 : index
      %13 = vector.load %arg7[%c0_10, %c0_11] : memref<32x128xf32, #tpu.memory_space<vmem>>, vector<32x128xf32>
      tpu.vector_store %arg7[%c0_10, %c0_11], %12 {strides = array<i32>} : memref<32x128xf32, #tpu.memory_space<vmem>>, vector<32x128xf32>,
    } else {
    }
    %c0 = arith.constant 0 : index
    %c0_1 = arith.constant 0 : index
    %3 = vector.load %arg7[%c0, %c0_1] : memref<32x128xf32, #tpu.memory_space<vmem>>, vector<32x128xf32>
    %c0_2 = arith.constant 0 : index
    %c0_3 = arith.constant 0 : index
    %4 = vector.load %arg2[%c0_2, %c0_3] : memref<32x512xbf16, #tpu.memory_space<vmem>>, vector<32x512xbf16>
    %c0_4 = arith.constant 0 : index
    %c0_5 = arith.constant 0 : index
    %5 = vector.load %arg3[%c0_4, %c0_5] : memref<512x128xbf16, #tpu.memory_space<vmem>>, vector<512x128xbf16>
    %cst = arith.constant dense<0.000000e+00> : vector<32x128xf32>
    %6 = tpu.matmul %4, %5, %cst {dimension_numbers = #tpu.dot_dimension_numbers<[1], [0], [0], [1], [0, 0, 1, 1], [], []>} : vector<32x512xbf16>, vector<512x128xbf16>, vector<32x128xf32> -> vector<32x128xf32>
    %7 = arith.addf %3, %6 : vector<32x128xf32>
    %c0_6 = arith.constant 0 : index
    %c0_7 = arith.constant 0 : index
    %8 = vector.load %arg7[%c0_6, %c0_7] : memref<32x128xf32, #tpu.memory_space<vmem>>, vector<32x128xf32>
    tpu.vector_store %arg7[%c0_6, %c0_7], %7 {strides = array<i32>} : memref<32x128xf32, #tpu.memory_space<vmem>>, vector<32x128xf32>,
    %c3_i32 = arith.constant 3 : i32
    %9 = arith.cmpi eq, %arg1, %c3_i32 : i32
    %10 = arith.extui %9 : i1 to i32
    %c0_i32_8 = arith.constant 0 : i32
    %11 = arith.cmpi ne, %10, %c0_i32_8 : i32
    scf.if %11 {
      %c0_9 = arith.constant 0 : index
      %c0_10 = arith.constant 0 : index
      %12 = vector.load %arg7[%c0_9, %c0_10] : memref<32x128xf32, #tpu.memory_space<vmem>>, vector<32x128xf32>
      %13 = tpu.iota {dimensions = array<i32: 0>} : vector<32x128xi32>
      %c32_i32 = arith.constant 32 : i32
      %14 = vector.broadcast %c32_i32 : i32 to vector<32x128xi32>
      %15 = arith.cmpi slt, %13, %14 : vector<32x128xi32>
      %cst_11 = arith.constant 0.000000e+00 : f32
      %16 = vector.broadcast %cst_11 : f32 to vector<32x128xf32>
      %17 = arith.select %15, %12, %16 : vector<32x128xi1>, vector<32x128xf32>
      %cst_12 = arith.constant dense<0.000000e+00> : vector<128xf32>
      %18 = vector.multi_reduction <add>, %17, %cst_12 [0] : vector<32x128xf32> to vector<128xf32>
      %19 = vector.shape_cast %18 : vector<128xf32> to vector<1x128xf32>
      %cst_13 = arith.constant 3.125000e-02 : f32
      %20 = vector.broadcast %cst_13 : f32 to vector<1x128xf32>
      %21 = arith.mulf %19, %20 : vector<1x128xf32>
      %22 = vector.broadcast %21 : vector<1x128xf32> to vector<32x128xf32>
      %23 = arith.subf %12, %22 : vector<32x128xf32>
      %cst_14 = arith.constant 0.000000e+00 : f32
      %24 = vector.broadcast %cst_14 : f32 to vector<32x128xf32>
      %25 = arith.select %15, %23, %24 : vector<32x128xi1>, vector<32x128xf32>
      %26 = arith.mulf %25, %25 : vector<32x128xf32>
      %cst_15 = arith.constant dense<0.000000e+00> : vector<128xf32>
      %27 = vector.multi_reduction <add>, %26, %cst_15 [0] : vector<32x128xf32> to vector<128xf32>
      %28 = vector.shape_cast %27 : vector<128xf32> to vector<1x128xf32>
      %cst_16 = arith.constant 3.125000e-02 : f32
      %29 = vector.broadcast %cst_16 : f32 to vector<1x128xf32>
      %30 = arith.mulf %28, %29 : vector<1x128xf32>
      %cst_17 = arith.constant 9.99999974E-6 : f32
      %31 = vector.broadcast %cst_17 : f32 to vector<1x128xf32>
      %32 = arith.addf %30, %31 : vector<1x128xf32>
      %33 = math.rsqrt %32 : vector<1x128xf32>
      %34 = vector.broadcast %21 : vector<1x128xf32> to vector<32x128xf32>
      %35 = arith.subf %12, %34 : vector<32x128xf32>
      %36 = vector.broadcast %33 : vector<1x128xf32> to vector<32x128xf32>
      %37 = arith.mulf %35, %36 : vector<32x128xf32>
      %c0_18 = arith.constant 0 : index
      %c0_19 = arith.constant 0 : index
      %38 = vector.load %arg4[%c0_18, %c0_19] : memref<1x128xf32, #tpu.memory_space<vmem>>, vector<1x128xf32>
      %39 = vector.broadcast %38 : vector<1x128xf32> to vector<32x128xf32>
      %40 = arith.mulf %37, %39 : vector<32x128xf32>
      %c0_20 = arith.constant 0 : index
      %c0_21 = arith.constant 0 : index
      %41 = vector.load %arg5[%c0_20, %c0_21] : memref<1x128xf32, #tpu.memory_space<vmem>>, vector<1x128xf32>
      %42 = vector.broadcast %41 : vector<1x128xf32> to vector<32x128xf32>
      %43 = arith.addf %40, %42 : vector<32x128xf32>
      %cst_22 = arith.constant 0.000000e+00 : f32
      %44 = vector.broadcast %cst_22 : f32 to vector<32x128xf32>
      %45 = arith.cmpf ogt, %43, %44 : vector<32x128xf32>
      %cst_23 = arith.constant 2.000000e-01 : f32
      %46 = vector.broadcast %cst_23 : f32 to vector<32x128xf32>
      %47 = arith.mulf %46, %43 : vector<32x128xf32>
      %48 = arith.select %45, %43, %47 : vector<32x128xi1>, vector<32x128xf32>
      %49 = arith.truncf %48 : vector<32x128xf32> to vector<32x128xbf16>
      %c0_24 = arith.constant 0 : index
      %c0_25 = arith.constant 0 : index
      %50 = vector.load %arg6[%c0_24, %c0_25] : memref<32x128xbf16, #tpu.memory_space<vmem>>, vector<32x128xbf16>
      tpu.vector_store %arg6[%c0_24, %c0_25], %49 {strides = array<i32>} : memref<32x128xbf16, #tpu.memory_space<vmem>>, vector<32x128xbf16>,
    } else {
    }
    return
  }
  func.func @transform_0(%arg0: i32, %arg1: i32) -> (i32, i32) {
    %c0_i32 = arith.constant 0 : i32
    %c0_i32_0 = arith.constant 0 : i32
    return %c0_i32, %arg1 : i32, i32
  }
  func.func @transform_1(%arg0: i32, %arg1: i32) -> (i32, i32) {
    %c0_i32 = arith.constant 0 : i32
    return %arg1, %arg0 : i32, i32
  }
  func.func @transform_2(%arg0: i32, %arg1: i32) -> (i32, i32) {
    %c0_i32 = arith.constant 0 : i32
    %c0_i32_0 = arith.constant 0 : i32
    return %c0_i32, %arg0 : i32, i32
  }
  func.func @transform_3(%arg0: i32, %arg1: i32) -> (i32, i32) {
    %c0_i32 = arith.constant 0 : i32
    %c0_i32_0 = arith.constant 0 : i32
    return %c0_i32, %arg0 : i32, i32
  }
  func.func @transform_4(%arg0: i32, %arg1: i32) -> (i32, i32) {
    %c0_i32 = arith.constant 0 : i32
    %c0_i32_0 = arith.constant 0 : i32
    return %c0_i32, %arg0 : i32, i32
  }
}

module attributes {stable_mosaic.version = 11 : i64} {
  func.func @_vec_dot_sigmoid_kernel(%arg0: i32, %arg1: memref<8x4096xbf16, #tpu.memory_space<vmem>>, %arg2: memref<1x4096xbf16, #tpu.memory_space<vmem>>, %arg3: memref<1x1xf32, #tpu.memory_space<vmem>>, %arg4: memref<8x1xf32, #tpu.memory_space<vmem>>) attributes {dimension_semantics = [#tpu.dimension_semantics<parallel>], iteration_bounds = array<i64: 1>, scalar_prefetch = 0 : i64, scratch_operands = 0 : i64, tpu.core_type = #tpu.core_type<tc>, window_params = [{transform_indices = @transform_0, window_bounds = array<i64: 8, 4096>}, {pipeline_mode = #tpu.pipeline_mode<synchronous>, transform_indices = @transform_1, window_bounds = array<i64: 1, 4096>}, {pipeline_mode = #tpu.pipeline_mode<synchronous>, transform_indices = @transform_2, window_bounds = array<i64: 1, 1>}, {transform_indices = @transform_3, window_bounds = array<i64: 8, 1>}]} {
    %c0 = arith.constant 0 : index
    %c0_0 = arith.constant 0 : index
    %0 = vector.load %arg1[%c0, %c0_0] : memref<8x4096xbf16, #tpu.memory_space<vmem>>, vector<8x4096xbf16>
    %c0_1 = arith.constant 0 : index
    %c0_2 = arith.constant 0 : index
    %1 = vector.load %arg2[%c0_1, %c0_2] : memref<1x4096xbf16, #tpu.memory_space<vmem>>, vector<1x4096xbf16>
    %2 = vector.broadcast %1 : vector<1x4096xbf16> to vector<8x4096xbf16>
    %3 = arith.mulf %0, %2 : vector<8x4096xbf16>
    %4 = arith.extf %3 : vector<8x4096xbf16> to vector<8x4096xf32>
    %cst = arith.constant dense<0.000000e+00> : vector<8xf32>
    %5 = vector.multi_reduction <add>, %4, %cst [1] : vector<8x4096xf32> to vector<8xf32>
    %6 = vector.shape_cast %5 : vector<8xf32> to vector<8x1xf32>
    %c0_3 = arith.constant 0 : index
    %c0_4 = arith.constant 0 : index
    %7 = vector.load %arg3[%c0_3, %c0_4] : memref<1x1xf32, #tpu.memory_space<vmem>>, vector<1x1xf32>
    %8 = vector.broadcast %7 : vector<1x1xf32> to vector<8x1xf32>
    %9 = arith.addf %6, %8 : vector<8x1xf32>
    %10 = arith.negf %9 : vector<8x1xf32>
    %11 = math.exp %10 : vector<8x1xf32>
    %cst_5 = arith.constant 1.000000e+00 : f32
    %12 = vector.broadcast %cst_5 : f32 to vector<8x1xf32>
    %13 = arith.addf %12, %11 : vector<8x1xf32>
    %14 = arith.divf %12, %13 : vector<8x1xf32>
    %c0_6 = arith.constant 0 : index
    %c0_7 = arith.constant 0 : index
    %15 = vector.load %arg4[%c0_6, %c0_7] : memref<8x1xf32, #tpu.memory_space<vmem>>, vector<8x1xf32>
    tpu.vector_store %arg4[%c0_6, %c0_7], %14 {strides = array<i32>} : memref<8x1xf32, #tpu.memory_space<vmem>>, vector<8x1xf32>,
    return
  }
  func.func @transform_0(%arg0: i32) -> (i32, i32) {
    %c0_i32 = arith.constant 0 : i32
    %c0_i32_0 = arith.constant 0 : i32
    return %arg0, %c0_i32 : i32, i32
  }
  func.func @transform_1(%arg0: i32) -> (i32, i32) {
    %c0_i32 = arith.constant 0 : i32
    %c0_i32_0 = arith.constant 0 : i32
    %c0_i32_1 = arith.constant 0 : i32
    return %c0_i32, %c0_i32_0 : i32, i32
  }
  func.func @transform_2(%arg0: i32) -> (i32, i32) {
    %c0_i32 = arith.constant 0 : i32
    %c0_i32_0 = arith.constant 0 : i32
    %c0_i32_1 = arith.constant 0 : i32
    return %c0_i32, %c0_i32_0 : i32, i32
  }
  func.func @transform_3(%arg0: i32) -> (i32, i32) {
    %c0_i32 = arith.constant 0 : i32
    %c0_i32_0 = arith.constant 0 : i32
    return %arg0, %c0_i32 : i32, i32
  }
}

</mosaic_0001>

<bundles_post_ra>
// kernel: discriminator_forward.4
= control target key start
LH: loop header
LB: loop body
LE: loop exit
PB: predicated region body
PF: predicated region fallthrough
CT: control target
= control target key end

     0   :  { %vm270_vm0 = vcmask 392192   ;;  %s2030_s1 = inlined_call_operand.vmem [shape: bf16[48,128], index: 1, kind: input, shape index: {}]   ;;  %s2031_s0 = inlined_call_operand.vmem [shape: bf16[512,48], index: 0, kind: input, shape index: {}]   ;;  %s2032_s2 = inlined_call_operand.vmem [shape: f32[1,128], index: 2, kind: input, shape index: {}]   ;;  %s2033_s3 = inlined_call_operand.vmem [shape: bf16[512,128], index: 3, kind: output, shape index: {}]  }
   0x1   :  { %v1670_v0 = vld [vmem:[%s2030_s1 + $0x10] sm:$0xff]   ;;  %v1671_v1 = vld [vmem:[%s2030_s1 + $0x8] sm:$0xff]   ;;  %v1672_v2 = vld [vmem:[%s2030_s1] sm:$0xff]  }
   0x2   :  { %1594 = vmatprep.subr.bf16.mxu0 %v1670_v0  ;;  %1664 = vmatprep.subr.bf16.mxu1 %v1670_v0  ;;  %v1673_v3 = vld [vmem:[%s2031_s0] sm:$0xff]   ;;  %v1675_v5 = vld [vmem:[%s2031_s0 + $0x8] sm:$0xff]   ;;  %v1677_v7 = vld [vmem:[%s2031_s0 + $0x10] sm:$0xff]  }
   0x3   :  { %1595 = vmatpush3.bf16.msra.mxu0 %v1670_v0  ;;  %1667 = vmatpush3.bf16.msra.mxu1 %v1670_v0  ;;  %v1674_v4 = vld [vmem:[%s2031_s0 + $0x80] sm:$0xff]   ;;  %v1676_v6 = vld [vmem:[%s2031_s0 + $0x88] sm:$0xff]   ;;  %v1678_v8 = vld [vmem:[%s2031_s0 + $0x90] sm:$0xff]  }
   0x4   :  { %1596 = vmatprep.subr.bf16.mxu0 %v1671_v1  ;;  %1665 = vmatprep.subr.bf16.mxu1 %v1671_v1  ;;  %v1679_v9 = vld [vmem:[%s2031_s0 + $0x18] sm:$0xff]   ;;  %v1681_v11 = vld [vmem:[%s2031_s0 + $0x20] sm:$0xff]   ;;  %v1683_v13 = vld [vmem:[%s2031_s0 + $0x28] sm:$0xff]  }
   0x5   :  { %1600 = vmatprep.mubr.msk.bf16.mxu0 %vm270_vm0, %v1673_v3  ;;  %1632 = vmatprep.mubr.msk.bf16.mxu1 %vm270_vm0, %v1674_v4  ;;  %v1680_v10 = vld [vmem:[%s2031_s0 + $0x98] sm:$0xff]   ;;  %v1682_v12 = vld [vmem:[%s2031_s0 + $0xa0] sm:$0xff]   ;;  %v1684_v14 = vld [vmem:[%s2031_s0 + $0xa8] sm:$0xff]  }
   0x6   :  { %v1685_v15 = vld [vmem:[%s2031_s0 + $0x30] sm:$0xff]   ;;  %v1687_v17 = vld [vmem:[%s2031_s0 + $0x38] sm:$0xff]   ;;  %v1689_v19 = vld [vmem:[%s2031_s0 + $0x40] sm:$0xff]  }
   0x7   :  { %1597 = vmatpush3.bf16.msra.mxu0 %v1671_v1  ;;  %1668 = vmatpush3.bf16.msra.mxu1 %v1671_v1  ;;  %v1686_v16 = vld [vmem:[%s2031_s0 + $0xb0] sm:$0xff]   ;;  %v1688_v18 = vld [vmem:[%s2031_s0 + $0xb8] sm:$0xff]   ;;  %v1690_v20 = vld [vmem:[%s2031_s0 + $0xc0] sm:$0xff]  }
   0x8   :  { %1598 = vmatprep.subr.bf16.mxu0 %v1672_v2  ;;  %1666 = vmatprep.subr.bf16.mxu1 %v1672_v2  ;;  %v1691_v21 = vld [vmem:[%s2031_s0 + $0x48] sm:$0xff]   ;;  %v1693_v23 = vld [vmem:[%s2031_s0 + $0x50] sm:$0xff]   ;;  %v1695_v25 = vld [vmem:[%s2031_s0 + $0x58] sm:$0xff]  }
   0x9   :  { %v1692_v22 = vld [vmem:[%s2031_s0 + $0xc8] sm:$0xff]   ;;  %v1694_v24 = vld [vmem:[%s2031_s0 + $0xd0] sm:$0xff]   ;;  %v1696_v26 = vld [vmem:[%s2031_s0 + $0xd8] sm:$0xff]  }
   0xa   :  { %v1697_v27 = vld [vmem:[%s2031_s0 + $0x60] sm:$0xff]   ;;  %v1699_v29 = vld [vmem:[%s2031_s0 + $0x68] sm:$0xff]   ;;  %v1701_v31 = vld [vmem:[%s2031_s0 + $0x70] sm:$0xff]  }
   0xb   :  { %1599 = vmatpush3.bf16.msra.mxu0 %v1672_v2  ;;  %1669 = vmatpush3.bf16.msra.mxu1 %v1672_v2  ;;  %v1698_v28 = vld [vmem:[%s2031_s0 + $0xe0] sm:$0xff]   ;;  %v1700_v30 = vld [vmem:[%s2031_s0 + $0xe8] sm:$0xff]   ;;  %v1702_v32 = vld [vmem:[%s2031_s0 + $0xf0] sm:$0xff]  }
   0xc   :  { %v1703_v33 = vld [vmem:[%s2031_s0 + $0x78] sm:$0xff]   ;;  %v1865_v35 = vld [vmem:[%s2032_s2] ss:$0 sm:$0xff] }
   0xd   :  { %v1704_v34 = vld [vmem:[%s2031_s0 + $0xf8] sm:$0xff]  }
   0xe   :  { %1601 = vmatmul.mubr.msk.bf16.vlgmr.msra.gmra.mxu0 %vm270_vm0, %v1675_v5  ;;  %1633 = vmatmul.mubr.msk.bf16.vlgmr.msra.gmra.mxu1 %vm270_vm0, %v1676_v6 }
   0xf   :  { %1604 = vmatprep.mubr.msk.bf16.mxu0 %vm270_vm0, %v1677_v7  ;;  %1636 = vmatprep.mubr.msk.bf16.mxu1 %vm270_vm0, %v1678_v8 }
  0x16   :  { %1605 = vmatmul.mubr.msk.bf16.gmra.mxu0 %vm270_vm0, %v1679_v9  ;;  %1637 = vmatmul.mubr.msk.bf16.gmra.mxu1 %vm270_vm0, %v1680_v10 }
  0x17   :  { %1608 = vmatprep.mubr.msk.bf16.mxu0 %vm270_vm0, %v1681_v11  ;;  %1640 = vmatprep.mubr.msk.bf16.mxu1 %vm270_vm0, %v1682_v12 }
  0x1e   :  { %1609 = vmatmul.mubr.msk.bf16.gmra.mxu0 %vm270_vm0, %v1683_v13  ;;  %1641 = vmatmul.mubr.msk.bf16.gmra.mxu1 %vm270_vm0, %v1684_v14 }
  0x1f   :  { %1612 = vmatprep.mubr.msk.bf16.mxu0 %vm270_vm0, %v1685_v15  ;;  %1644 = vmatprep.mubr.msk.bf16.mxu1 %vm270_vm0, %v1686_v16 }
  0x26   :  { %1613 = vmatmul.mubr.msk.bf16.gmra.mxu0 %vm270_vm0, %v1687_v17  ;;  %1645 = vmatmul.mubr.msk.bf16.gmra.mxu1 %vm270_vm0, %v1688_v18 }
  0x27   :  { %1616 = vmatprep.mubr.msk.bf16.mxu0 %vm270_vm0, %v1689_v19  ;;  %1648 = vmatprep.mubr.msk.bf16.mxu1 %vm270_vm0, %v1690_v20 }
  0x2e   :  { %1617 = vmatmul.mubr.msk.bf16.gmra.mxu0 %vm270_vm0, %v1691_v21  ;;  %1649 = vmatmul.mubr.msk.bf16.gmra.mxu1 %vm270_vm0, %v1692_v22 }
  0x2f   :  { %1620 = vmatprep.mubr.msk.bf16.mxu0 %vm270_vm0, %v1693_v23  ;;  %1652 = vmatprep.mubr.msk.bf16.mxu1 %vm270_vm0, %v1694_v24 }
  0x36   :  { %1621 = vmatmul.mubr.msk.bf16.gmra.mxu0 %vm270_vm0, %v1695_v25  ;;  %1653 = vmatmul.mubr.msk.bf16.gmra.mxu1 %vm270_vm0, %v1696_v26 }
  0x37   :  { %1624 = vmatprep.mubr.msk.bf16.mxu0 %vm270_vm0, %v1697_v27  ;;  %1656 = vmatprep.mubr.msk.bf16.mxu1 %vm270_vm0, %v1698_v28 }
  0x3e   :  { %1625 = vmatmul.mubr.msk.bf16.gmra.mxu0 %vm270_vm0, %v1699_v29  ;;  %1657 = vmatmul.mubr.msk.bf16.gmra.mxu1 %vm270_vm0, %v1700_v30 }
  0x3f   :  { %1628 = vmatprep.mubr.msk.bf16.mxu0 %vm270_vm0, %v1701_v31  ;;  %1660 = vmatprep.mubr.msk.bf16.mxu1 %vm270_vm0, %v1702_v32 }
  0x46   :  { %1629 = vmatmul.mubr.msk.bf16.gmra.mxu0 %vm270_vm0, %v1703_v33  ;;  %1661 = vmatmul.mubr.msk.bf16.gmra.mxu1 %vm270_vm0, %v1704_v34 }
  0xce   :  { %v1602_v36 = vpop.f32.mrf.mxu0  ;;  %v1634_v37 = vpop.f32.mrf.mxu1 }
  0xcf   :  { %v410_v38 = vadd.f32 %v1602_v36, %v1865_v35  ;;  %v538_v39 = vadd.f32 %v1634_v37, %v1865_v35 }
  0xd0   :  { %v401_v40 = vpop.f32.mrf.mxu0  ;;  %v529_v41 = vpop.f32.mrf.mxu1 }
  0xd1   :  { %vm658_vm1 = vcmp.gt.f32.partialorder %v410_v38, 0.0  ;;  %v722_v42 = vmul.f32 0.2, %v410_v38  ;;  %vm690_vm2 = vcmp.gt.f32.partialorder %v538_v39, 0.0  ;;  %v754_v43 = vmul.f32 0.2, %v538_v39 }
  0xd2   :  { %v402_v44 = vadd.f32 %v1865_v35, %v401_v40  ;;  %v530_v45 = vadd.f32 %v1865_v35, %v529_v41  ;;  %v1603_v46 = vpop.f32.mrf.mxu0  ;;  %v1635_v47 = vpop.f32.mrf.mxu1 }
  0xd3   :  { %v786_v48 = vsel %vm658_vm1, %v410_v38, %v722_v42  ;;  %v413_v49 = vadd.f32 %v1603_v46, %v1865_v35  ;;  %v541_v50 = vadd.f32 %v1635_v47, %v1865_v35  ;;  %v818_v51 = vsel %vm690_vm2, %v538_v39, %v754_v43 }
  0xd4   :  { %vm656_vm3 = vcmp.gt.f32.partialorder %v402_v44, 0.0  ;;  %v720_v52 = vmul.f32 0.2, %v402_v44  ;;  %vm688_vm4 = vcmp.gt.f32.partialorder %v530_v45, 0.0  ;;  %v404_v53 = vpop.f32.mrf.mxu0  ;;  %v532_v54 = vpop.f32.mrf.mxu1  ;;  %v752_v58 = vmul.f32 0.2, %v530_v45 }
  0xd5   :  { %vm659_vm5 = vcmp.gt.f32.partialorder %v413_v49, 0.0  ;;  %v723_v55 = vmul.f32 0.2, %v413_v49  ;;  %vm691_vm6 = vcmp.gt.f32.partialorder %v541_v50, 0.0  ;;  %v755_v56 = vmul.f32 0.2, %v541_v50 }
  0xd6   :  { %v784_v57 = vsel %vm656_vm3, %v402_v44, %v720_v52  ;;  %v405_v59 = vadd.f32 %v1865_v35, %v404_v53  ;;  %v533_v60 = vadd.f32 %v1865_v35, %v532_v54  ;;  %v1606_v61 = vpop.f32.mrf.mxu0  ;;  %v1638_v62 = vpop.f32.mrf.mxu1  ;;  %v816_v10 = vsel %vm688_vm4, %v530_v45, %v752_v58 }
  0xd7   :  { %v787_v63 = vsel %vm659_vm5, %v413_v49, %v723_v55  ;;  %v819_v0 = vsel %vm691_vm6, %v541_v50, %v755_v56  ;;  %v426_v1 = vadd.f32 %v1606_v61, %v1865_v35  ;;  %v554_v2 = vadd.f32 %v1638_v62, %v1865_v35 }
  0xd8   :  { %v1376_v3 = vpack.c.bf16 %v787_v63, %v786_v48  ;;  %v1456_v4 = vpack.c.bf16 %v819_v0, %v818_v51  ;;  %vm657_vm7 = vcmp.gt.f32.partialorder %v405_v59, 0.0  ;;  %v721_v5 = vmul.f32 0.2, %v405_v59  ;;  %v417_v6 = vpop.f32.mrf.mxu0  ;;  %v545_v7 = vpop.f32.mrf.mxu1 }
  0xd9   :  { %vm689_vm8 = vcmp.gt.f32.partialorder %v533_v60, 0.0  ;;  %v753_v8 = vmul.f32 0.2, %v533_v60  ;;  %vm662_vm9 = vcmp.gt.f32.partialorder %v426_v1, 0.0  ;;  %v726_v9 = vmul.f32 0.2, %v426_v1 }
  0xda   :  { %1528 = vst [vmem:[%s2033_s3 + $0x8] sm:$0xff] %v1376_v3   ;;  %1544 = vst [vmem:[%s2033_s3 + $0x88] sm:$0xff] %v1456_v4   ;;  %v785_v11 = vsel %vm657_vm7, %v405_v59, %v721_v5  ;;  %v758_v12 = vmul.f32 0.2, %v554_v2  ;;  %v418_v13 = vadd.f32 %v1865_v35, %v417_v6  ;;  %v1607_v14 = vpop.f32.mrf.mxu0  ;;  %v1639_v15 = vpop.f32.mrf.mxu1  ;;  %vm694_vm10 = vcmp.gt.f32.partialorder %v554_v2, 0.0 }
  0xdb   :  { %v1371_v16 = vpack.c.bf16 %v785_v11, %v784_v57  ;;  %v817_v17 = vsel %vm689_vm8, %v533_v60, %v753_v8  ;;  %v546_v18 = vadd.f32 %v1865_v35, %v545_v7  ;;  %v790_v20 = vsel %vm662_vm9, %v426_v1, %v726_v9 }
  0xdc   :  { %v1451_v19 = vpack.c.bf16 %v817_v17, %v816_v10  ;;  %vm660_vm11 = vcmp.gt.f32.partialorder %v418_v13, 0.0  ;;  %v724_v21 = vmul.f32 0.2, %v418_v13  ;;  %v420_v22 = vpop.f32.mrf.mxu0  ;;  %v548_v23 = vpop.f32.mrf.mxu1  ;;  %v429_v25 = vadd.f32 %v1607_v14, %v1865_v35 }
  0xdd   :  { %1372 = vst [vmem:[%s2033_s3] sm:$0xff] %v1371_v16   ;;  %vm692_vm12 = vcmp.gt.f32.partialorder %v546_v18, 0.0  ;;  %v756_v24 = vmul.f32 0.2, %v546_v18  ;;  %v557_v26 = vadd.f32 %v1639_v15, %v1865_v35  ;;  %v822_v27 = vsel %vm694_vm10, %v554_v2, %v758_v12 }
  0xde   :  { %1543 = vst [vmem:[%s2033_s3 + $0x80] sm:$0xff] %v1451_v19   ;;  %v788_v28 = vsel %vm660_vm11, %v418_v13, %v724_v21  ;;  %v421_v29 = vadd.f32 %v1865_v35, %v420_v22  ;;  %v549_v30 = vadd.f32 %v1865_v35, %v548_v23  ;;  %v1610_v31 = vpop.f32.mrf.mxu0  ;;  %v1642_v32 = vpop.f32.mrf.mxu1  ;;  %vm663_vm13 = vcmp.gt.f32.partialorder %v429_v25, 0.0 }
  0xdf   :  { %v820_v33 = vsel %vm692_vm12, %v546_v18, %v756_v24  ;;  %v727_v34 = vmul.f32 0.2, %v429_v25  ;;  %vm695_vm14 = vcmp.gt.f32.partialorder %v557_v26, 0.0  ;;  %v759_v36 = vmul.f32 0.2, %v557_v26 }
  0xe0   :  { %vm661_vm15 = vcmp.gt.f32.partialorder %v421_v29, 0.0  ;;  %v725_v37 = vmul.f32 0.2, %v421_v29  ;;  %vm693_vm0 = vcmp.gt.f32.partialorder %v549_v30, 0.0  ;;  %v433_v38 = vpop.f32.mrf.mxu0  ;;  %v561_v39 = vpop.f32.mrf.mxu1  ;;  %v757_v41 = vmul.f32 0.2, %v549_v30 }
  0xe1   :  { %v791_v40 = vsel %vm663_vm13, %v429_v25, %v727_v34  ;;  %v442_v42 = vadd.f32 %v1610_v31, %v1865_v35  ;;  %v570_v43 = vadd.f32 %v1642_v32, %v1865_v35  ;;  %v823_v45 = vsel %vm695_vm14, %v557_v26, %v759_v36 }
  0xe2   :  { %v1386_v44 = vpack.c.bf16 %v791_v40, %v790_v20  ;;  %v789_v46 = vsel %vm661_vm15, %v421_v29, %v725_v37  ;;  %v434_v47 = vadd.f32 %v1865_v35, %v433_v38  ;;  %v1611_v48 = vpop.f32.mrf.mxu0  ;;  %v1643_v49 = vpop.f32.mrf.mxu1  ;;  %v1466_v50 = vpack.c.bf16 %v823_v45, %v822_v27 }
  0xe3   :  { %v1381_v51 = vpack.c.bf16 %v789_v46, %v788_v28  ;;  %v821_v52 = vsel %vm693_vm0, %v549_v30, %v757_v41  ;;  %vm666_vm1 = vcmp.gt.f32.partialorder %v442_v42, 0.0  ;;  %v730_v54 = vmul.f32 0.2, %v442_v42 }
  0xe4   :  { %1530 = vst [vmem:[%s2033_s3 + $0x18] sm:$0xff] %v1386_v44   ;;  %v1461_v53 = vpack.c.bf16 %v821_v52, %v820_v33  ;;  %vm698_vm2 = vcmp.gt.f32.partialorder %v570_v43, 0.0  ;;  %v762_v55 = vmul.f32 0.2, %v570_v43  ;;  %v436_v56 = vpop.f32.mrf.mxu0  ;;  %v564_v57 = vpop.f32.mrf.mxu1  ;;  %1546 = vst [vmem:[%s2033_s3 + $0x98] sm:$0xff] %v1466_v50   ;;  %vm664_vm3 = vcmp.gt.f32.partialorder %v434_v47, 0.0 }
  0xe5   :  { %1529 = vst [vmem:[%s2033_s3 + $0x10] sm:$0xff] %v1381_v51   ;;  %v728_v58 = vmul.f32 0.2, %v434_v47  ;;  %v562_v59 = vadd.f32 %v1865_v35, %v561_v39  ;;  %v445_v60 = vadd.f32 %v1611_v48, %v1865_v35  ;;  %v794_v61 = vsel %vm666_vm1, %v442_v42, %v730_v54 }
  0xe6   :  { %1545 = vst [vmem:[%s2033_s3 + $0x90] sm:$0xff] %v1461_v53   ;;  %v826_v62 = vsel %vm698_vm2, %v570_v43, %v762_v55  ;;  %v573_v63 = vadd.f32 %v1643_v49, %v1865_v35  ;;  %v437_v0 = vadd.f32 %v1865_v35, %v436_v56  ;;  %v1614_v1 = vpop.f32.mrf.mxu0  ;;  %v1646_v2 = vpop.f32.mrf.mxu1  ;;  %v565_v11 = vadd.f32 %v1865_v35, %v564_v57 }
  0xe7   :  { %v792_v3 = vsel %vm664_vm3, %v434_v47, %v728_v58  ;;  %vm696_vm4 = vcmp.gt.f32.partialorder %v562_v59, 0.0  ;;  %v760_v4 = vmul.f32 0.2, %v562_v59  ;;  %vm667_vm5 = vcmp.gt.f32.partialorder %v445_v60, 0.0 }
  0xe8   :  { %v731_v5 = vmul.f32 0.2, %v445_v60  ;;  %vm699_vm6 = vcmp.gt.f32.partialorder %v573_v63, 0.0  ;;  %v763_v6 = vmul.f32 0.2, %v573_v63  ;;  %vm665_vm7 = vcmp.gt.f32.partialorder %v437_v0, 0.0  ;;  %v449_v7 = vpop.f32.mrf.mxu0  ;;  %v577_v8 = vpop.f32.mrf.mxu1 }
  0xe9   :  { %v824_v9 = vsel %vm696_vm4, %v562_v59, %v760_v4  ;;  %v729_v10 = vmul.f32 0.2, %v437_v0  ;;  %v458_v12 = vadd.f32 %v1614_v1, %v1865_v35  ;;  %v586_v15 = vadd.f32 %v1646_v2, %v1865_v35 }
  0xea   :  { %v795_v13 = vsel %vm667_vm5, %v445_v60, %v731_v5  ;;  %v827_v14 = vsel %vm699_vm6, %v573_v63, %v763_v6  ;;  %v450_v16 = vadd.f32 %v1865_v35, %v449_v7  ;;  %v1615_v17 = vpop.f32.mrf.mxu0  ;;  %v1647_v18 = vpop.f32.mrf.mxu1  ;;  %vm697_vm8 = vcmp.gt.f32.partialorder %v565_v11, 0.0 }
  0xeb   :  { %v1396_v19 = vpack.c.bf16 %v795_v13, %v794_v61  ;;  %v1476_v20 = vpack.c.bf16 %v827_v14, %v826_v62  ;;  %v793_v21 = vsel %vm665_vm7, %v437_v0, %v729_v10  ;;  %v761_v23 = vmul.f32 0.2, %v565_v11 }
  0xec   :  { %v1391_v22 = vpack.c.bf16 %v793_v21, %v792_v3  ;;  %vm670_vm9 = vcmp.gt.f32.partialorder %v458_v12, 0.0  ;;  %v734_v24 = vmul.f32 0.2, %v458_v12  ;;  %v452_v25 = vpop.f32.mrf.mxu0  ;;  %v580_v26 = vpop.f32.mrf.mxu1  ;;  %vm702_vm10 = vcmp.gt.f32.partialorder %v586_v15, 0.0 }
  0xed   :  { %1532 = vst [vmem:[%s2033_s3 + $0x28] sm:$0xff] %v1396_v19   ;;  %1548 = vst [vmem:[%s2033_s3 + $0xa8] sm:$0xff] %v1476_v20   ;;  %v766_v27 = vmul.f32 0.2, %v586_v15  ;;  %vm668_vm11 = vcmp.gt.f32.partialorder %v450_v16, 0.0  ;;  %v825_v29 = vsel %vm697_vm8, %v565_v11, %v761_v23  ;;  %v578_v31 = vadd.f32 %v1865_v35, %v577_v8 }
  0xee   :  { %v732_v28 = vmul.f32 0.2, %v450_v16  ;;  %1531 = vst [vmem:[%s2033_s3 + $0x20] sm:$0xff] %v1391_v22   ;;  %v798_v30 = vsel %vm670_vm9, %v458_v12, %v734_v24  ;;  %v461_v32 = vadd.f32 %v1615_v17, %v1865_v35  ;;  %v1618_v33 = vpop.f32.mrf.mxu0  ;;  %v1650_v34 = vpop.f32.mrf.mxu1  ;;  %v1471_v36 = vpack.c.bf16 %v825_v29, %v824_v9 }
  0xef   :  { %v830_v37 = vsel %vm702_vm10, %v586_v15, %v766_v27  ;;  %v589_v39 = vadd.f32 %v1647_v18, %v1865_v35  ;;  %vm700_vm12 = vcmp.gt.f32.partialorder %v578_v31, 0.0  ;;  %v764_v40 = vmul.f32 0.2, %v578_v31 }
  0xf0   :  { %v796_v38 = vsel %vm668_vm11, %v450_v16, %v732_v28  ;;  %vm671_vm13 = vcmp.gt.f32.partialorder %v461_v32, 0.0  ;;  %v735_v41 = vmul.f32 0.2, %v461_v32  ;;  %v465_v42 = vpop.f32.mrf.mxu0  ;;  %v593_v43 = vpop.f32.mrf.mxu1  ;;  %1547 = vst [vmem:[%s2033_s3 + $0xa0] sm:$0xff] %v1471_v36   ;;  %v453_v45 = vadd.f32 %v1865_v35, %v452_v25 }
  0xf1   :  { %vm703_vm14 = vcmp.gt.f32.partialorder %v589_v39, 0.0  ;;  %v767_v44 = vmul.f32 0.2, %v589_v39  ;;  %v581_v46 = vadd.f32 %v1865_v35, %v580_v26  ;;  %v828_v47 = vsel %vm700_vm12, %v578_v31, %v764_v40 }
  0xf2   :  { %v799_v48 = vsel %vm671_vm13, %v461_v32, %v735_v41  ;;  %v474_v49 = vadd.f32 %v1618_v33, %v1865_v35  ;;  %v602_v50 = vadd.f32 %v1650_v34, %v1865_v35  ;;  %v1619_v51 = vpop.f32.mrf.mxu0  ;;  %v1651_v52 = vpop.f32.mrf.mxu1  ;;  %vm669_vm15 = vcmp.gt.f32.partialorder %v453_v45, 0.0 }
  0xf3   :  { %v1406_v53 = vpack.c.bf16 %v799_v48, %v798_v30  ;;  %v831_v54 = vsel %vm703_vm14, %v589_v39, %v767_v44  ;;  %v733_v55 = vmul.f32 0.2, %v453_v45  ;;  %vm701_vm0 = vcmp.gt.f32.partialorder %v581_v46, 0.0 }
  0xf4   :  { %v1486_v56 = vpack.c.bf16 %v831_v54, %v830_v37  ;;  %v765_v57 = vmul.f32 0.2, %v581_v46  ;;  %vm674_vm1 = vcmp.gt.f32.partialorder %v474_v49, 0.0  ;;  %v468_v58 = vpop.f32.mrf.mxu0  ;;  %v596_v59 = vpop.f32.mrf.mxu1  ;;  %v738_v61 = vmul.f32 0.2, %v474_v49 }
  0xf5   :  { %1534 = vst [vmem:[%s2033_s3 + $0x38] sm:$0xff] %v1406_v53   ;;  %v797_v60 = vsel %vm669_vm15, %v453_v45, %v733_v55  ;;  %vm706_vm2 = vcmp.gt.f32.partialorder %v602_v50, 0.0  ;;  %v770_v62 = vmul.f32 0.2, %v602_v50  ;;  %v466_v1 = vadd.f32 %v1865_v35, %v465_v42 }
  0xf6   :  { %1550 = vst [vmem:[%s2033_s3 + $0xb8] sm:$0xff] %v1486_v56   ;;  %v1401_v63 = vpack.c.bf16 %v797_v60, %v796_v38  ;;  %v829_v0 = vsel %vm701_vm0, %v581_v46, %v765_v57  ;;  %v594_v2 = vadd.f32 %v1865_v35, %v593_v43  ;;  %v1622_v3 = vpop.f32.mrf.mxu0  ;;  %v1654_v4 = vpop.f32.mrf.mxu1  ;;  %v802_v6 = vsel %vm674_vm1, %v474_v49, %v738_v61 }
  0xf7   :  { %v1481_v5 = vpack.c.bf16 %v829_v0, %v828_v47  ;;  %v834_v7 = vsel %vm706_vm2, %v602_v50, %v770_v62  ;;  %v477_v8 = vadd.f32 %v1619_v51, %v1865_v35  ;;  %vm672_vm3 = vcmp.gt.f32.partialorder %v466_v1, 0.0 }
  0xf8   :  { %1533 = vst [vmem:[%s2033_s3 + $0x30] sm:$0xff] %v1401_v63   ;;  %v736_v9 = vmul.f32 0.2, %v466_v1  ;;  %vm704_vm4 = vcmp.gt.f32.partialorder %v594_v2, 0.0  ;;  %v768_v10 = vmul.f32 0.2, %v594_v2  ;;  %v481_v11 = vpop.f32.mrf.mxu0  ;;  %v609_v12 = vpop.f32.mrf.mxu1  ;;  %v605_v14 = vadd.f32 %v1651_v52, %v1865_v35 }
  0xf9   :  { %1549 = vst [vmem:[%s2033_s3 + $0xb0] sm:$0xff] %v1481_v5   ;;  %vm675_vm5 = vcmp.gt.f32.partialorder %v477_v8, 0.0  ;;  %v739_v13 = vmul.f32 0.2, %v477_v8  ;;  %v469_v15 = vadd.f32 %v1865_v35, %v468_v58  ;;  %v597_v18 = vadd.f32 %v1865_v35, %v596_v59 }
  0xfa   :  { %v800_v16 = vsel %vm672_vm3, %v466_v1, %v736_v9  ;;  %v832_v17 = vsel %vm704_vm4, %v594_v2, %v768_v10  ;;  %v490_v19 = vadd.f32 %v1622_v3, %v1865_v35  ;;  %v1623_v20 = vpop.f32.mrf.mxu0  ;;  %v1655_v21 = vpop.f32.mrf.mxu1  ;;  %vm707_vm6 = vcmp.gt.f32.partialorder %v605_v14, 0.0 }
  0xfb   :  { %v803_v22 = vsel %vm675_vm5, %v477_v8, %v739_v13  ;;  %v771_v23 = vmul.f32 0.2, %v605_v14  ;;  %vm673_vm7 = vcmp.gt.f32.partialorder %v469_v15, 0.0  ;;  %v737_v25 = vmul.f32 0.2, %v469_v15 }
  0xfc   :  { %v1416_v24 = vpack.c.bf16 %v803_v22, %v802_v6  ;;  %vm705_vm8 = vcmp.gt.f32.partialorder %v597_v18, 0.0  ;;  %v769_v26 = vmul.f32 0.2, %v597_v18  ;;  %v484_v27 = vpop.f32.mrf.mxu0  ;;  %v612_v28 = vpop.f32.mrf.mxu1  ;;  %vm678_vm9 = vcmp.gt.f32.partialorder %v490_v19, 0.0 }
  0xfd   :  { %v835_v29 = vsel %vm707_vm6, %v605_v14, %v771_v23  ;;  %v742_v30 = vmul.f32 0.2, %v490_v19  ;;  %v618_v31 = vadd.f32 %v1654_v4, %v1865_v35  ;;  %v801_v33 = vsel %vm673_vm7, %v469_v15, %v737_v25 }
  0xfe   :  { %1536 = vst [vmem:[%s2033_s3 + $0x48] sm:$0xff] %v1416_v24   ;;  %v1496_v32 = vpack.c.bf16 %v835_v29, %v834_v7  ;;  %v833_v34 = vsel %vm705_vm8, %v597_v18, %v769_v26  ;;  %v482_v36 = vadd.f32 %v1865_v35, %v481_v11  ;;  %v1626_v37 = vpop.f32.mrf.mxu0  ;;  %v1658_v38 = vpop.f32.mrf.mxu1  ;;  %v1411_v39 = vpack.c.bf16 %v801_v33, %v800_v16 }
  0xff   :  { %v1491_v40 = vpack.c.bf16 %v833_v34, %v832_v17  ;;  %v806_v41 = vsel %vm678_vm9, %v490_v19, %v742_v30  ;;  %vm710_vm10 = vcmp.gt.f32.partialorder %v618_v31, 0.0  ;;  %v774_v42 = vmul.f32 0.2, %v618_v31 }
 0x100   :  { %1552 = vst [vmem:[%s2033_s3 + $0xc8] sm:$0xff] %v1496_v32   ;;  %vm676_vm11 = vcmp.gt.f32.partialorder %v482_v36, 0.0  ;;  %v740_v43 = vmul.f32 0.2, %v482_v36  ;;  %v610_v44 = vadd.f32 %v1865_v35, %v609_v12  ;;  %v497_v45 = vpop.f32.mrf.mxu0  ;;  %v625_v46 = vpop.f32.mrf.mxu1  ;;  %1535 = vst [vmem:[%s2033_s3 + $0x40] sm:$0xff] %v1411_v39   ;;  %v493_v47 = vadd.f32 %v1623_v20, %v1865_v35 }
 0x101   :  { %1551 = vst [vmem:[%s2033_s3 + $0xc0] sm:$0xff] %v1491_v40   ;;  %v621_v48 = vadd.f32 %v1655_v21, %v1865_v35  ;;  %v485_v49 = vadd.f32 %v1865_v35, %v484_v27  ;;  %v613_v50 = vadd.f32 %v1865_v35, %v612_v28  ;;  %v838_v51 = vsel %vm710_vm10, %v618_v31, %v774_v42 }
 0x102   :  { %v804_v52 = vsel %vm676_vm11, %v482_v36, %v740_v43  ;;  %vm708_vm12 = vcmp.gt.f32.partialorder %v610_v44, 0.0  ;;  %v772_v53 = vmul.f32 0.2, %v610_v44  ;;  %v1627_v54 = vpop.f32.mrf.mxu0  ;;  %v1659_v55 = vpop.f32.mrf.mxu1  ;;  %vm679_vm13 = vcmp.gt.f32.partialorder %v493_v47, 0.0 }
 0x103   :  { %v743_v56 = vmul.f32 0.2, %v493_v47  ;;  %vm711_vm14 = vcmp.gt.f32.partialorder %v621_v48, 0.0  ;;  %v775_v57 = vmul.f32 0.2, %v621_v48  ;;  %vm677_vm15 = vcmp.gt.f32.partialorder %v485_v49, 0.0 }
 0x104   :  { %v836_v58 = vsel %vm708_vm12, %v610_v44, %v772_v53  ;;  %v741_v59 = vmul.f32 0.2, %v485_v49  ;;  %vm709_vm0 = vcmp.gt.f32.partialorder %v613_v50, 0.0  ;;  %v500_v60 = vpop.f32.mrf.mxu0  ;;  %v628_v61 = vpop.f32.mrf.mxu1  ;;  %v773_v0 = vmul.f32 0.2, %v613_v50 }
 0x105   :  { %v807_v62 = vsel %vm679_vm13, %v493_v47, %v743_v56  ;;  %v839_v63 = vsel %vm711_vm14, %v621_v48, %v775_v57  ;;  %v506_v1 = vadd.f32 %v1626_v37, %v1865_v35  ;;  %v634_v5 = vadd.f32 %v1658_v38, %v1865_v35 }
 0x106   :  { %v1426_v2 = vpack.c.bf16 %v807_v62, %v806_v41  ;;  %v1506_v3 = vpack.c.bf16 %v839_v63, %v838_v51  ;;  %v805_v4 = vsel %vm677_vm15, %v485_v49, %v741_v59  ;;  %v1630_v6 = vpop.f32.mrf.mxu0  ;;  %v1662_v7 = vpop.f32.mrf.mxu1  ;;  %v837_v9 = vsel %vm709_vm0, %v613_v50, %v773_v0 }
 0x107   :  { %v1421_v8 = vpack.c.bf16 %v805_v4, %v804_v52  ;;  %vm682_vm1 = vcmp.gt.f32.partialorder %v506_v1, 0.0  ;;  %v746_v10 = vmul.f32 0.2, %v506_v1  ;;  %v1501_v11 = vpack.c.bf16 %v837_v9, %v836_v58 }
 0x108   :  { %1538 = vst [vmem:[%s2033_s3 + $0x58] sm:$0xff] %v1426_v2   ;;  %1554 = vst [vmem:[%s2033_s3 + $0xd8] sm:$0xff] %v1506_v3   ;;  %vm714_vm2 = vcmp.gt.f32.partialorder %v634_v5, 0.0  ;;  %v778_v12 = vmul.f32 0.2, %v634_v5  ;;  %v498_v13 = vadd.f32 %v1865_v35, %v497_v45  ;;  %v626_v14 = vadd.f32 %v1865_v35, %v625_v46  ;;  %v513_v20 = vpop.f32.mrf.mxu0  ;;  %v641_v21 = vpop.f32.mrf.mxu1 }
 0x109   :  { %1537 = vst [vmem:[%s2033_s3 + $0x50] sm:$0xff] %v1421_v8   ;;  %v509_v15 = vadd.f32 %v1627_v54, %v1865_v35  ;;  %v637_v16 = vadd.f32 %v1659_v55, %v1865_v35  ;;  %1553 = vst [vmem:[%s2033_s3 + $0xd0] sm:$0xff] %v1501_v11   ;;  %v810_v17 = vsel %vm682_vm1, %v506_v1, %v746_v10 }
 0x10a   :  { %vm680_vm3 = vcmp.gt.f32.partialorder %v498_v13, 0.0  ;;  %v744_v18 = vmul.f32 0.2, %v498_v13  ;;  %v501_v19 = vadd.f32 %v1865_v35, %v500_v60  ;;  %v842_v22 = vsel %vm714_vm2, %v634_v5, %v778_v12  ;;  %v1631_v34 = vpop.f32.mrf.mxu0  ;;  %v1663_v36 = vpop.f32.mrf.mxu1 }
 0x10b   :  { %vm712_vm4 = vcmp.gt.f32.partialorder %v626_v14, 0.0  ;;  %vm683_vm5 = vcmp.gt.f32.partialorder %v509_v15, 0.0  ;;  %v747_v23 = vmul.f32 0.2, %v509_v15  ;;  %v776_v24 = vmul.f32 0.2, %v626_v14 }
 0x10c   :  { %vm715_vm6 = vcmp.gt.f32.partialorder %v637_v16, 0.0  ;;  %v779_v25 = vmul.f32 0.2, %v637_v16  ;;  %vm681_vm7 = vcmp.gt.f32.partialorder %v501_v19, 0.0  ;;  %v808_v26 = vsel %vm680_vm3, %v498_v13, %v744_v18  ;;  %v516_v50 = vpop.f32.mrf.mxu0  ;;  %v644_v51 = vpop.f32.mrf.mxu1 }
 0x10d   :  { %v811_v27 = vsel %vm683_vm5, %v509_v15, %v747_v23  ;;  %v745_v28 = vmul.f32 0.2, %v501_v19  ;;  %v629_v29 = vadd.f32 %v1865_v35, %v628_v61  ;;  %v522_v32 = vadd.f32 %v1630_v6, %v1865_v35 }
 0x10e   :  { %v1436_v30 = vpack.c.bf16 %v811_v27, %v810_v17  ;;  %v843_v31 = vsel %vm715_vm6, %v637_v16, %v779_v25  ;;  %v650_v33 = vadd.f32 %v1662_v7, %v1865_v35  ;;  %v840_v40 = vsel %vm712_vm4, %v626_v14, %v776_v24 }
 0x10f   :  { %v1516_v37 = vpack.c.bf16 %v843_v31, %v842_v22  ;;  %v809_v38 = vsel %vm681_vm7, %v501_v19, %v745_v28  ;;  %vm713_vm8 = vcmp.gt.f32.partialorder %v629_v29, 0.0  ;;  %v777_v39 = vmul.f32 0.2, %v629_v29 }
 0x110   :  { %1540 = vst [vmem:[%s2033_s3 + $0x68] sm:$0xff] %v1436_v30   ;;  %v1431_v41 = vpack.c.bf16 %v809_v38, %v808_v26  ;;  %vm686_vm9 = vcmp.gt.f32.partialorder %v522_v32, 0.0  ;;  %v750_v42 = vmul.f32 0.2, %v522_v32  ;;  %vm718_vm10 = vcmp.gt.f32.partialorder %v650_v33, 0.0 }
 0x111   :  { %1556 = vst [vmem:[%s2033_s3 + $0xe8] sm:$0xff] %v1516_v37   ;;  %v841_v43 = vsel %vm713_vm8, %v629_v29, %v777_v39  ;;  %v782_v44 = vmul.f32 0.2, %v650_v33  ;;  %v514_v45 = vadd.f32 %v1865_v35, %v513_v20  ;;  %v642_v47 = vadd.f32 %v1865_v35, %v641_v21 }
 0x112   :  { %1539 = vst [vmem:[%s2033_s3 + $0x60] sm:$0xff] %v1431_v41   ;;  %v1511_v46 = vpack.c.bf16 %v841_v43, %v840_v40  ;;  %v525_v48 = vadd.f32 %v1631_v34, %v1865_v35  ;;  %v653_v49 = vadd.f32 %v1663_v36, %v1865_v35  ;;  %v814_v52 = vsel %vm686_vm9, %v522_v32, %v750_v42 }
 0x113   :  { %v846_v53 = vsel %vm718_vm10, %v650_v33, %v782_v44  ;;  %v748_v55 = vmul.f32 0.2, %v514_v45  ;;  %v517_v57 = vadd.f32 %v1865_v35, %v516_v50  ;;  %v645_v58 = vadd.f32 %v1865_v35, %v644_v51 }
 0x114   :  { %1555 = vst [vmem:[%s2033_s3 + $0xe0] sm:$0xff] %v1511_v46   ;;  %vm687_vm11 = vcmp.gt.f32.partialorder %v525_v48, 0.0  ;;  %v751_v54 = vmul.f32 0.2, %v525_v48  ;;  %vm719_vm12 = vcmp.gt.f32.partialorder %v653_v49, 0.0  ;;  %vm684_vm13 = vcmp.gt.f32.partialorder %v514_v45, 0.0 }
 0x115   :  { %v783_v56 = vmul.f32 0.2, %v653_v49  ;;  %vm716_vm14 = vcmp.gt.f32.partialorder %v642_v47, 0.0  ;;  %v780_v59 = vmul.f32 0.2, %v642_v47  ;;  %vm685_vm15 = vcmp.gt.f32.partialorder %v517_v57, 0.0 }
 0x116   :  { %v815_v60 = vsel %vm687_vm11, %v525_v48, %v751_v54  ;;  %v749_v63 = vmul.f32 0.2, %v517_v57  ;;  %vm717_vm0 = vcmp.gt.f32.partialorder %v645_v58, 0.0  ;;  %v781_v1 = vmul.f32 0.2, %v645_v58 }
 0x117   :  { %v1446_v61 = vpack.c.bf16 %v815_v60, %v814_v52  ;;  %v847_v62 = vsel %vm719_vm12, %v653_v49, %v783_v56  ;;  %v812_v2 = vsel %vm684_vm13, %v514_v45, %v748_v55  ;;  %v844_v4 = vsel %vm716_vm14, %v642_v47, %v780_v59 }
 0x118   :  { %v1526_v0 = vpack.c.bf16 %v847_v62, %v846_v53  ;;  %v813_v3 = vsel %vm685_vm15, %v517_v57, %v749_v63  ;;  %v845_v5 = vsel %vm717_vm0, %v645_v58, %v781_v1 }
 0x119   :  { %1542 = vst [vmem:[%s2033_s3 + $0x78] sm:$0xff] %v1446_v61   ;;  %v1441_v35 = vpack.c.bf16 %v813_v3, %v812_v2  ;;  %v1521_v6 = vpack.c.bf16 %v845_v5, %v844_v4 }
 0x11a   :  { %1558 = vst [vmem:[%s2033_s3 + $0xf8] sm:$0xff] %v1526_v0  }
 0x11b   :  { %1541 = vst [vmem:[%s2033_s3 + $0x70] sm:$0xff] %v1441_v35   ;;  %1557 = vst [vmem:[%s2033_s3 + $0xf0] sm:$0xff] %v1521_v6  }

// kernel: discriminator_forward.5
= control target key start
LH: loop header
LB: loop body
LE: loop exit
PB: predicated region body
PF: predicated region fallthrough
CT: control target
= control target key end

     0   :  { %s2000_s15 = smov 0   ;;  %s2002_s16 = smov 0   ;;  %s2327_s0 = inlined_call_operand.vmem [shape: bf16[128,1024], index: 0, kind: input, shape index: {}]   ;;  %s2328_s1 = inlined_call_operand.vmem [shape: bf16[1024,128], index: 1, kind: input, shape index: {}]   ;;  %s2329_s2 = inlined_call_operand.vmem [shape: f32[1,128], index: 2, kind: input, shape index: {}]   ;;  %s2330_s3 = inlined_call_operand.vmem [shape: f32[1,128], index: 3, kind: input, shape index: {}]   ;;  %s2331_s4 = inlined_call_operand.vmem [shape: bf16[128,128], index: 4, kind: output, shape index: {}]  }
   0x1   :  { %s2004_s17 = smov 0   ;;  %s2006_s18 = smov 0  }
   0x2   :  { %s2008_s19 = smov 0  }
   0x3 LB: > { %s23_s20 = sadd.s32 1, %s1968_s18  ;;  %p40_p1 = scmp.ne.s32.totalorder %s1960_s16, %s1956_s15  ;;  %s1972_s19 = sphi %s2008_s19, %s14_s19   ;;  %s1968_s18 = sphi %s2006_s18, %s2335_s18   ;;  %s1964_s17 = sphi %s2004_s17, %s2334_s17   ;;  %s1960_s16 = sphi %s2002_s16, %s2333_s16   ;;  %s1956_s15 = sphi %s2000_s15, %s2332_s15  }
   0x4   : > { %p24_p0 = scmp.ge.s32.totalorder %s23_s20, 2  ;;  %p41_p2 = scmp.eq.s32.totalorder %s1972_s19, 0 }
   0x5   : > { %s33_s22 = sadd.s32 1, %s1960_s16  ;;  %p1524_p5 = scmp.ge.s32.totalorder %s1972_s19, 2 }
   0x6   : > { %s2337_s20 = smov (%p24_p0, %s23_s20), 0  ;;  %p42_p3 = por %p41_p2, %p40_p1 }
   0x7   : > { %s30_s21 = ssub.s32 %s1968_s18, %s2337_s20  ;;  %184 = sbr.rel (%p1524_p5) target bundleno = 32 (0x20), region = 24 }
   0x8   : > { %p31_p4 = scmp.eq.s32.totalorder %s30_s21, 0 }
   0xa   : > { %s2035_s23 = scalar_select %p31_p4, %s1960_s16, %s33_s22  }
   0xc   : > { %187 = sbr.rel (!%p42_p3) target bundleno = 32 (0x20), region = 28  ;;  %s189_s24 = sand.u32 (%p42_p3), 1, %s1960_s16  }
   0xd   : > { %s1619_s25 = sshll.u32 (%p42_p3), %s1968_s18, 4  ;;  %s1525_s26 = sshll.u32 (%p42_p3), %s189_s24, 8 }
   0xe   : > { %s2043_s29 = scalar_lea.vmem (%p42_p3), %s2327_s0, %s1619_s25  ;;  %s2048_s30 = scalar_lea.vmem (%p42_p3), [#allocation3], %s1525_s26 }
   0xf   : > { %v207_v0 = vld [vmem:[%s2043_s29] sm:$0xff] (%p42_p3)  ;;  %v209_v1 = vld [vmem:[%s2043_s29 + $0x8] sm:$0xff] (%p42_p3) }
  0x10   : > { %v211_v2 = vld [vmem:[%s2043_s29 + $0x20] sm:$0xff] (%p42_p3)  ;;  %208 = vst [vmem:[%s2048_s30] sm:$0xff] (%p42_p3), %v207_v0  ;;  %210 = vst [vmem:[%s2048_s30 + $0x8] sm:$0xff] (%p42_p3), %v209_v1  ;;  %v213_v3 = vld [vmem:[%s2043_s29 + $0x28] sm:$0xff] (%p42_p3) }
  0x11   : > { %212 = vst [vmem:[%s2048_s30 + $0x10] sm:$0xff] %v211_v2  ;;  %v215_v4 = vld [vmem:[%s2043_s29 + $0x40] sm:$0xff]  ;;  %v217_v5 = vld [vmem:[%s2043_s29 + $0x48] sm:$0xff]  ;;  %214 = vst [vmem:[%s2048_s30 + $0x18] sm:$0xff] %v213_v3 }
  0x12   : > { %216 = vst [vmem:[%s2048_s30 + $0x20] sm:$0xff] %v215_v4  ;;  %218 = vst [vmem:[%s2048_s30 + $0x28] sm:$0xff] %v217_v5  ;;  %v219_v6 = vld [vmem:[%s2043_s29 + $0x60] sm:$0xff]  ;;  %v221_v7 = vld [vmem:[%s2043_s29 + $0x68] sm:$0xff] }
  0x13   : > { %v223_v8 = vld [vmem:[%s2043_s29 + $0x80] sm:$0xff]  ;;  %220 = vst [vmem:[%s2048_s30 + $0x30] sm:$0xff] %v219_v6  ;;  %222 = vst [vmem:[%s2048_s30 + $0x38] sm:$0xff] %v221_v7  ;;  %v225_v9 = vld [vmem:[%s2043_s29 + $0x88] sm:$0xff] }
  0x14   : > { %224 = vst [vmem:[%s2048_s30 + $0x40] sm:$0xff] %v223_v8  ;;  %v227_v10 = vld [vmem:[%s2043_s29 + $0xa0] sm:$0xff]  ;;  %v229_v11 = vld [vmem:[%s2043_s29 + $0xa8] sm:$0xff]  ;;  %226 = vst [vmem:[%s2048_s30 + $0x48] sm:$0xff] %v225_v9 }
  0x15   : > { %228 = vst [vmem:[%s2048_s30 + $0x50] sm:$0xff] %v227_v10  ;;  %230 = vst [vmem:[%s2048_s30 + $0x58] sm:$0xff] %v229_v11  ;;  %v231_v12 = vld [vmem:[%s2043_s29 + $0xc0] sm:$0xff]  ;;  %v233_v13 = vld [vmem:[%s2043_s29 + $0xc8] sm:$0xff] }
  0x16   : > { %v235_v14 = vld [vmem:[%s2043_s29 + $0xe0] sm:$0xff]  ;;  %232 = vst [vmem:[%s2048_s30 + $0x60] sm:$0xff] %v231_v12  ;;  %234 = vst [vmem:[%s2048_s30 + $0x68] sm:$0xff] %v233_v13  ;;  %v237_v15 = vld [vmem:[%s2043_s29 + $0xe8] sm:$0xff] }
  0x17   : > { %236 = vst [vmem:[%s2048_s30 + $0x70] sm:$0xff] %v235_v14  ;;  %v239_v16 = vld [vmem:[%s2043_s29 + $0x100] sm:$0xff]  ;;  %v241_v17 = vld [vmem:[%s2043_s29 + $0x108] sm:$0xff]  ;;  %238 = vst [vmem:[%s2048_s30 + $0x78] sm:$0xff] %v237_v15 }
  0x18   : > { %240 = vst [vmem:[%s2048_s30 + $0x80] sm:$0xff] %v239_v16  ;;  %242 = vst [vmem:[%s2048_s30 + $0x88] sm:$0xff] %v241_v17  ;;  %v243_v18 = vld [vmem:[%s2043_s29 + $0x120] sm:$0xff]  ;;  %v245_v19 = vld [vmem:[%s2043_s29 + $0x128] sm:$0xff] }
  0x19   : > { %v247_v20 = vld [vmem:[%s2043_s29 + $0x140] sm:$0xff]  ;;  %244 = vst [vmem:[%s2048_s30 + $0x90] sm:$0xff] %v243_v18  ;;  %246 = vst [vmem:[%s2048_s30 + $0x98] sm:$0xff] %v245_v19  ;;  %v249_v21 = vld [vmem:[%s2043_s29 + $0x148] sm:$0xff] }
  0x1a   : > { %248 = vst [vmem:[%s2048_s30 + $0xa0] sm:$0xff] %v247_v20  ;;  %v251_v22 = vld [vmem:[%s2043_s29 + $0x160] sm:$0xff]  ;;  %v253_v23 = vld [vmem:[%s2043_s29 + $0x168] sm:$0xff]  ;;  %250 = vst [vmem:[%s2048_s30 + $0xa8] sm:$0xff] %v249_v21 }
  0x1b   : > { %252 = vst [vmem:[%s2048_s30 + $0xb0] sm:$0xff] %v251_v22  ;;  %254 = vst [vmem:[%s2048_s30 + $0xb8] sm:$0xff] %v253_v23  ;;  %v255_v24 = vld [vmem:[%s2043_s29 + $0x180] sm:$0xff]  ;;  %v257_v25 = vld [vmem:[%s2043_s29 + $0x188] sm:$0xff] }
  0x1c   : > { %v259_v26 = vld [vmem:[%s2043_s29 + $0x1a0] sm:$0xff]  ;;  %256 = vst [vmem:[%s2048_s30 + $0xc0] sm:$0xff] %v255_v24  ;;  %258 = vst [vmem:[%s2048_s30 + $0xc8] sm:$0xff] %v257_v25  ;;  %v261_v27 = vld [vmem:[%s2043_s29 + $0x1a8] sm:$0xff] }
  0x1d   : > { %260 = vst [vmem:[%s2048_s30 + $0xd0] sm:$0xff] %v259_v26  ;;  %v263_v28 = vld [vmem:[%s2043_s29 + $0x1c0] sm:$0xff]  ;;  %v265_v29 = vld [vmem:[%s2043_s29 + $0x1c8] sm:$0xff]  ;;  %262 = vst [vmem:[%s2048_s30 + $0xd8] sm:$0xff] %v261_v27 }
  0x1e   : > { %264 = vst [vmem:[%s2048_s30 + $0xe0] sm:$0xff] %v263_v28  ;;  %266 = vst [vmem:[%s2048_s30 + $0xe8] sm:$0xff] %v265_v29  ;;  %v267_v30 = vld [vmem:[%s2043_s29 + $0x1e0] sm:$0xff]  ;;  %v269_v31 = vld [vmem:[%s2043_s29 + $0x1e8] sm:$0xff] }
  0x1f   : > { %268 = vst [vmem:[%s2048_s30 + $0xf0] sm:$0xff] %v267_v30  ;;  %270 = vst [vmem:[%s2048_s30 + $0xf8] sm:$0xff] %v269_v31 }
  0x20 PF: > { %p1528_p6 = scmp.ge.s32.totalorder %s1972_s19, 1  ;;  %p287_p7 = scmp.lt.s32.totalorder %s1972_s19, 3 }
  0x22   : > { %p288_p8 = pnand %p1528_p6, %p287_p7 }
  0x23   : > { %s294_s5 = sand.u32 (!%p288_p8), 1, %s1956_s15   ;;  %s1530_s6 = sshll.u32 (!%p288_p8), %s1964_s17, 6 }
  0x24   : > { %291 = sbr.rel (%p288_p8) target bundleno = 493 (0x1ed), region = 55  ;;  %s1529_s7 = sshll.u32 (!%p288_p8), %s294_s5, 8 }
  0x25   : > { %p334_p9 = scmp.lt.s32.totalorder (!%p288_p8), %s1530_s6, 127  ;;  %s2120_s12 = scalar_lea.vmem (!%p288_p8), [#allocation3], %s1529_s7 }
  0x26   : > { %p1532_p10 = scmp.ne.s32.totalorder (!%p288_p8), %s1964_s17, 0 }
  0x29   : > { %s2339_s6 = smov (!%p334_p9, %s1530_s6), 127  ;;  %356 = sbr.rel (%p1532_p10) target bundleno = 55 (0x37), region = 63 }
  0x2a   : > { %s1531_s8 = sshll.u32 %s2339_s6, 2 }
  0x2b   : > { %s2118_s11 = scalar_lea.vmem %s2328_s1, %s1531_s8 }
  0x2e   : > { %v1974_v32 = vmov 0.0  }
  0x2f   : > { %357 = vst [vmem:[#allocation2 + $0x30] sm:$0xff] %v1974_v32  ;;  %358 = vst [vmem:[#allocation2] sm:$0xff] %v1974_v32 }
  0x30   : > { %359 = vst [vmem:[#allocation2 + $0x58] sm:$0xff] %v1974_v32  ;;  %360 = vst [vmem:[#allocation2 + $0x18] sm:$0xff] %v1974_v32 }
  0x31   : > { %361 = vst [vmem:[#allocation2 + $0x50] sm:$0xff] %v1974_v32  ;;  %362 = vst [vmem:[#allocation2 + $0x68] sm:$0xff] %v1974_v32 }
  0x32   : > { %363 = vst [vmem:[#allocation2 + $0x8] sm:$0xff] %v1974_v32  ;;  %364 = vst [vmem:[#allocation2 + $0x48] sm:$0xff] %v1974_v32 }
  0x33   : > { %365 = vst [vmem:[#allocation2 + $0x40] sm:$0xff] %v1974_v32  ;;  %366 = vst [vmem:[#allocation2 + $0x20] sm:$0xff] %v1974_v32 }
  0x34   : > { %367 = vst [vmem:[#allocation2 + $0x10] sm:$0xff] %v1974_v32  ;;  %368 = vst [vmem:[#allocation2 + $0x38] sm:$0xff] %v1974_v32 }
  0x35   : > { %369 = vst [vmem:[#allocation2 + $0x60] sm:$0xff] %v1974_v32  ;;  %370 = vst [vmem:[#allocation2 + $0x70] sm:$0xff] %v1974_v32 }
  0x36   : > { %371 = vst [vmem:[#allocation2 + $0x78] sm:$0xff] %v1974_v32  ;;  %372 = vst [vmem:[#allocation2 + $0x28] sm:$0xff] %v1974_v32 }
  0x37 PF: > { %v1852_v33 = vld [vmem:[%s2118_s11 + $0x78] sm:$0xff]   ;;  %v1856_v37 = vld [vmem:[%s2118_s11 + $0x70] sm:$0xff]   ;;  %v1860_v41 = vld [vmem:[%s2118_s11 + $0x68] sm:$0xff]   ;;  %p1597_p11 = scmp.ne.s32.totalorder %s1964_s17, 1 }
  0x38   : > { %v1853_v34 = vld [vmem:[%s2118_s11 + $0xf8] sm:$0xff]   ;;  %1683 = vmatprep.subr.bf16.mxu0 %v1852_v33  ;;  %v1857_v38 = vld [vmem:[%s2118_s11 + $0xf0] sm:$0xff]   ;;  %v1861_v42 = vld [vmem:[%s2118_s11 + $0xe8] sm:$0xff]  }
  0x39   : > { %v1854_v35 = vld [vmem:[%s2118_s11 + $0x38] sm:$0xff]   ;;  %1747 = vmatprep.subr.bf16.mxu1 %v1853_v34  ;;  %v1858_v39 = vld [vmem:[%s2118_s11 + $0x30] sm:$0xff]   ;;  %v1862_v43 = vld [vmem:[%s2118_s11 + $0x28] sm:$0xff]  }
  0x3a   : > { %v1855_v36 = vld [vmem:[%s2118_s11 + $0xb8] sm:$0xff]   ;;  %1684 = vmatpush3.bf16.msra.mxu0 %v1854_v35  ;;  %v1859_v40 = vld [vmem:[%s2118_s11 + $0xb0] sm:$0xff]   ;;  %v1863_v44 = vld [vmem:[%s2118_s11 + $0xa8] sm:$0xff]  }
  0x3b   : > { %1748 = vmatpush3.bf16.msra.mxu1 %v1855_v36  ;;  %1685 = vmatprep.subr.bf16.mxu0 %v1856_v37  ;;  %v1864_v45 = vld [vmem:[%s2118_s11 + $0x60] sm:$0xff]   ;;  %v1868_v49 = vld [vmem:[%s2118_s11 + $0x58] sm:$0xff]   ;;  %v1872_v53 = vld [vmem:[%s2118_s11 + $0x50] sm:$0xff]  }
  0x3c   : > { %1749 = vmatprep.subr.bf16.mxu1 %v1857_v38  ;;  %v1865_v46 = vld [vmem:[%s2118_s11 + $0xe0] sm:$0xff]   ;;  %v1869_v50 = vld [vmem:[%s2118_s11 + $0xd8] sm:$0xff]   ;;  %v1873_v54 = vld [vmem:[%s2118_s11 + $0xd0] sm:$0xff]  }
  0x3d   : > { %v1866_v47 = vld [vmem:[%s2118_s11 + $0x20] sm:$0xff]   ;;  %v1870_v51 = vld [vmem:[%s2118_s11 + $0x18] sm:$0xff]   ;;  %v1874_v55 = vld [vmem:[%s2118_s11 + $0x10] sm:$0xff]  }
  0x3e   : > { %1686 = vmatpush3.bf16.msra.mxu0 %v1858_v39  ;;  %v1867_v48 = vld [vmem:[%s2118_s11 + $0xa0] sm:$0xff]   ;;  %v1871_v52 = vld [vmem:[%s2118_s11 + $0x98] sm:$0xff]   ;;  %v1875_v56 = vld [vmem:[%s2118_s11 + $0x90] sm:$0xff]  }
  0x3f   : > { %1750 = vmatpush3.bf16.msra.mxu1 %v1859_v40  ;;  %1687 = vmatprep.subr.bf16.mxu0 %v1860_v41  ;;  %v1876_v57 = vld [vmem:[%s2118_s11 + $0x48] sm:$0xff]   ;;  %v1880_v61 = vld [vmem:[%s2118_s11 + $0x40] sm:$0xff]   ;;  %v373_v40 = vld [vmem:[#allocation2 + $0x30] sm:$0xff] }
  0x40   : > { %1751 = vmatprep.subr.bf16.mxu1 %v1861_v42  ;;  %v1877_v58 = vld [vmem:[%s2118_s11 + $0xc8] sm:$0xff]   ;;  %v1881_v62 = vld [vmem:[%s2118_s11 + $0xc0] sm:$0xff]  }
  0x41   : > { %v1878_v59 = vld [vmem:[%s2118_s11 + $0x8] sm:$0xff]   ;;  %v1882_v63 = vld [vmem:[%s2118_s11] sm:$0xff]  }
  0x42   : > { %1688 = vmatpush3.bf16.msra.mxu0 %v1862_v43  ;;  %v1879_v60 = vld [vmem:[%s2118_s11 + $0x88] sm:$0xff]   ;;  %v1883_v0 = vld [vmem:[%s2118_s11 + $0x80] sm:$0xff]  }
  0x43   : > { %1752 = vmatpush3.bf16.msra.mxu1 %v1863_v44  ;;  %1689 = vmatprep.subr.bf16.mxu0 %v1864_v45  ;;  %v1884_v1 = vld [vmem:[%s2120_s12] ss:$16 sps:$4 sm:$0xff]   ;;  %v1886_v2 = vld [vmem:[%s2120_s12 + $0x4] ss:$16 sps:$4 sm:$0xff]   ;;  %v1887_v3 = vld [vmem:[%s2120_s12 + $0x8] ss:$16 sps:$4 sm:$0xff]  }
  0x44   : > { %1753 = vmatprep.subr.bf16.mxu1 %v1865_v46  ;;  %v1889_v4 = vld [vmem:[%s2120_s12 + $0xc] ss:$16 sps:$4 sm:$0xff]   ;;  %869 = vmatprep.mubr.bf16.mxu0 %v1886_v2  ;;  %v1890_v5 = vld [vmem:[%s2120_s12 + $0x24] ss:$16 sps:$4 sm:$0xff]   ;;  %v1894_v7 = vld [vmem:[%s2120_s12 + $0x20] ss:$16 sps:$4 sm:$0xff]  }
  0x45   : > { %966 = vmatprep.mubr.bf16.mxu1 %v1889_v4  ;;  %v1892_v6 = vld [vmem:[%s2120_s12 + $0x2c] ss:$16 sps:$4 sm:$0xff]   ;;  %v1895_v8 = vld [vmem:[%s2120_s12 + $0x28] ss:$16 sps:$4 sm:$0xff]   ;;  %v1896_v9 = vld [vmem:[%s2120_s12 + $0x44] ss:$16 sps:$4 sm:$0xff]  }
  0x46   : > { %1690 = vmatpush3.bf16.msra.mxu0 %v1866_v47  ;;  %v1898_v10 = vld [vmem:[%s2120_s12 + $0x4c] ss:$16 sps:$4 sm:$0xff]   ;;  %v1900_v11 = vld [vmem:[%s2120_s12 + $0x40] ss:$16 sps:$4 sm:$0xff]   ;;  %v1901_v12 = vld [vmem:[%s2120_s12 + $0x48] ss:$16 sps:$4 sm:$0xff]  }
  0x47   : > { %1754 = vmatpush3.bf16.msra.mxu1 %v1867_v48  ;;  %1691 = vmatprep.subr.bf16.mxu0 %v1868_v49  ;;  %v1902_v13 = vld [vmem:[%s2120_s12 + $0x64] ss:$16 sps:$4 sm:$0xff]   ;;  %v1904_v14 = vld [vmem:[%s2120_s12 + $0x6c] ss:$16 sps:$4 sm:$0xff]   ;;  %v1906_v15 = vld [vmem:[%s2120_s12 + $0x60] ss:$16 sps:$4 sm:$0xff]  }
  0x48   : > { %1755 = vmatprep.subr.bf16.mxu1 %v1869_v50  ;;  %v1907_v16 = vld [vmem:[%s2120_s12 + $0x68] ss:$16 sps:$4 sm:$0xff]   ;;  %v1908_v17 = vld [vmem:[%s2120_s12 + $0x84] ss:$16 sps:$4 sm:$0xff]   ;;  %v1910_v18 = vld [vmem:[%s2120_s12 + $0x8c] ss:$16 sps:$4 sm:$0xff]  }
  0x49   : > { %v1912_v19 = vld [vmem:[%s2120_s12 + $0x80] ss:$16 sps:$4 sm:$0xff]   ;;  %v1913_v20 = vld [vmem:[%s2120_s12 + $0x88] ss:$16 sps:$4 sm:$0xff]   ;;  %v1914_v21 = vld [vmem:[%s2120_s12 + $0xa4] ss:$16 sps:$4 sm:$0xff]  }
  0x4a   : > { %1692 = vmatpush3.bf16.msra.mxu0 %v1870_v51  ;;  %v1916_v22 = vld [vmem:[%s2120_s12 + $0xac] ss:$16 sps:$4 sm:$0xff]   ;;  %v1918_v23 = vld [vmem:[%s2120_s12 + $0xa0] ss:$16 sps:$4 sm:$0xff]   ;;  %v1919_v24 = vld [vmem:[%s2120_s12 + $0xa8] ss:$16 sps:$4 sm:$0xff]  }
  0x4b   : > { %1756 = vmatpush3.bf16.msra.mxu1 %v1871_v52  ;;  %1693 = vmatprep.subr.bf16.mxu0 %v1872_v53  ;;  %v1920_v25 = vld [vmem:[%s2120_s12 + $0xc4] ss:$16 sps:$4 sm:$0xff]   ;;  %v1922_v26 = vld [vmem:[%s2120_s12 + $0xcc] ss:$16 sps:$4 sm:$0xff]   ;;  %v1924_v27 = vld [vmem:[%s2120_s12 + $0xc0] ss:$16 sps:$4 sm:$0xff]  }
  0x4c   : > { %1757 = vmatprep.subr.bf16.mxu1 %v1873_v54  ;;  %v1925_v28 = vld [vmem:[%s2120_s12 + $0xc8] ss:$16 sps:$4 sm:$0xff]   ;;  %v1926_v29 = vld [vmem:[%s2120_s12 + $0xe4] ss:$16 sps:$4 sm:$0xff]   ;;  %v1928_v30 = vld [vmem:[%s2120_s12 + $0xec] ss:$16 sps:$4 sm:$0xff]  }
  0x4d   : > { %v1930_v31 = vld [vmem:[%s2120_s12 + $0xe0] ss:$16 sps:$4 sm:$0xff]   ;;  %v1931_v32 = vld [vmem:[%s2120_s12 + $0xe8] ss:$16 sps:$4 sm:$0xff]  }
  0x4e   : > { %1694 = vmatpush3.bf16.msra.mxu0 %v1874_v55  ;;  %v374_v49 = vld [vmem:[#allocation2] sm:$0xff] }
  0x4f   : > { %1758 = vmatpush3.bf16.msra.mxu1 %v1875_v56  ;;  %1695 = vmatprep.subr.bf16.mxu0 %v1876_v57 }
  0x50   : > { %1759 = vmatprep.subr.bf16.mxu1 %v1877_v58  ;;  %v375_v58 = vld [vmem:[#allocation2 + $0x58] sm:$0xff] }
  0x52   : > { %1696 = vmatpush3.bf16.msra.mxu0 %v1878_v59 }
  0x53   : > { %1760 = vmatpush3.bf16.msra.mxu1 %v1879_v60  ;;  %1697 = vmatprep.subr.bf16.mxu0 %v1880_v61 }
  0x54   : > { %1761 = vmatprep.subr.bf16.mxu1 %v1881_v62 }
  0x56   : > { %1698 = vmatpush3.bf16.msra.mxu0 %v1882_v63 }
  0x57   : > { %1762 = vmatpush3.bf16.msra.mxu1 %v1883_v0 }
  0x59   : > { %870 = vmatmul.mubr.bf16.vlgmr.msra.gmra.mxu0 %v1884_v1 }
  0x5a   : > { %967 = vmatmul.mubr.bf16.vlgmr.msra.gmra.mxu1 %v1887_v3  ;;  %877 = vmatprep.mubr.bf16.mxu0 %v1890_v5  ;;  %v376_v3 = vld [vmem:[#allocation2 + $0x18] sm:$0xff] }
  0x5b   : > { %974 = vmatprep.mubr.bf16.mxu1 %v1892_v6 }
  0x61   : > { %878 = vmatmul.mubr.bf16.gmra.mxu0 %v1894_v7 }
  0x62   : > { %975 = vmatmul.mubr.bf16.gmra.mxu1 %v1895_v8  ;;  %885 = vmatprep.mubr.bf16.mxu0 %v1896_v9 }
  0x63   : > { %982 = vmatprep.mubr.bf16.mxu1 %v1898_v10 }
  0x69   : > { %886 = vmatmul.mubr.bf16.gmra.mxu0 %v1900_v11 }
  0x6a   : > { %983 = vmatmul.mubr.bf16.gmra.mxu1 %v1901_v12  ;;  %893 = vmatprep.mubr.bf16.mxu0 %v1902_v13  ;;  %v377_v12 = vld [vmem:[#allocation2 + $0x50] sm:$0xff] }
  0x6b   : > { %990 = vmatprep.mubr.bf16.mxu1 %v1904_v14 }
  0x71   : > { %894 = vmatmul.mubr.bf16.gmra.mxu0 %v1906_v15 }
  0x72   : > { %991 = vmatmul.mubr.bf16.gmra.mxu1 %v1907_v16  ;;  %901 = vmatprep.mubr.bf16.mxu0 %v1908_v17 }
  0x73   : > { %998 = vmatprep.mubr.bf16.mxu1 %v1910_v18 }
  0x79   : > { %902 = vmatmul.mubr.bf16.gmra.mxu0 %v1912_v19 }
  0x7a   : > { %999 = vmatmul.mubr.bf16.gmra.mxu1 %v1913_v20  ;;  %909 = vmatprep.mubr.bf16.mxu0 %v1914_v21  ;;  %v378_v21 = vld [vmem:[#allocation2 + $0x68] sm:$0xff] }
  0x7b   : > { %1006 = vmatprep.mubr.bf16.mxu1 %v1916_v22 }
  0x81   : > { %910 = vmatmul.mubr.bf16.gmra.mxu0 %v1918_v23 }
  0x82   : > { %1007 = vmatmul.mubr.bf16.gmra.mxu1 %v1919_v24  ;;  %917 = vmatprep.mubr.bf16.mxu0 %v1920_v25 }
  0x83   : > { %1014 = vmatprep.mubr.bf16.mxu1 %v1922_v26 }
  0x89   : > { %918 = vmatmul.mubr.bf16.gmra.mxu0 %v1924_v27 }
  0x8a   : > { %1015 = vmatmul.mubr.bf16.gmra.mxu1 %v1925_v28  ;;  %925 = vmatprep.mubr.bf16.mxu0 %v1926_v29 }
  0x8b   : > { %1022 = vmatprep.mubr.bf16.mxu1 %v1928_v30  ;;  %v379_v30 = vld [vmem:[#allocation2 + $0x8] sm:$0xff] }
  0x91   : > { %926 = vmatmul.mubr.bf16.gmra.mxu0 %v1930_v31 }
  0x92   : > { %1023 = vmatmul.mubr.bf16.gmra.mxu1 %v1931_v32 }
 0x119   : > { %v1699_v33 = vpop.f32.mrf.mxu0 }
 0x11a   : > { %v1763_v34 = vpop.f32.mrf.mxu1 }
 0x11b   : > { %v1700_v35 = vpop.f32.mrf.mxu0 }
 0x11c   : > { %v1701_v36 = vadd.f32 %v1700_v35, %v1699_v33  ;;  %v1764_v37 = vpop.f32.mrf.mxu1 }
 0x11d   : > { %v1765_v38 = vadd.f32 %v1764_v37, %v1763_v34  ;;  %v1702_v39 = vpop.f32.mrf.mxu0 }
 0x11e   : > { %v1766_v41 = vpop.f32.mrf.mxu1 }
 0x11f   : > { %v969_v42 = vadd.f32 %v1765_v38, %v1701_v36  ;;  %v1703_v43 = vpop.f32.mrf.mxu0 }
 0x120   : > { %v1704_v44 = vadd.f32 %v1703_v43, %v1702_v39  ;;  %v1767_v45 = vpop.f32.mrf.mxu1  ;;  %v380_v39 = vld [vmem:[#allocation2 + $0x48] sm:$0xff] }
 0x121   : > { %v1031_v46 = vadd.f32 %v969_v42, %v373_v40  ;;  %v1768_v47 = vadd.f32 %v1767_v45, %v1766_v41  ;;  %v1705_v48 = vpop.f32.mrf.mxu0 }
 0x122   : > { %v1769_v50 = vpop.f32.mrf.mxu1 }
 0x123   : > { %1047 = vst [vmem:[#allocation2 + $0x30] sm:$0xff] %v1031_v46  ;;  %v972_v51 = vadd.f32 %v1768_v47, %v1704_v44  ;;  %v1706_v52 = vpop.f32.mrf.mxu0 }
 0x124   : > { %v1707_v53 = vadd.f32 %v1706_v52, %v1705_v48  ;;  %v1770_v54 = vpop.f32.mrf.mxu1  ;;  %v381_v48 = vld [vmem:[#allocation2 + $0x40] sm:$0xff] }
 0x125   : > { %v1032_v55 = vadd.f32 %v972_v51, %v374_v49  ;;  %v1771_v56 = vadd.f32 %v1770_v54, %v1769_v50  ;;  %v1708_v57 = vpop.f32.mrf.mxu0 }
 0x126   : > { %v1772_v59 = vpop.f32.mrf.mxu1 }
 0x127   : > { %1048 = vst [vmem:[#allocation2] sm:$0xff] %v1032_v55  ;;  %v977_v60 = vadd.f32 %v1771_v56, %v1707_v53  ;;  %v1709_v61 = vpop.f32.mrf.mxu0 }
 0x128   : > { %v1710_v62 = vadd.f32 %v1709_v61, %v1708_v57  ;;  %v1773_v63 = vpop.f32.mrf.mxu1  ;;  %v382_v57 = vld [vmem:[#allocation2 + $0x20] sm:$0xff] }
 0x129   : > { %v1033_v0 = vadd.f32 %v977_v60, %v375_v58  ;;  %v1774_v1 = vadd.f32 %v1773_v63, %v1772_v59  ;;  %v1711_v2 = vpop.f32.mrf.mxu0 }
 0x12a   : > { %v1775_v4 = vpop.f32.mrf.mxu1 }
 0x12b   : > { %1049 = vst [vmem:[#allocation2 + $0x58] sm:$0xff] %v1033_v0  ;;  %v980_v5 = vadd.f32 %v1774_v1, %v1710_v62  ;;  %v1712_v6 = vpop.f32.mrf.mxu0 }
 0x12c   : > { %v1713_v7 = vadd.f32 %v1712_v6, %v1711_v2  ;;  %v1776_v8 = vpop.f32.mrf.mxu1  ;;  %v383_v2 = vld [vmem:[#allocation2 + $0x10] sm:$0xff] }
 0x12d   : > { %v1034_v9 = vadd.f32 %v980_v5, %v376_v3  ;;  %v1777_v10 = vadd.f32 %v1776_v8, %v1775_v4  ;;  %v1714_v11 = vpop.f32.mrf.mxu0 }
 0x12e   : > { %v1778_v13 = vpop.f32.mrf.mxu1 }
 0x12f   : > { %1050 = vst [vmem:[#allocation2 + $0x18] sm:$0xff] %v1034_v9  ;;  %v985_v14 = vadd.f32 %v1777_v10, %v1713_v7  ;;  %v1715_v15 = vpop.f32.mrf.mxu0 }
 0x130   : > { %v1716_v16 = vadd.f32 %v1715_v15, %v1714_v11  ;;  %v1779_v17 = vpop.f32.mrf.mxu1  ;;  %v384_v11 = vld [vmem:[#allocation2 + $0x38] sm:$0xff] }
 0x131   : > { %v1035_v18 = vadd.f32 %v985_v14, %v377_v12  ;;  %v1780_v19 = vadd.f32 %v1779_v17, %v1778_v13  ;;  %v1717_v20 = vpop.f32.mrf.mxu0 }
 0x132   : > { %v1781_v22 = vpop.f32.mrf.mxu1 }
 0x133   : > { %1051 = vst [vmem:[#allocation2 + $0x50] sm:$0xff] %v1035_v18  ;;  %v988_v23 = vadd.f32 %v1780_v19, %v1716_v16  ;;  %v1718_v24 = vpop.f32.mrf.mxu0 }
 0x134   : > { %v1719_v25 = vadd.f32 %v1718_v24, %v1717_v20  ;;  %v1782_v26 = vpop.f32.mrf.mxu1  ;;  %v385_v20 = vld [vmem:[#allocation2 + $0x60] sm:$0xff] }
 0x135   : > { %v1036_v27 = vadd.f32 %v988_v23, %v378_v21  ;;  %v1783_v28 = vadd.f32 %v1782_v26, %v1781_v22  ;;  %v1720_v29 = vpop.f32.mrf.mxu0 }
 0x136   : > { %v1784_v31 = vpop.f32.mrf.mxu1 }
 0x137   : > { %1052 = vst [vmem:[#allocation2 + $0x68] sm:$0xff] %v1036_v27  ;;  %v993_v32 = vadd.f32 %v1783_v28, %v1719_v25  ;;  %v1721_v33 = vpop.f32.mrf.mxu0 }
 0x138   : > { %v1722_v34 = vadd.f32 %v1721_v33, %v1720_v29  ;;  %v1785_v35 = vpop.f32.mrf.mxu1  ;;  %v386_v29 = vld [vmem:[#allocation2 + $0x70] sm:$0xff] }
 0x139   : > { %v1037_v36 = vadd.f32 %v993_v32, %v379_v30  ;;  %v1786_v37 = vadd.f32 %v1785_v35, %v1784_v31  ;;  %v1723_v38 = vpop.f32.mrf.mxu0 }
 0x13a   : > { %v1787_v40 = vpop.f32.mrf.mxu1 }
 0x13b   : > { %1053 = vst [vmem:[#allocation2 + $0x8] sm:$0xff] %v1037_v36  ;;  %v996_v41 = vadd.f32 %v1786_v37, %v1722_v34  ;;  %v1724_v42 = vpop.f32.mrf.mxu0 }
 0x13c   : > { %v1725_v43 = vadd.f32 %v1724_v42, %v1723_v38  ;;  %v1788_v44 = vpop.f32.mrf.mxu1  ;;  %v387_v38 = vld [vmem:[#allocation2 + $0x78] sm:$0xff] }
 0x13d   : > { %v1038_v45 = vadd.f32 %v996_v41, %v380_v39  ;;  %v1789_v46 = vadd.f32 %v1788_v44, %v1787_v40  ;;  %v1726_v47 = vpop.f32.mrf.mxu0 }
 0x13e   : > { %v1790_v49 = vpop.f32.mrf.mxu1 }
 0x13f   : > { %1054 = vst [vmem:[#allocation2 + $0x48] sm:$0xff] %v1038_v45  ;;  %v1001_v50 = vadd.f32 %v1789_v46, %v1725_v43  ;;  %v1727_v51 = vpop.f32.mrf.mxu0  ;;  %v388_v46 = vld [vmem:[#allocation2 + $0x28] sm:$0xff] }
 0x140   : > { %v1728_v52 = vadd.f32 %v1727_v51, %v1726_v47  ;;  %v1791_v53 = vpop.f32.mrf.mxu1 }
 0x141   : > { %v1039_v54 = vadd.f32 %v1001_v50, %v381_v48  ;;  %v1792_v55 = vadd.f32 %v1791_v53, %v1790_v49  ;;  %v1729_v56 = vpop.f32.mrf.mxu0 }
 0x142   : > { %v1793_v58 = vpop.f32.mrf.mxu1 }
 0x143   : > { %1055 = vst [vmem:[#allocation2 + $0x40] sm:$0xff] %v1039_v54  ;;  %v1004_v59 = vadd.f32 %v1792_v55, %v1728_v52  ;;  %v1730_v60 = vpop.f32.mrf.mxu0 }
 0x144   : > { %v1731_v61 = vadd.f32 %v1730_v60, %v1729_v56  ;;  %v1794_v62 = vpop.f32.mrf.mxu1 }
 0x145   : > { %v1040_v63 = vadd.f32 %v1004_v59, %v382_v57  ;;  %v1795_v0 = vadd.f32 %v1794_v62, %v1793_v58  ;;  %v1732_v1 = vpop.f32.mrf.mxu0 }
 0x146   : > { %v1796_v3 = vpop.f32.mrf.mxu1 }
 0x147   : > { %1056 = vst [vmem:[#allocation2 + $0x20] sm:$0xff] %v1040_v63  ;;  %v1009_v4 = vadd.f32 %v1795_v0, %v1731_v61  ;;  %v1733_v5 = vpop.f32.mrf.mxu0 }
 0x148   : > { %v1734_v6 = vadd.f32 %v1733_v5, %v1732_v1  ;;  %v1797_v7 = vpop.f32.mrf.mxu1 }
 0x149   : > { %v1041_v8 = vadd.f32 %v1009_v4, %v383_v2  ;;  %v1798_v9 = vadd.f32 %v1797_v7, %v1796_v3  ;;  %v1735_v10 = vpop.f32.mrf.mxu0 }
 0x14a   : > { %v1799_v12 = vpop.f32.mrf.mxu1 }
 0x14b   : > { %1057 = vst [vmem:[#allocation2 + $0x10] sm:$0xff] %v1041_v8  ;;  %v1012_v13 = vadd.f32 %v1798_v9, %v1734_v6  ;;  %v1736_v14 = vpop.f32.mrf.mxu0 }
 0x14c   : > { %v1737_v15 = vadd.f32 %v1736_v14, %v1735_v10  ;;  %v1800_v16 = vpop.f32.mrf.mxu1 }
 0x14d   : > { %v1042_v17 = vadd.f32 %v1012_v13, %v384_v11  ;;  %v1801_v18 = vadd.f32 %v1800_v16, %v1799_v12  ;;  %v1738_v19 = vpop.f32.mrf.mxu0 }
 0x14e   : > { %v1802_v21 = vpop.f32.mrf.mxu1 }
 0x14f   : > { %1058 = vst [vmem:[#allocation2 + $0x38] sm:$0xff] %v1042_v17  ;;  %v1017_v22 = vadd.f32 %v1801_v18, %v1737_v15  ;;  %v1739_v23 = vpop.f32.mrf.mxu0 }
 0x150   : > { %v1740_v24 = vadd.f32 %v1739_v23, %v1738_v19  ;;  %v1803_v25 = vpop.f32.mrf.mxu1 }
 0x151   : > { %v1043_v26 = vadd.f32 %v1017_v22, %v385_v20  ;;  %v1804_v27 = vadd.f32 %v1803_v25, %v1802_v21  ;;  %v1741_v28 = vpop.f32.mrf.mxu0 }
 0x152   : > { %v1805_v30 = vpop.f32.mrf.mxu1 }
 0x153   : > { %1059 = vst [vmem:[#allocation2 + $0x60] sm:$0xff] %v1043_v26  ;;  %v1020_v31 = vadd.f32 %v1804_v27, %v1740_v24  ;;  %v1742_v32 = vpop.f32.mrf.mxu0 }
 0x154   : > { %v1743_v33 = vadd.f32 %v1742_v32, %v1741_v28  ;;  %v1806_v34 = vpop.f32.mrf.mxu1 }
 0x155   : > { %v1044_v35 = vadd.f32 %v1020_v31, %v386_v29  ;;  %v1807_v36 = vadd.f32 %v1806_v34, %v1805_v30  ;;  %v1744_v37 = vpop.f32.mrf.mxu0 }
 0x156   : > { %v1808_v39 = vpop.f32.mrf.mxu1 }
 0x157   : > { %1060 = vst [vmem:[#allocation2 + $0x70] sm:$0xff] %v1044_v35  ;;  %v1025_v40 = vadd.f32 %v1807_v36, %v1743_v33  ;;  %v1745_v41 = vpop.f32.mrf.mxu0 }
 0x158   : > { %v1746_v42 = vadd.f32 %v1745_v41, %v1744_v37  ;;  %v1809_v43 = vpop.f32.mrf.mxu1 }
 0x159   : > { %v1045_v44 = vadd.f32 %v1025_v40, %v387_v38  ;;  %v1810_v45 = vadd.f32 %v1809_v43, %v1808_v39 }
 0x15b   : > { %1061 = vst [vmem:[#allocation2 + $0x78] sm:$0xff] %v1045_v44  ;;  %v1028_v47 = vadd.f32 %v1810_v45, %v1746_v42  ;;  %1066 = sbr.rel (%p1597_p11) target bundleno = 493 (0x1ed), region = 67 }
 0x15d   : > { %v1046_v48 = vadd.f32 %v1028_v47, %v388_v46 }
 0x15f   : > { %1062 = vst [vmem:[#allocation2 + $0x28] sm:$0xff] %v1046_v48 }
 0x160   : > { %v1067_v49 = vld [vmem:[#allocation2 + $0x30] sm:$0xff]  ;;  %v1068_v50 = vld [vmem:[#allocation2] sm:$0xff]  ;;  %v1069_v51 = vld [vmem:[#allocation2 + $0x58] sm:$0xff] }
 0x161   : > { %v1132_v52 = vadd.f32 %v1068_v50, %v1067_v49  ;;  %v1070_v53 = vld [vmem:[#allocation2 + $0x18] sm:$0xff]  ;;  %v1071_v55 = vld [vmem:[#allocation2 + $0x50] sm:$0xff]  ;;  %v1072_v57 = vld [vmem:[#allocation2 + $0x68] sm:$0xff] }
 0x162   : > { %v1073_v59 = vld [vmem:[#allocation2 + $0x8] sm:$0xff]  ;;  %v1075_v63 = vld [vmem:[#allocation2 + $0x40] sm:$0xff]  ;;  %v1077_v3 = vld [vmem:[#allocation2 + $0x10] sm:$0xff] }
 0x163   : > { %v1133_v54 = vadd.f32 %v1132_v52, %v1069_v51  ;;  %v1074_v61 = vld [vmem:[#allocation2 + $0x48] sm:$0xff]  ;;  %v1076_v1 = vld [vmem:[#allocation2 + $0x20] sm:$0xff]  ;;  %v1078_v5 = vld [vmem:[#allocation2 + $0x38] sm:$0xff] }
 0x164   : > { %v1079_v7 = vld [vmem:[#allocation2 + $0x60] sm:$0xff]  ;;  %v1080_v9 = vld [vmem:[#allocation2 + $0x70] sm:$0xff]  ;;  %v1081_v11 = vld [vmem:[#allocation2 + $0x78] sm:$0xff] }
 0x165   : > { %v1134_v56 = vadd.f32 %v1133_v54, %v1070_v53 }
 0x166   : > { %v1082_v13 = vld [vmem:[#allocation2 + $0x28] sm:$0xff] }
 0x167   : > { %v1135_v58 = vadd.f32 %v1134_v56, %v1071_v55 }
 0x169   : > { %v1136_v60 = vadd.f32 %v1135_v58, %v1072_v57 }
 0x16b   : > { %v1137_v62 = vadd.f32 %v1136_v60, %v1073_v59 }
 0x16d   : > { %v1138_v0 = vadd.f32 %v1137_v62, %v1074_v61 }
 0x16f   : > { %v1139_v2 = vadd.f32 %v1138_v0, %v1075_v63 }
 0x171   : > { %v1140_v4 = vadd.f32 %v1139_v2, %v1076_v1 }
 0x173   : > { %v1141_v6 = vadd.f32 %v1140_v4, %v1077_v3 }
 0x175   : > { %v1142_v8 = vadd.f32 %v1141_v6, %v1078_v5 }
 0x177   : > { %v1143_v10 = vadd.f32 %v1142_v8, %v1079_v7 }
 0x179   : > { %v1144_v12 = vadd.f32 %v1143_v10, %v1080_v9 }
 0x17b   : > { %v1145_v14 = vadd.f32 %v1144_v12, %v1081_v11 }
 0x17d   : > { %v1146_v15 = vadd.f32 %v1145_v14, %v1082_v13 }
 0x17f   : > { %v1147_v16 = vrot.slane %v1146_v15, 4 }
 0x181   : > { %v1148_v17 = vadd.f32 %v1147_v16, %v1146_v15  ;;  %v2225_v15 = vld [vmem:[%s2329_s2] ss:$0 sm:$0xff] }
 0x183   : > { %v1149_v18 = vrot.slane %v1148_v17, 2 }
 0x185   : > { %v1150_v19 = vadd.f32 %v1149_v18, %v1148_v17 }
 0x187   : > { %v1151_v20 = vrot.slane %v1150_v19, 1 }
 0x189   : > { %v1152_v21 = vadd.f32 %v1151_v20, %v1150_v19  ;;  %v2234_v20 = vld [vmem:[%s2330_s3] ss:$0 sm:$0xff] }
 0x18b   : > { %v1153_v22 = vmul.f32 0.0078125, %v1152_v21 }
 0x18d   : > { %v1154_v23 = vsub.f32 %v1067_v49, %v1153_v22  ;;  %v1155_v24 = vsub.f32 %v1068_v50, %v1153_v22  ;;  %v1156_v25 = vsub.f32 %v1069_v51, %v1153_v22  ;;  %v1157_v26 = vsub.f32 %v1070_v53, %v1153_v22 }
 0x18e   : > { %v1158_v29 = vsub.f32 %v1071_v55, %v1153_v22  ;;  %v1159_v31 = vsub.f32 %v1072_v57, %v1153_v22  ;;  %v1160_v34 = vsub.f32 %v1073_v59, %v1153_v22  ;;  %v1161_v37 = vsub.f32 %v1074_v61, %v1153_v22 }
 0x18f   : > { %v1186_v27 = vmul.f32 %v1154_v23, %v1154_v23  ;;  %v1187_v28 = vmul.f32 %v1155_v24, %v1155_v24  ;;  %v1188_v30 = vmul.f32 %v1156_v25, %v1156_v25  ;;  %v1189_v32 = vmul.f32 %v1157_v26, %v1157_v26 }
 0x190   : > { %v1190_v35 = vmul.f32 %v1158_v29, %v1158_v29  ;;  %v1191_v38 = vmul.f32 %v1159_v31, %v1159_v31  ;;  %v2188_v40 = vsub.f32 %v1075_v63, %v1153_v22  ;;  %v1192_v41 = vmul.f32 %v1160_v34, %v1160_v34 }
 0x191   : > { %v1202_v33 = vadd.f32 %v1187_v28, %v1186_v27  ;;  %v2190_v43 = vsub.f32 %v1076_v1, %v1153_v22  ;;  %v1193_v44 = vmul.f32 %v1161_v37, %v1161_v37  ;;  %v2192_v46 = vsub.f32 %v1077_v3, %v1153_v22 }
 0x192   : > { %v1194_v47 = vmul.f32 %v2188_v40, %v2188_v40  ;;  %v2196_v49 = vsub.f32 %v1078_v5, %v1153_v22  ;;  %v2200_v52 = vsub.f32 %v1079_v7, %v1153_v22  ;;  %v2204_v55 = vsub.f32 %v1080_v9, %v1153_v22 }
 0x193   : > { %v1203_v36 = vadd.f32 %v1202_v33, %v1188_v30  ;;  %v1195_v50 = vmul.f32 %v2190_v43, %v2190_v43  ;;  %v1196_v53 = vmul.f32 %v2192_v46, %v2192_v46  ;;  %v2208_v58 = vsub.f32 %v1081_v11, %v1153_v22 }
 0x194   : > { %v1197_v56 = vmul.f32 %v2196_v49, %v2196_v49  ;;  %v1198_v59 = vmul.f32 %v2200_v52, %v2200_v52  ;;  %v2212_v61 = vsub.f32 %v1082_v13, %v1153_v22  ;;  %v1199_v62 = vmul.f32 %v2204_v55, %v2204_v55 }
 0x195   : > { %v1204_v39 = vadd.f32 %v1203_v36, %v1189_v32  ;;  %v1200_v0 = vmul.f32 %v2208_v58, %v2208_v58 }
 0x196   : > { %v1201_v2 = vmul.f32 %v2212_v61, %v2212_v61 }
 0x197   : > { %v1205_v42 = vadd.f32 %v1204_v39, %v1190_v35 }
 0x199   : > { %v1206_v45 = vadd.f32 %v1205_v42, %v1191_v38 }
 0x19b   : > { %v1207_v48 = vadd.f32 %v1206_v45, %v1192_v41 }
 0x19d   : > { %v1208_v51 = vadd.f32 %v1207_v48, %v1193_v44 }
 0x19f   : > { %v1209_v54 = vadd.f32 %v1208_v51, %v1194_v47 }
 0x1a1   : > { %v1210_v57 = vadd.f32 %v1209_v54, %v1195_v50 }
 0x1a3   : > { %v1211_v60 = vadd.f32 %v1210_v57, %v1196_v53 }
 0x1a5   : > { %v1212_v63 = vadd.f32 %v1211_v60, %v1197_v56 }
 0x1a7   : > { %v1213_v1 = vadd.f32 %v1212_v63, %v1198_v59 }
 0x1a9   : > { %v1214_v3 = vadd.f32 %v1213_v1, %v1199_v62 }
 0x1ab   : > { %v1215_v4 = vadd.f32 %v1214_v3, %v1200_v0 }
 0x1ad   : > { %v1216_v5 = vadd.f32 %v1215_v4, %v1201_v2 }
 0x1af   : > { %v1217_v6 = vrot.slane %v1216_v5, 4 }
 0x1b1   : > { %v1218_v7 = vadd.f32 %v1217_v6, %v1216_v5 }
 0x1b3   : > { %v1219_v8 = vrot.slane %v1218_v7, 2 }
 0x1b5   : > { %v1220_v9 = vadd.f32 %v1219_v8, %v1218_v7 }
 0x1b7   : > { %v1221_v10 = vrot.slane %v1220_v9, 1 }
 0x1b9   : > { %v1222_v11 = vadd.f32 %v1221_v10, %v1220_v9 }
 0x1bb   : > { %v1223_v12 = vmul.f32 0.0078125, %v1222_v11 }
 0x1bd   : > { %v1224_v13 = vadd.f32 1e-05, %v1223_v12 }
 0x1bf   : > { %1932 = vrsqrt.f32 %v1224_v13 }
 0x1cc   : > { %v2220_v14 = vpop.eup %1932 }
 0x1cd   : > { %v1226_v16 = vmul.f32 %v2220_v14, %v1154_v23  ;;  %v1227_v17 = vmul.f32 %v2220_v14, %v1155_v24  ;;  %v1228_v18 = vmul.f32 %v2220_v14, %v1156_v25  ;;  %v1229_v19 = vmul.f32 %v2220_v14, %v1157_v26 }
 0x1ce   : > { %v1230_v21 = vmul.f32 %v2220_v14, %v1158_v29  ;;  %v1231_v22 = vmul.f32 %v2220_v14, %v1159_v31  ;;  %v1232_v27 = vmul.f32 %v2220_v14, %v1160_v34  ;;  %v1233_v28 = vmul.f32 %v2220_v14, %v1161_v37 }
 0x1cf   : > { %v1249_v23 = vmul.f32 %v2225_v15, %v1226_v16  ;;  %v1250_v24 = vmul.f32 %v2225_v15, %v1227_v17  ;;  %v1251_v25 = vmul.f32 %v2225_v15, %v1228_v18  ;;  %v1252_v26 = vmul.f32 %v2225_v15, %v1229_v19 }
 0x1d0   : > { %v1253_v30 = vmul.f32 %v2225_v15, %v1230_v21  ;;  %v1254_v32 = vmul.f32 %v2225_v15, %v1231_v22  ;;  %v1255_v29 = vmul.f32 %v2225_v15, %v1232_v27  ;;  %v1256_v31 = vmul.f32 %v2225_v15, %v1233_v28 }
 0x1d1   : > { %v1272_v33 = vadd.f32 %v2234_v20, %v1249_v23  ;;  %v1273_v34 = vadd.f32 %v2234_v20, %v1250_v24  ;;  %v1274_v35 = vadd.f32 %v2234_v20, %v1251_v25  ;;  %v1275_v36 = vadd.f32 %v2234_v20, %v1252_v26 }
 0x1d2   : > { %v1276_v37 = vadd.f32 %v2234_v20, %v1253_v30  ;;  %v1277_v38 = vadd.f32 %v2234_v20, %v1254_v32  ;;  %v1278_v39 = vadd.f32 %v2234_v20, %v1255_v29  ;;  %v1279_v41 = vadd.f32 %v2234_v20, %v1256_v31 }
 0x1d3   : > { %vm1288_vm0 = vcmp.gt.f32.partialorder %v1272_v33, 0.0  ;;  %vm1289_vm1 = vcmp.gt.f32.partialorder %v1273_v34, 0.0  ;;  %v1304_v42 = vmul.f32 0.2, %v1272_v33  ;;  %v1305_v44 = vmul.f32 0.2, %v1273_v34 }
 0x1d4   : > { %vm1290_vm2 = vcmp.gt.f32.partialorder %v1274_v35, 0.0  ;;  %vm1291_vm3 = vcmp.gt.f32.partialorder %v1275_v36, 0.0  ;;  %v1306_v45 = vmul.f32 0.2, %v1274_v35  ;;  %v1307_v47 = vmul.f32 0.2, %v1275_v36 }
 0x1d5   : > { %v1320_v48 = vsel %vm1288_vm0, %v1272_v33, %v1304_v42  ;;  %v1321_v50 = vsel %vm1289_vm1, %v1273_v34, %v1305_v44  ;;  %vm1292_vm4 = vcmp.gt.f32.partialorder %v1276_v37, 0.0  ;;  %vm1293_vm5 = vcmp.gt.f32.partialorder %v1277_v38, 0.0 }
 0x1d6   : > { %v1639_v51 = vpack.c.bf16 %v1321_v50, %v1320_v48  ;;  %v1322_v53 = vsel %vm1290_vm2, %v1274_v35, %v1306_v45  ;;  %v1323_v54 = vsel %vm1291_vm3, %v1275_v36, %v1307_v47  ;;  %v1308_v56 = vmul.f32 0.2, %v1276_v37 }
 0x1d7   : > { %v1644_v57 = vpack.c.bf16 %v1323_v54, %v1322_v53  ;;  %v1309_v59 = vmul.f32 0.2, %v1277_v38  ;;  %vm1294_vm6 = vcmp.gt.f32.partialorder %v1278_v39, 0.0  ;;  %vm1295_vm7 = vcmp.gt.f32.partialorder %v1279_v41, 0.0 }
 0x1d8   : > { %1640 = vst [vmem:[%s2331_s4] sm:$0xff] %v1639_v51   ;;  %v1324_v60 = vsel %vm1292_vm4, %v1276_v37, %v1308_v56  ;;  %v1310_v62 = vmul.f32 0.2, %v1278_v39  ;;  %v1311_v63 = vmul.f32 0.2, %v1279_v41  ;;  %v1234_v0 = vmul.f32 %v2220_v14, %v2188_v40 }
 0x1d9   : > { %1676 = vst [vmem:[%s2331_s4 + $0x8] sm:$0xff] %v1644_v57   ;;  %v1325_v1 = vsel %vm1293_vm5, %v1277_v38, %v1309_v59  ;;  %v1235_v2 = vmul.f32 %v2220_v14, %v2190_v43  ;;  %v1236_v3 = vmul.f32 %v2220_v14, %v2192_v46  ;;  %v1237_v4 = vmul.f32 %v2220_v14, %v2196_v49 }
 0x1da   : > { %v1649_v5 = vpack.c.bf16 %v1325_v1, %v1324_v60  ;;  %v1326_v6 = vsel %vm1294_vm6, %v1278_v39, %v1310_v62  ;;  %v1327_v7 = vsel %vm1295_vm7, %v1279_v41, %v1311_v63  ;;  %v1257_v8 = vmul.f32 %v2225_v15, %v1234_v0 }
 0x1db   : > { %v1654_v40 = vpack.c.bf16 %v1327_v7, %v1326_v6  ;;  %v1258_v9 = vmul.f32 %v2225_v15, %v1235_v2  ;;  %v1259_v10 = vmul.f32 %v2225_v15, %v1236_v3  ;;  %v1260_v11 = vmul.f32 %v2225_v15, %v1237_v4 }
 0x1dc   : > { %1677 = vst [vmem:[%s2331_s4 + $0x10] sm:$0xff] %v1649_v5   ;;  %v1280_v43 = vadd.f32 %v2234_v20, %v1257_v8  ;;  %v1238_v46 = vmul.f32 %v2220_v14, %v2200_v52  ;;  %v1239_v49 = vmul.f32 %v2220_v14, %v2204_v55  ;;  %v1240_v12 = vmul.f32 %v2220_v14, %v2208_v58 }
 0x1dd   : > { %1678 = vst [vmem:[%s2331_s4 + $0x18] sm:$0xff] %v1654_v40   ;;  %v1281_v13 = vadd.f32 %v2234_v20, %v1258_v9  ;;  %v1282_v16 = vadd.f32 %v2234_v20, %v1259_v10  ;;  %v1283_v17 = vadd.f32 %v2234_v20, %v1260_v11  ;;  %v1241_v18 = vmul.f32 %v2220_v14, %v2212_v61 }
 0x1de   : > { %vm1296_vm8 = vcmp.gt.f32.partialorder %v1280_v43, 0.0  ;;  %v1312_v52 = vmul.f32 0.2, %v1280_v43  ;;  %v1261_v55 = vmul.f32 %v2225_v15, %v1238_v46  ;;  %v1262_v19 = vmul.f32 %v2225_v15, %v1239_v49 }
 0x1df   : > { %vm1297_vm9 = vcmp.gt.f32.partialorder %v1281_v13, 0.0  ;;  %v1313_v58 = vmul.f32 0.2, %v1281_v13  ;;  %vm1298_vm10 = vcmp.gt.f32.partialorder %v1282_v16, 0.0  ;;  %vm1299_vm11 = vcmp.gt.f32.partialorder %v1283_v17, 0.0 }
 0x1e0   : > { %v1328_v21 = vsel %vm1296_vm8, %v1280_v43, %v1312_v52  ;;  %v1314_v22 = vmul.f32 0.2, %v1282_v16  ;;  %v1315_v27 = vmul.f32 0.2, %v1283_v17  ;;  %v1284_v28 = vadd.f32 %v2234_v20, %v1261_v55 }
 0x1e1   : > { %v1329_v23 = vsel %vm1297_vm9, %v1281_v13, %v1313_v58  ;;  %v1285_v24 = vadd.f32 %v2234_v20, %v1262_v19  ;;  %v1263_v61 = vmul.f32 %v2225_v15, %v1240_v12  ;;  %v1264_v14 = vmul.f32 %v2225_v15, %v1241_v18 }
 0x1e2   : > { %v1659_v25 = vpack.c.bf16 %v1329_v23, %v1328_v21  ;;  %v1330_v26 = vsel %vm1298_vm10, %v1282_v16, %v1314_v22  ;;  %v1331_v30 = vsel %vm1299_vm11, %v1283_v17, %v1315_v27  ;;  %vm1300_vm12 = vcmp.gt.f32.partialorder %v1284_v28, 0.0 }
 0x1e3   : > { %v1664_v32 = vpack.c.bf16 %v1331_v30, %v1330_v26  ;;  %vm1301_vm13 = vcmp.gt.f32.partialorder %v1285_v24, 0.0  ;;  %v1316_v29 = vmul.f32 0.2, %v1284_v28  ;;  %v1317_v31 = vmul.f32 0.2, %v1285_v24 }
 0x1e4   : > { %1679 = vst [vmem:[%s2331_s4 + $0x20] sm:$0xff] %v1659_v25   ;;  %v1286_v33 = vadd.f32 %v2234_v20, %v1263_v61  ;;  %v1287_v34 = vadd.f32 %v2234_v20, %v1264_v14 }
 0x1e5   : > { %1680 = vst [vmem:[%s2331_s4 + $0x28] sm:$0xff] %v1664_v32   ;;  %v1332_v15 = vsel %vm1300_vm12, %v1284_v28, %v1316_v29  ;;  %v1333_v35 = vsel %vm1301_vm13, %v1285_v24, %v1317_v31 }
 0x1e6   : > { %v1669_v36 = vpack.c.bf16 %v1333_v35, %v1332_v15  ;;  %vm1302_vm14 = vcmp.gt.f32.partialorder %v1286_v33, 0.0  ;;  %vm1303_vm15 = vcmp.gt.f32.partialorder %v1287_v34, 0.0  ;;  %v1318_v37 = vmul.f32 0.2, %v1286_v33 }
 0x1e7   : > { %v1319_v38 = vmul.f32 0.2, %v1287_v34 }
 0x1e8   : > { %1681 = vst [vmem:[%s2331_s4 + $0x30] sm:$0xff] %v1669_v36   ;;  %v1334_v39 = vsel %vm1302_vm14, %v1286_v33, %v1318_v37 }
 0x1e9   : > { %v1335_v41 = vsel %vm1303_vm15, %v1287_v34, %v1319_v38 }
 0x1ea   : > { %v1674_v42 = vpack.c.bf16 %v1335_v41, %v1334_v39 }
 0x1ec   : > { %1682 = vst [vmem:[%s2331_s4 + $0x38] sm:$0xff] %v1674_v42  }
 0x1ed PF: > { %s14_s19 = sadd.s32 1, %s1972_s19   ;;  %s2332_s15 = smov %s1960_s16 }
 0x1ee   : > { %p11_p12 = scmp.ge.s32.totalorder %s14_s19, 4   ;;  %s2333_s16 = smov %s2035_s23 }
 0x1ef   : > { %s2334_s17 = smov %s1968_s18  ;;  %s2335_s18 = smov %s2337_s20 }
 0x1f0   :  { %13 = sbr.rel (!%p11_p12) target bundleno = 3 (0x3), region = 111 }

// kernel: discriminator_forward.6
= control target key start
LH: loop header
LB: loop body
LE: loop exit
PB: predicated region body
PF: predicated region fallthrough
CT: control target
= control target key end

     0   :  { %s2047_s0 = inlined_call_operand.vmem [shape: bf16[32,2048], index: 0, kind: input, shape index: {}]   ;;  %s2048_s1 = inlined_call_operand.vmem [shape: bf16[2048,256], index: 1, kind: input, shape index: {}]   ;;  %s2049_s2 = inlined_call_operand.vmem [shape: f32[1,256], index: 2, kind: input, shape index: {}]   ;;  %s2050_s3 = inlined_call_operand.vmem [shape: f32[1,256], index: 3, kind: input, shape index: {}]   ;;  %s2051_s4 = inlined_call_operand.vmem [shape: bf16[32,256], index: 4, kind: output, shape index: {}]  }
   0x1   :  { %2055 = sst [smem:[#allocation9_spill]] %s2047_s0 }
   0x2   :  { %2056 = sst [smem:[#allocation10_spill]] %s2048_s1 }
   0x3   :  { %s1681_s15 = smov 0   ;;  %s1683_s16 = smov 0  }
   0x4   :  { %s1685_s17 = smov 0   ;;  %s1687_s18 = smov 0  }
   0x5   :  { %s1689_s19 = smov 0   ;;  %s1691_s20 = smov 0  }
   0x6   :  { %s1693_s21 = smov 0   ;;  %s1695_s22 = smov 0  }
   0x7   :  { %s1697_s23 = smov 0   ;;  %s1699_s24 = smov 0  }
   0x8   :  { %s1701_s25 = smov 0  }
   0x9 LB: > { %2057 = sst [smem:[#allocation6_spill]] %s1649_s24  ;;  %s1292_s26 = sadd.s32 4294967295, %s1653_s25   ;;  %s1653_s25 = sphi %s1701_s25, %s14_s25   ;;  %s1649_s24 = sphi %s1699_s24, %s2067_s24   ;;  %s1645_s23 = sphi %s1697_s23, %s2075_s23   ;;  %s1641_s22 = sphi %s1695_s22, %s2065_s22   ;;  %s1637_s21 = sphi %s1693_s21, %s2074_s21   ;;  %s1633_s20 = sphi %s1691_s20, %s2073_s20   ;;  %s1629_s19 = sphi %s1689_s19, %s2072_s19   ;;  %s1625_s18 = sphi %s1687_s18, %s2071_s18   ;;  %s1621_s17 = sphi %s1685_s17, %s2070_s17   ;;  %s1617_s16 = sphi %s1683_s16, %s2069_s16   ;;  %s1613_s15 = sphi %s1681_s15, %s2068_s15  }
   0xa   : > { %s23_s27 = sadd.s32 1, %s1645_s23  ;;  %s26_s28 = sadd.s32 1, %s1649_s24 }
   0xb   : > { %p24_p0 = scmp.ge.s32.totalorder %s23_s27, 4  ;;  %s33_s29 = sadd.s32 1, %s1633_s20 }
   0xc   : > { %p40_p1 = scmp.ne.s32.totalorder %s1633_s20, %s1629_s19  ;;  %p41_p2 = scmp.eq.s32.totalorder %s1653_s25, 0 }
   0xd   : > { %s2077_s27 = smov (%p24_p0, %s23_s27), 0  ;;  %s2079_s28 = smov (!%p24_p0, %s26_s28), %s1649_s24 }
   0xe   : > { %2058 = sst [smem:[#allocation7_spill]] %s2077_s27  ;;  %s30_s30 = ssub.s32 %s1645_s23, %s2077_s27 }
   0xf   : > { %p28_p3 = scmp.ge.s32.totalorder %s2079_s28, 2  ;;  %p31_p4 = scmp.eq.s32.totalorder %s30_s30, 0 }
  0x10   : > { %p1748_p5 = por %p41_p2, %p40_p1  ;;  %s61_s6 = sadd.s32 1, %s1625_s18 }
  0x11   : > { %s2081_s28 = smov (%p28_p3, %s2079_s28), 0  ;;  %p68_p6 = scmp.ne.s32.totalorder %s1625_s18, %s1621_s17 }
  0x12   : > { %2060 = sst [smem:[#allocation8_spill]] %s2081_s28  ;;  %s57_s8 = ssub.s32 %s1649_s24, %s2081_s28 }
  0x13   : > { %s1756_s7 = scalar_select %p31_p4, %s1633_s20, %s33_s29  }
  0x14   : > { %s58_s9 = sor.u32 %s57_s8, %s30_s30  ;;  %p137_p7 = scmp.eq.s32.totalorder %s57_s8, 0 }
  0x15   : > { %p59_p8 = scmp.eq.s32.totalorder %s58_s9, 0  ;;  %p1762_p9 = por %p68_p6, %p41_p2 }
  0x16   : > { %s139_s11 = sadd.s32 1, %s1617_s16  ;;  %p149_p10 = scmp.ne.s32.totalorder %s1617_s16, %s1613_s15 }
  0x17   : > { %s1770_s12 = scalar_select %p59_p8, %s1625_s18, %s61_s6  }
  0x18   : > { %s1773_s13 = scalar_select %p137_p7, %s1617_s16, %s139_s11  }
  0x19   : > { %p150_p11 = scmp.eq.s32.totalorder %s1292_s26, 7  ;;  %p1295_p13 = scmp.ge.s32.totalorder %s1653_s25, 8 }
  0x1b   : > { %p1775_p12 = por %p150_p11, %p149_p10  ;;  %172 = sbr.rel (%p1295_p13) target bundleno = 98 (0x62), region = 16 }
  0x20   : > { %175 = sbr.rel (!%p1748_p5) target bundleno = 46 (0x2e), region = 20  ;;  %s177_s29 = sand.u32 (%p1748_p5), 1, %s1633_s20  }
  0x21   : > { %s1359_s30 = sshll.u32 (%p1748_p5), %s1645_s23, 4  ;;  %s1296_s8 = sshll.u32 (%p1748_p5), %s177_s29, 6 }
  0x22   : > { %s2063_s0 = sld [smem:[#allocation9_spill]] (%p1748_p5)  ;;  %s179_s26 = scalar_lea.vmem (%p1748_p5), [#allocation3], %s1296_s8 }
  0x28   : > { %s182_s11 = scalar_lea.vmem %s2063_s0, %s1359_s30 }
  0x29   : > { %v195_v0 = vld [vmem:[%s182_s11] sm:$0xff]  ;;  %v197_v1 = vld [vmem:[%s182_s11 + $0x8] sm:$0xff] }
  0x2a   : > { %v199_v2 = vld [vmem:[%s182_s11 + $0x40] sm:$0xff]  ;;  %196 = vst [vmem:[%s179_s26] sm:$0xff] %v195_v0  ;;  %198 = vst [vmem:[%s179_s26 + $0x8] sm:$0xff] %v197_v1  ;;  %v201_v3 = vld [vmem:[%s182_s11 + $0x48] sm:$0xff] }
  0x2b   : > { %200 = vst [vmem:[%s179_s26 + $0x10] sm:$0xff] %v199_v2  ;;  %v203_v4 = vld [vmem:[%s182_s11 + $0x80] sm:$0xff]  ;;  %v205_v5 = vld [vmem:[%s182_s11 + $0x88] sm:$0xff]  ;;  %202 = vst [vmem:[%s179_s26 + $0x18] sm:$0xff] %v201_v3 }
  0x2c   : > { %204 = vst [vmem:[%s179_s26 + $0x20] sm:$0xff] %v203_v4  ;;  %206 = vst [vmem:[%s179_s26 + $0x28] sm:$0xff] %v205_v5  ;;  %v207_v6 = vld [vmem:[%s182_s11 + $0xc0] sm:$0xff]  ;;  %v209_v7 = vld [vmem:[%s182_s11 + $0xc8] sm:$0xff] }
  0x2d   : > { %208 = vst [vmem:[%s179_s26 + $0x30] sm:$0xff] %v207_v6  ;;  %210 = vst [vmem:[%s179_s26 + $0x38] sm:$0xff] %v209_v7 }
  0x2e PF: > { %216 = sbr.rel (!%p1762_p9) target bundleno = 98 (0x62), region = 43  ;;  %s218_s5 = sand.u32 (%p1762_p9), 1, %s1625_s18  }
  0x2f   : > { %s1360_s29 = sshll.u32 (%p1762_p9), %s1645_s23, 7  ;;  %s1299_s30 = sshll.u32 (%p1762_p9), %s218_s5, 8 }
  0x30   : > { %s223_s8 = sadd.s32 (%p1762_p9), %s1649_s24, %s1360_s29  ;;  %s2064_s1 = sld [smem:[#allocation10_spill]] (%p1762_p9) }
  0x31   : > { %s1302_s6 = sshll.u32 (%p1762_p9), %s223_s8, 2  ;;  %s1800_s10 = scalar_lea.vmem (%p1762_p9), [#allocation4], %s1299_s30 }
  0x36   : > { %s1795_s28 = scalar_lea.vmem %s2064_s1, %s1302_s6 }
  0x37   : > { %v242_v8 = vld [vmem:[%s1795_s28] sm:$0xf]  ;;  %v244_v9 = vld [vmem:[%s1795_s28 + $0x8] sm:$0xf]  ;;  %v246_v10 = vld [vmem:[%s1795_s28 + $0x10] sm:$0xf] }
  0x38   : > { %243 = vst [vmem:[%s1800_s10] sm:$0xf] %v242_v8  ;;  %245 = vst [vmem:[%s1800_s10 + $0x4] sm:$0xf] %v244_v9  ;;  %v248_v11 = vld [vmem:[%s1795_s28 + $0x18] sm:$0xf] }
  0x39   : > { %247 = vst [vmem:[%s1800_s10 + $0x8] sm:$0xf] %v246_v10  ;;  %v250_v12 = vld [vmem:[%s1795_s28 + $0x20] sm:$0xf]  ;;  %v252_v13 = vld [vmem:[%s1795_s28 + $0x28] sm:$0xf] }
  0x3a   : > { %249 = vst [vmem:[%s1800_s10 + $0xc] sm:$0xf] %v248_v11  ;;  %251 = vst [vmem:[%s1800_s10 + $0x10] sm:$0xf] %v250_v12  ;;  %v254_v14 = vld [vmem:[%s1795_s28 + $0x30] sm:$0xf] }
  0x3b   : > { %253 = vst [vmem:[%s1800_s10 + $0x14] sm:$0xf] %v252_v13  ;;  %v256_v15 = vld [vmem:[%s1795_s28 + $0x38] sm:$0xf]  ;;  %v258_v16 = vld [vmem:[%s1795_s28 + $0x40] sm:$0xf] }
  0x3c   : > { %255 = vst [vmem:[%s1800_s10 + $0x18] sm:$0xf] %v254_v14  ;;  %257 = vst [vmem:[%s1800_s10 + $0x1c] sm:$0xf] %v256_v15  ;;  %v260_v17 = vld [vmem:[%s1795_s28 + $0x48] sm:$0xf] }
  0x3d   : > { %259 = vst [vmem:[%s1800_s10 + $0x20] sm:$0xf] %v258_v16  ;;  %v262_v18 = vld [vmem:[%s1795_s28 + $0x50] sm:$0xf]  ;;  %v264_v19 = vld [vmem:[%s1795_s28 + $0x58] sm:$0xf] }
  0x3e   : > { %261 = vst [vmem:[%s1800_s10 + $0x24] sm:$0xf] %v260_v17  ;;  %263 = vst [vmem:[%s1800_s10 + $0x28] sm:$0xf] %v262_v18  ;;  %v266_v20 = vld [vmem:[%s1795_s28 + $0x60] sm:$0xf] }
  0x3f   : > { %265 = vst [vmem:[%s1800_s10 + $0x2c] sm:$0xf] %v264_v19  ;;  %v268_v21 = vld [vmem:[%s1795_s28 + $0x68] sm:$0xf]  ;;  %v270_v22 = vld [vmem:[%s1795_s28 + $0x70] sm:$0xf] }
  0x40   : > { %267 = vst [vmem:[%s1800_s10 + $0x30] sm:$0xf] %v266_v20  ;;  %269 = vst [vmem:[%s1800_s10 + $0x34] sm:$0xf] %v268_v21  ;;  %v272_v23 = vld [vmem:[%s1795_s28 + $0x78] sm:$0xf] }
  0x41   : > { %271 = vst [vmem:[%s1800_s10 + $0x38] sm:$0xf] %v270_v22  ;;  %v274_v24 = vld [vmem:[%s1795_s28 + $0x80] sm:$0xf]  ;;  %v276_v25 = vld [vmem:[%s1795_s28 + $0x88] sm:$0xf] }
  0x42   : > { %273 = vst [vmem:[%s1800_s10 + $0x3c] sm:$0xf] %v272_v23  ;;  %275 = vst [vmem:[%s1800_s10 + $0x40] sm:$0xf] %v274_v24  ;;  %v278_v26 = vld [vmem:[%s1795_s28 + $0x90] sm:$0xf] }
  0x43   : > { %277 = vst [vmem:[%s1800_s10 + $0x44] sm:$0xf] %v276_v25  ;;  %v280_v27 = vld [vmem:[%s1795_s28 + $0x98] sm:$0xf]  ;;  %v282_v28 = vld [vmem:[%s1795_s28 + $0xa0] sm:$0xf] }
  0x44   : > { %279 = vst [vmem:[%s1800_s10 + $0x48] sm:$0xf] %v278_v26  ;;  %281 = vst [vmem:[%s1800_s10 + $0x4c] sm:$0xf] %v280_v27  ;;  %v284_v29 = vld [vmem:[%s1795_s28 + $0xa8] sm:$0xf] }
  0x45   : > { %283 = vst [vmem:[%s1800_s10 + $0x50] sm:$0xf] %v282_v28  ;;  %v286_v30 = vld [vmem:[%s1795_s28 + $0xb0] sm:$0xf]  ;;  %v288_v31 = vld [vmem:[%s1795_s28 + $0xb8] sm:$0xf] }
  0x46   : > { %285 = vst [vmem:[%s1800_s10 + $0x54] sm:$0xf] %v284_v29  ;;  %287 = vst [vmem:[%s1800_s10 + $0x58] sm:$0xf] %v286_v30  ;;  %v290_v32 = vld [vmem:[%s1795_s28 + $0xc0] sm:$0xf] }
  0x47   : > { %289 = vst [vmem:[%s1800_s10 + $0x5c] sm:$0xf] %v288_v31  ;;  %v292_v33 = vld [vmem:[%s1795_s28 + $0xc8] sm:$0xf]  ;;  %v294_v34 = vld [vmem:[%s1795_s28 + $0xd0] sm:$0xf] }
  0x48   : > { %291 = vst [vmem:[%s1800_s10 + $0x60] sm:$0xf] %v290_v32  ;;  %293 = vst [vmem:[%s1800_s10 + $0x64] sm:$0xf] %v292_v33  ;;  %v296_v35 = vld [vmem:[%s1795_s28 + $0xd8] sm:$0xf] }
  0x49   : > { %295 = vst [vmem:[%s1800_s10 + $0x68] sm:$0xf] %v294_v34  ;;  %v298_v36 = vld [vmem:[%s1795_s28 + $0xe0] sm:$0xf]  ;;  %v300_v37 = vld [vmem:[%s1795_s28 + $0xe8] sm:$0xf] }
  0x4a   : > { %297 = vst [vmem:[%s1800_s10 + $0x6c] sm:$0xf] %v296_v35  ;;  %299 = vst [vmem:[%s1800_s10 + $0x70] sm:$0xf] %v298_v36  ;;  %v302_v38 = vld [vmem:[%s1795_s28 + $0xf0] sm:$0xf] }
  0x4b   : > { %301 = vst [vmem:[%s1800_s10 + $0x74] sm:$0xf] %v300_v37  ;;  %v304_v39 = vld [vmem:[%s1795_s28 + $0xf8] sm:$0xf]  ;;  %v306_v40 = vld [vmem:[%s1795_s28 + $0x100] sm:$0xf] }
  0x4c   : > { %303 = vst [vmem:[%s1800_s10 + $0x78] sm:$0xf] %v302_v38  ;;  %305 = vst [vmem:[%s1800_s10 + $0x7c] sm:$0xf] %v304_v39  ;;  %v308_v41 = vld [vmem:[%s1795_s28 + $0x108] sm:$0xf] }
  0x4d   : > { %307 = vst [vmem:[%s1800_s10 + $0x80] sm:$0xf] %v306_v40  ;;  %v310_v42 = vld [vmem:[%s1795_s28 + $0x110] sm:$0xf]  ;;  %v312_v43 = vld [vmem:[%s1795_s28 + $0x118] sm:$0xf] }
  0x4e   : > { %309 = vst [vmem:[%s1800_s10 + $0x84] sm:$0xf] %v308_v41  ;;  %311 = vst [vmem:[%s1800_s10 + $0x88] sm:$0xf] %v310_v42  ;;  %v314_v44 = vld [vmem:[%s1795_s28 + $0x120] sm:$0xf] }
  0x4f   : > { %313 = vst [vmem:[%s1800_s10 + $0x8c] sm:$0xf] %v312_v43  ;;  %v316_v45 = vld [vmem:[%s1795_s28 + $0x128] sm:$0xf]  ;;  %v318_v46 = vld [vmem:[%s1795_s28 + $0x130] sm:$0xf] }
  0x50   : > { %315 = vst [vmem:[%s1800_s10 + $0x90] sm:$0xf] %v314_v44  ;;  %317 = vst [vmem:[%s1800_s10 + $0x94] sm:$0xf] %v316_v45  ;;  %v320_v47 = vld [vmem:[%s1795_s28 + $0x138] sm:$0xf] }
  0x51   : > { %319 = vst [vmem:[%s1800_s10 + $0x98] sm:$0xf] %v318_v46  ;;  %v322_v48 = vld [vmem:[%s1795_s28 + $0x140] sm:$0xf]  ;;  %v324_v49 = vld [vmem:[%s1795_s28 + $0x148] sm:$0xf] }
  0x52   : > { %321 = vst [vmem:[%s1800_s10 + $0x9c] sm:$0xf] %v320_v47  ;;  %323 = vst [vmem:[%s1800_s10 + $0xa0] sm:$0xf] %v322_v48  ;;  %v326_v50 = vld [vmem:[%s1795_s28 + $0x150] sm:$0xf] }
  0x53   : > { %325 = vst [vmem:[%s1800_s10 + $0xa4] sm:$0xf] %v324_v49  ;;  %v328_v51 = vld [vmem:[%s1795_s28 + $0x158] sm:$0xf]  ;;  %v330_v52 = vld [vmem:[%s1795_s28 + $0x160] sm:$0xf] }
  0x54   : > { %327 = vst [vmem:[%s1800_s10 + $0xa8] sm:$0xf] %v326_v50  ;;  %329 = vst [vmem:[%s1800_s10 + $0xac] sm:$0xf] %v328_v51  ;;  %v332_v53 = vld [vmem:[%s1795_s28 + $0x168] sm:$0xf] }
  0x55   : > { %331 = vst [vmem:[%s1800_s10 + $0xb0] sm:$0xf] %v330_v52  ;;  %v334_v54 = vld [vmem:[%s1795_s28 + $0x170] sm:$0xf]  ;;  %v336_v55 = vld [vmem:[%s1795_s28 + $0x178] sm:$0xf] }
  0x56   : > { %333 = vst [vmem:[%s1800_s10 + $0xb4] sm:$0xf] %v332_v53  ;;  %335 = vst [vmem:[%s1800_s10 + $0xb8] sm:$0xf] %v334_v54  ;;  %v338_v56 = vld [vmem:[%s1795_s28 + $0x180] sm:$0xf] }
  0x57   : > { %337 = vst [vmem:[%s1800_s10 + $0xbc] sm:$0xf] %v336_v55  ;;  %v340_v57 = vld [vmem:[%s1795_s28 + $0x188] sm:$0xf]  ;;  %v342_v58 = vld [vmem:[%s1795_s28 + $0x190] sm:$0xf] }
  0x58   : > { %339 = vst [vmem:[%s1800_s10 + $0xc0] sm:$0xf] %v338_v56  ;;  %341 = vst [vmem:[%s1800_s10 + $0xc4] sm:$0xf] %v340_v57  ;;  %v344_v59 = vld [vmem:[%s1795_s28 + $0x198] sm:$0xf] }
  0x59   : > { %343 = vst [vmem:[%s1800_s10 + $0xc8] sm:$0xf] %v342_v58  ;;  %v346_v60 = vld [vmem:[%s1795_s28 + $0x1a0] sm:$0xf]  ;;  %v348_v61 = vld [vmem:[%s1795_s28 + $0x1a8] sm:$0xf] }
  0x5a   : > { %345 = vst [vmem:[%s1800_s10 + $0xcc] sm:$0xf] %v344_v59  ;;  %347 = vst [vmem:[%s1800_s10 + $0xd0] sm:$0xf] %v346_v60  ;;  %v350_v62 = vld [vmem:[%s1795_s28 + $0x1b0] sm:$0xf] }
  0x5b   : > { %349 = vst [vmem:[%s1800_s10 + $0xd4] sm:$0xf] %v348_v61  ;;  %v352_v63 = vld [vmem:[%s1795_s28 + $0x1b8] sm:$0xf]  ;;  %v354_v0 = vld [vmem:[%s1795_s28 + $0x1c0] sm:$0xf] }
  0x5c   : > { %351 = vst [vmem:[%s1800_s10 + $0xd8] sm:$0xf] %v350_v62  ;;  %353 = vst [vmem:[%s1800_s10 + $0xdc] sm:$0xf] %v352_v63  ;;  %v356_v1 = vld [vmem:[%s1795_s28 + $0x1c8] sm:$0xf] }
  0x5d   : > { %355 = vst [vmem:[%s1800_s10 + $0xe0] sm:$0xf] %v354_v0  ;;  %v358_v2 = vld [vmem:[%s1795_s28 + $0x1d0] sm:$0xf]  ;;  %v360_v3 = vld [vmem:[%s1795_s28 + $0x1d8] sm:$0xf] }
  0x5e   : > { %357 = vst [vmem:[%s1800_s10 + $0xe4] sm:$0xf] %v356_v1  ;;  %359 = vst [vmem:[%s1800_s10 + $0xe8] sm:$0xf] %v358_v2  ;;  %v362_v4 = vld [vmem:[%s1795_s28 + $0x1e0] sm:$0xf] }
  0x5f   : > { %361 = vst [vmem:[%s1800_s10 + $0xec] sm:$0xf] %v360_v3  ;;  %v364_v5 = vld [vmem:[%s1795_s28 + $0x1e8] sm:$0xf]  ;;  %v366_v6 = vld [vmem:[%s1795_s28 + $0x1f0] sm:$0xf] }
  0x60   : > { %363 = vst [vmem:[%s1800_s10 + $0xf0] sm:$0xf] %v362_v4  ;;  %365 = vst [vmem:[%s1800_s10 + $0xf4] sm:$0xf] %v364_v5  ;;  %v368_v7 = vld [vmem:[%s1795_s28 + $0x1f8] sm:$0xf] }
  0x61   : > { %367 = vst [vmem:[%s1800_s10 + $0xf8] sm:$0xf] %v366_v6  ;;  %369 = vst [vmem:[%s1800_s10 + $0xfc] sm:$0xf] %v368_v7 }
  0x62 PF: > { %p1303_p0 = scmp.ge.s32.totalorder %s1653_s25, 1  ;;  %p532_p1 = scmp.lt.s32.totalorder %s1653_s25, 9 }
  0x64   : > { %p533_p2 = pnand %p1303_p0, %p532_p1 }
  0x65   : > { %s539_s0 = sand.u32 (!%p533_p2), 1, %s1629_s19   ;;  %s546_s11 = sand.u32 (!%p533_p2), 1, %s1621_s17  }
  0x66   : > { %536 = sbr.rel (%p533_p2) target bundleno = 450 (0x1c2), region = 92  ;;  %s1304_s26 = sshll.u32 (!%p533_p2), %s539_s0, 6 }
  0x67   : > { %s1305_s5 = sshll.u32 (!%p533_p2), %s546_s11, 8  ;;  %s577_s29 = sand.u32 (!%p533_p2), 1, %s1613_s15  }
  0x68   : > { %p582_p3 = scmp.lt.s32.totalorder (!%p533_p2), %s1641_s22, 1  ;;  %s1306_s28 = sshll.u32 (!%p533_p2), %s577_s29, 4 }
  0x69   : > { %s1944_s24 = scalar_lea.vmem (!%p533_p2), [#allocation3], %s1304_s26  ;;  %s1946_s17 = scalar_lea.vmem (!%p533_p2), [#allocation4], %s1305_s5 }
  0x6a   : > { %s1948_s19 = scalar_lea.vmem (!%p533_p2), [#allocation5], %s1306_s28  ;;  %p1307_p4 = scmp.ne.s32.totalorder (!%p533_p2), %s1637_s21, 0 }
  0x6b   : > { %s1934_s30 = scalar_select %p582_p3, %s1641_s22, 1 }
  0x6c   : > { %592 = sbr.rel (%p1307_p4) target bundleno = 116 (0x74), region = 104 }
  0x6d   : > { %s584_s9 = scalar_lea.vmem %s2049_s2, %s1934_s30  ;;  %s587_s27 = scalar_lea.vmem %s2050_s3, %s1934_s30 }
  0x71   : > { %v1655_v8 = vmov 0.0  }
  0x72   : > { %593 = vst [vmem:[#allocation2 + $0x10] sm:$0xff] %v1655_v8  ;;  %594 = vst [vmem:[#allocation2] sm:$0xff] %v1655_v8 }
  0x73   : > { %595 = vst [vmem:[#allocation2 + $0x18] sm:$0xff] %v1655_v8  ;;  %596 = vst [vmem:[#allocation2 + $0x8] sm:$0xff] %v1655_v8 }
  0x74 PF: > { %v1521_v9 = vld [vmem:[%s1946_s17 + $0x78] sm:$0xff]   ;;  %v1525_v13 = vld [vmem:[%s1946_s17 + $0x70] sm:$0xff]   ;;  %v1529_v17 = vld [vmem:[%s1946_s17 + $0x68] sm:$0xff]   ;;  %p1348_p5 = scmp.ne.s32.totalorder %s1637_s21, 3 }
  0x75   : > { %v1522_v10 = vld [vmem:[%s1946_s17 + $0xf8] sm:$0xff]   ;;  %1376 = vmatprep.subr.bf16.mxu0 %v1521_v9  ;;  %v1526_v14 = vld [vmem:[%s1946_s17 + $0xf0] sm:$0xff]   ;;  %v1530_v18 = vld [vmem:[%s1946_s17 + $0xe8] sm:$0xff]  }
  0x76   : > { %v1523_v11 = vld [vmem:[%s1946_s17 + $0x38] sm:$0xff]   ;;  %1404 = vmatprep.subr.bf16.mxu1 %v1522_v10  ;;  %v1527_v15 = vld [vmem:[%s1946_s17 + $0x30] sm:$0xff]   ;;  %v1531_v19 = vld [vmem:[%s1946_s17 + $0x28] sm:$0xff]  }
  0x77   : > { %v1524_v12 = vld [vmem:[%s1946_s17 + $0xb8] sm:$0xff]   ;;  %1377 = vmatpush3.bf16.msra.mxu0 %v1523_v11  ;;  %v1528_v16 = vld [vmem:[%s1946_s17 + $0xb0] sm:$0xff]   ;;  %v1532_v20 = vld [vmem:[%s1946_s17 + $0xa8] sm:$0xff]  }
  0x78   : > { %1405 = vmatpush3.bf16.msra.mxu1 %v1524_v12  ;;  %1378 = vmatprep.subr.bf16.mxu0 %v1525_v13  ;;  %v1533_v21 = vld [vmem:[%s1946_s17 + $0x60] sm:$0xff]   ;;  %v1537_v25 = vld [vmem:[%s1946_s17 + $0x58] sm:$0xff]   ;;  %v1541_v29 = vld [vmem:[%s1946_s17 + $0x50] sm:$0xff]  }
  0x79   : > { %1406 = vmatprep.subr.bf16.mxu1 %v1526_v14  ;;  %v1534_v22 = vld [vmem:[%s1946_s17 + $0xe0] sm:$0xff]   ;;  %v1538_v26 = vld [vmem:[%s1946_s17 + $0xd8] sm:$0xff]   ;;  %v1542_v30 = vld [vmem:[%s1946_s17 + $0xd0] sm:$0xff]  }
  0x7a   : > { %v1535_v23 = vld [vmem:[%s1946_s17 + $0x20] sm:$0xff]   ;;  %v1539_v27 = vld [vmem:[%s1946_s17 + $0x18] sm:$0xff]   ;;  %v1543_v31 = vld [vmem:[%s1946_s17 + $0x10] sm:$0xff]  }
  0x7b   : > { %1379 = vmatpush3.bf16.msra.mxu0 %v1527_v15  ;;  %v1536_v24 = vld [vmem:[%s1946_s17 + $0xa0] sm:$0xff]   ;;  %v1540_v28 = vld [vmem:[%s1946_s17 + $0x98] sm:$0xff]   ;;  %v1544_v32 = vld [vmem:[%s1946_s17 + $0x90] sm:$0xff]  }
  0x7c   : > { %1407 = vmatpush3.bf16.msra.mxu1 %v1528_v16  ;;  %1380 = vmatprep.subr.bf16.mxu0 %v1529_v17  ;;  %v1545_v33 = vld [vmem:[%s1946_s17 + $0x48] sm:$0xff]   ;;  %v1549_v37 = vld [vmem:[%s1946_s17 + $0x40] sm:$0xff]   ;;  %v597_v56 = vld [vmem:[#allocation2 + $0x10] sm:$0xff] }
  0x7d   : > { %1408 = vmatprep.subr.bf16.mxu1 %v1530_v18  ;;  %v1546_v34 = vld [vmem:[%s1946_s17 + $0xc8] sm:$0xff]   ;;  %v1550_v38 = vld [vmem:[%s1946_s17 + $0xc0] sm:$0xff]   ;;  %v599_v10 = vld [vmem:[#allocation2 + $0x18] sm:$0xff] }
  0x7e   : > { %v1547_v35 = vld [vmem:[%s1946_s17 + $0x8] sm:$0xff]   ;;  %v1551_v39 = vld [vmem:[%s1946_s17] sm:$0xff]  }
  0x7f   : > { %1381 = vmatpush3.bf16.msra.mxu0 %v1531_v19  ;;  %v1548_v36 = vld [vmem:[%s1946_s17 + $0x88] sm:$0xff]   ;;  %v1552_v40 = vld [vmem:[%s1946_s17 + $0x80] sm:$0xff]  }
  0x80   : > { %1409 = vmatpush3.bf16.msra.mxu1 %v1532_v20  ;;  %1382 = vmatprep.subr.bf16.mxu0 %v1533_v21  ;;  %v1553_v41 = vld [vmem:[%s1944_s24] ss:$16 sps:$4 sm:$0xff]   ;;  %v1555_v42 = vld [vmem:[%s1944_s24 + $0x4] ss:$16 sps:$4 sm:$0xff]   ;;  %v1556_v43 = vld [vmem:[%s1944_s24 + $0x8] ss:$16 sps:$4 sm:$0xff]  }
  0x81   : > { %1410 = vmatprep.subr.bf16.mxu1 %v1534_v22  ;;  %v1558_v44 = vld [vmem:[%s1944_s24 + $0xc] ss:$16 sps:$4 sm:$0xff]   ;;  %937 = vmatprep.mubr.bf16.mxu0 %v1555_v42  ;;  %v1559_v45 = vld [vmem:[%s1944_s24 + $0x24] ss:$16 sps:$4 sm:$0xff]   ;;  %v1563_v47 = vld [vmem:[%s1944_s24 + $0x20] ss:$16 sps:$4 sm:$0xff]  }
  0x82   : > { %986 = vmatprep.mubr.bf16.mxu1 %v1558_v44  ;;  %v1561_v46 = vld [vmem:[%s1944_s24 + $0x2c] ss:$16 sps:$4 sm:$0xff]   ;;  %v1564_v48 = vld [vmem:[%s1944_s24 + $0x28] ss:$16 sps:$4 sm:$0xff]   ;;  %v598_v1 = vld [vmem:[#allocation2] sm:$0xff] }
  0x83   : > { %1383 = vmatpush3.bf16.msra.mxu0 %v1535_v23  ;;  %v600_v18 = vld [vmem:[#allocation2 + $0x8] sm:$0xff] }
  0x84   : > { %1411 = vmatpush3.bf16.msra.mxu1 %v1536_v24  ;;  %1384 = vmatprep.subr.bf16.mxu0 %v1537_v25 }
  0x85   : > { %1412 = vmatprep.subr.bf16.mxu1 %v1538_v26 }
  0x87   : > { %1385 = vmatpush3.bf16.msra.mxu0 %v1539_v27 }
  0x88   : > { %1413 = vmatpush3.bf16.msra.mxu1 %v1540_v28  ;;  %1386 = vmatprep.subr.bf16.mxu0 %v1541_v29 }
  0x89   : > { %1414 = vmatprep.subr.bf16.mxu1 %v1542_v30 }
  0x8b   : > { %1387 = vmatpush3.bf16.msra.mxu0 %v1543_v31 }
  0x8c   : > { %1415 = vmatpush3.bf16.msra.mxu1 %v1544_v32  ;;  %1388 = vmatprep.subr.bf16.mxu0 %v1545_v33 }
  0x8d   : > { %1416 = vmatprep.subr.bf16.mxu1 %v1546_v34 }
  0x8f   : > { %1389 = vmatpush3.bf16.msra.mxu0 %v1547_v35 }
  0x90   : > { %1417 = vmatpush3.bf16.msra.mxu1 %v1548_v36  ;;  %1390 = vmatprep.subr.bf16.mxu0 %v1549_v37 }
  0x91   : > { %1418 = vmatprep.subr.bf16.mxu1 %v1550_v38 }
  0x93   : > { %1391 = vmatpush3.bf16.msra.mxu0 %v1551_v39 }
  0x94   : > { %1419 = vmatpush3.bf16.msra.mxu1 %v1552_v40 }
  0x96   : > { %938 = vmatmul.mubr.bf16.vlgmr.msra.gmra.mxu0 %v1553_v41 }
  0x97   : > { %987 = vmatmul.mubr.bf16.vlgmr.msra.gmra.mxu1 %v1556_v43  ;;  %945 = vmatprep.mubr.bf16.mxu0 %v1559_v45 }
  0x98   : > { %994 = vmatprep.mubr.bf16.mxu1 %v1561_v46 }
  0x9e   : > { %946 = vmatmul.mubr.bf16.gmra.mxu0 %v1563_v47 }
  0x9f   : > { %995 = vmatmul.mubr.bf16.gmra.mxu1 %v1564_v48 }
 0x156   : > { %v1392_v49 = vpop.f32.mrf.mxu0 }
 0x157   : > { %v1420_v50 = vpop.f32.mrf.mxu1 }
 0x158   : > { %v1393_v51 = vpop.f32.mrf.mxu0 }
 0x159   : > { %v1394_v52 = vadd.f32 %v1393_v51, %v1392_v49  ;;  %v1421_v53 = vpop.f32.mrf.mxu1 }
 0x15a   : > { %v1422_v54 = vadd.f32 %v1421_v53, %v1420_v50  ;;  %v1395_v55 = vpop.f32.mrf.mxu0 }
 0x15b   : > { %v1423_v57 = vpop.f32.mrf.mxu1 }
 0x15c   : > { %v989_v58 = vadd.f32 %v1422_v54, %v1394_v52  ;;  %v1396_v59 = vpop.f32.mrf.mxu0 }
 0x15d   : > { %v1397_v60 = vadd.f32 %v1396_v59, %v1395_v55  ;;  %v1424_v61 = vpop.f32.mrf.mxu1 }
 0x15e   : > { %v1003_v62 = vadd.f32 %v989_v58, %v597_v56  ;;  %v1425_v63 = vadd.f32 %v1424_v61, %v1423_v57  ;;  %v1398_v0 = vpop.f32.mrf.mxu0 }
 0x15f   : > { %v1426_v2 = vpop.f32.mrf.mxu1 }
 0x160   : > { %1007 = vst [vmem:[#allocation2 + $0x10] sm:$0xff] %v1003_v62  ;;  %v992_v3 = vadd.f32 %v1425_v63, %v1397_v60  ;;  %v1399_v4 = vpop.f32.mrf.mxu0 }
 0x161   : > { %v1400_v5 = vadd.f32 %v1399_v4, %v1398_v0  ;;  %v1427_v6 = vpop.f32.mrf.mxu1 }
 0x162   : > { %v1004_v7 = vadd.f32 %v992_v3, %v598_v1  ;;  %v1428_v8 = vadd.f32 %v1427_v6, %v1426_v2  ;;  %v1401_v9 = vpop.f32.mrf.mxu0 }
 0x163   : > { %v1429_v11 = vpop.f32.mrf.mxu1 }
 0x164   : > { %1008 = vst [vmem:[#allocation2] sm:$0xff] %v1004_v7  ;;  %v997_v12 = vadd.f32 %v1428_v8, %v1400_v5  ;;  %v1402_v13 = vpop.f32.mrf.mxu0 }
 0x165   : > { %v1403_v14 = vadd.f32 %v1402_v13, %v1401_v9  ;;  %v1430_v15 = vpop.f32.mrf.mxu1 }
 0x166   : > { %v1005_v16 = vadd.f32 %v997_v12, %v599_v10  ;;  %v1431_v17 = vadd.f32 %v1430_v15, %v1429_v11 }
 0x168   : > { %1009 = vst [vmem:[#allocation2 + $0x18] sm:$0xff] %v1005_v16  ;;  %v1000_v19 = vadd.f32 %v1431_v17, %v1403_v14  ;;  %1014 = sbr.rel (%p1348_p5) target bundleno = 441 (0x1b9), region = 108 }
 0x16a   : > { %v1006_v20 = vadd.f32 %v1000_v19, %v600_v18 }
 0x16c   : > { %1010 = vst [vmem:[#allocation2 + $0x8] sm:$0xff] %v1006_v20 }
 0x16d   : > { %v1015_v21 = vld [vmem:[#allocation2 + $0x10] sm:$0xff]  ;;  %v1016_v22 = vld [vmem:[#allocation2] sm:$0xff] }
 0x16e   : > { %v1032_v24 = vadd.f32 %v1016_v22, %v1015_v21  ;;  %v1349_v55 = vld [vmem:[%s584_s9] ss:$0 sm:$0xff] }
 0x16f   : > { %v1017_v23 = vld [vmem:[#allocation2 + $0x18] sm:$0xff]  ;;  %v1350_v60 = vld [vmem:[%s587_s27] ss:$0 sm:$0xff] }
 0x170   : > { %v1033_v26 = vadd.f32 %v1032_v24, %v1017_v23 }
 0x173   : > { %v1018_v25 = vld [vmem:[#allocation2 + $0x8] sm:$0xff] }
 0x174   : > { %v1034_v27 = vadd.f32 %v1033_v26, %v1018_v25 }
 0x176   : > { %v1035_v28 = vrot.slane %v1034_v27, 4 }
 0x178   : > { %v1036_v29 = vadd.f32 %v1035_v28, %v1034_v27 }
 0x17a   : > { %v1037_v30 = vrot.slane %v1036_v29, 2 }
 0x17c   : > { %v1038_v31 = vadd.f32 %v1037_v30, %v1036_v29 }
 0x17e   : > { %v1039_v32 = vrot.slane %v1038_v31, 1 }
 0x180   : > { %v1040_v33 = vadd.f32 %v1039_v32, %v1038_v31 }
 0x182   : > { %v1041_v34 = vmul.f32 0.03125, %v1040_v33 }
 0x184   : > { %v1042_v35 = vsub.f32 %v1015_v21, %v1041_v34  ;;  %v1043_v36 = vsub.f32 %v1016_v22, %v1041_v34  ;;  %v1044_v37 = vsub.f32 %v1017_v23, %v1041_v34  ;;  %v1045_v38 = vsub.f32 %v1018_v25, %v1041_v34 }
 0x186   : > { %v1050_v39 = vmul.f32 %v1042_v35, %v1042_v35  ;;  %v1051_v40 = vmul.f32 %v1043_v36, %v1043_v36  ;;  %v1052_v41 = vmul.f32 %v1044_v37, %v1044_v37  ;;  %v1053_v42 = vmul.f32 %v1045_v38, %v1045_v38 }
 0x188   : > { %v1054_v43 = vadd.f32 %v1051_v40, %v1050_v39 }
 0x18a   : > { %v1055_v44 = vadd.f32 %v1054_v43, %v1052_v41 }
 0x18c   : > { %v1056_v45 = vadd.f32 %v1055_v44, %v1053_v42 }
 0x18e   : > { %v1057_v46 = vrot.slane %v1056_v45, 4 }
 0x190   : > { %v1058_v47 = vadd.f32 %v1057_v46, %v1056_v45 }
 0x192   : > { %v1059_v48 = vrot.slane %v1058_v47, 2 }
 0x194   : > { %v1060_v49 = vadd.f32 %v1059_v48, %v1058_v47 }
 0x196   : > { %v1061_v50 = vrot.slane %v1060_v49, 1 }
 0x198   : > { %v1062_v51 = vadd.f32 %v1061_v50, %v1060_v49 }
 0x19a   : > { %v1063_v52 = vmul.f32 0.03125, %v1062_v51 }
 0x19c   : > { %v1064_v53 = vadd.f32 1e-05, %v1063_v52 }
 0x19e   : > { %1565 = vrsqrt.f32 %v1064_v53 }
 0x1ab   : > { %v1566_v54 = vpop.eup %1565 }
 0x1ac   : > { %v1066_v56 = vmul.f32 %v1566_v54, %v1042_v35  ;;  %v1067_v57 = vmul.f32 %v1566_v54, %v1043_v36  ;;  %v1068_v58 = vmul.f32 %v1566_v54, %v1044_v37  ;;  %v1069_v59 = vmul.f32 %v1566_v54, %v1045_v38 }
 0x1ae   : > { %v1077_v61 = vmul.f32 %v1349_v55, %v1066_v56  ;;  %v1078_v62 = vmul.f32 %v1349_v55, %v1067_v57  ;;  %v1079_v63 = vmul.f32 %v1349_v55, %v1068_v58  ;;  %v1080_v0 = vmul.f32 %v1349_v55, %v1069_v59 }
 0x1b0   : > { %v1088_v1 = vadd.f32 %v1350_v60, %v1077_v61  ;;  %v1089_v2 = vadd.f32 %v1350_v60, %v1078_v62  ;;  %v1090_v3 = vadd.f32 %v1350_v60, %v1079_v63  ;;  %v1091_v4 = vadd.f32 %v1350_v60, %v1080_v0 }
 0x1b2   : > { %vm1092_vm0 = vcmp.gt.f32.partialorder %v1088_v1, 0.0  ;;  %vm1093_vm1 = vcmp.gt.f32.partialorder %v1089_v2, 0.0  ;;  %v1096_v5 = vmul.f32 0.2, %v1088_v1  ;;  %v1097_v6 = vmul.f32 0.2, %v1089_v2 }
 0x1b3   : > { %vm1094_vm2 = vcmp.gt.f32.partialorder %v1090_v3, 0.0  ;;  %vm1095_vm3 = vcmp.gt.f32.partialorder %v1091_v4, 0.0  ;;  %v1098_v7 = vmul.f32 0.2, %v1090_v3  ;;  %v1099_v8 = vmul.f32 0.2, %v1091_v4 }
 0x1b4   : > { %v1100_v9 = vsel %vm1092_vm0, %v1088_v1, %v1096_v5  ;;  %v1101_v10 = vsel %vm1093_vm1, %v1089_v2, %v1097_v6 }
 0x1b5   : > { %v1368_v11 = vpack.c.bf16 %v1101_v10, %v1100_v9  ;;  %v1102_v12 = vsel %vm1094_vm2, %v1090_v3, %v1098_v7  ;;  %v1103_v13 = vsel %vm1095_vm3, %v1091_v4, %v1099_v8 }
 0x1b6   : > { %v1373_v14 = vpack.c.bf16 %v1103_v13, %v1102_v12 }
 0x1b7   : > { %1369 = vst [vmem:[%s1948_s19] sm:$0xff] %v1368_v11  }
 0x1b8   : > { %1375 = vst [vmem:[%s1948_s19 + $0x8] sm:$0xff] %v1373_v14  }
 0x1b9 PF: > { %1130 = sbr.rel (!%p1775_p12) target bundleno = 450 (0x1c2), region = 112  ;;  %s1356_s27 = sshll.u32 (%p1775_p12), %s1641_s22, 2 }
 0x1ba   : > { %s1132_s26 = scalar_lea.vmem (%p1775_p12), %s2051_s4, %s1356_s27 }
 0x1be   : > { %v1149_v15 = vld [vmem:[%s1948_s19] sm:$0xf]  ;;  %v1151_v16 = vld [vmem:[%s1948_s19 + $0x4] sm:$0xf] }
 0x1bf   : > { %v1153_v17 = vld [vmem:[%s1948_s19 + $0x8] sm:$0xf]  ;;  %v1155_v18 = vld [vmem:[%s1948_s19 + $0xc] sm:$0xf]  ;;  %1150 = vst [vmem:[%s1132_s26] sm:$0xf] %v1149_v15 }
 0x1c0   : > { %1152 = vst [vmem:[%s1132_s26 + $0x8] sm:$0xf] %v1151_v16  ;;  %1154 = vst [vmem:[%s1132_s26 + $0x10] sm:$0xf] %v1153_v17 }
 0x1c1   : > { %1156 = vst [vmem:[%s1132_s26 + $0x18] sm:$0xf] %v1155_v18 }
 0x1c2 PF: > { %s14_s25 = sadd.s32 1, %s1653_s25   ;;  %s2065_s22 = sld [smem:[#allocation6_spill]] }
 0x1c3   : > { %p11_p6 = scmp.ge.s32.totalorder %s14_s25, 10   ;;  %s2066_s14 = sld [smem:[#allocation7_spill]] }
 0x1c4   : > { %s2067_s24 = sld [smem:[#allocation8_spill]]  ;;  %s2068_s15 = smov %s1617_s16 }
 0x1c5   : > { %s2069_s16 = smov %s1773_s13  ;;  %s2070_s17 = smov %s1625_s18 }
 0x1c6   : > { %s2071_s18 = smov %s1770_s12  ;;  %s2072_s19 = smov %s1633_s20 }
 0x1c7   : > { %s2073_s20 = smov %s1756_s7  ;;  %s2074_s21 = smov %s1645_s23 }
 0x1c8   :  { %13 = sbr.rel (!%p11_p6) target bundleno = 9 (0x9), region = 198 }
 0x1c9   : > { %s2075_s23 = smov %s2066_s14 }

// kernel: discriminator_forward.7
= control target key start
LH: loop header
LB: loop body
LE: loop exit
PB: predicated region body
PF: predicated region fallthrough
CT: control target
= control target key end

     0   :  { %v684_v1 = vmov 1966171168   ;;  %v44_v3 = vlaneseq  ;;  %vm651_vm0 = vcmask 7168   ;;  %s831_s2 = inlined_call_operand.<no memory space> [shape: f32[1,1], index: 2, kind: input, shape index: {}]   ;;  %s832_s1 = inlined_call_operand.vmem [shape: bf16[1,4096], index: 1, kind: input, shape index: {}]   ;;  %s833_s0 = inlined_call_operand.vmem [shape: bf16[8,4096], index: 0, kind: input, shape index: {}]   ;;  %s834_s3 = inlined_call_operand.vmem [shape: f32[8,1], index: 3, kind: output, shape index: {}]  }
   0x1   :  { %v8_v0 = vstv %s831_s2  ;;  %v42_v2 = vunpack.c.l.s4 %v684_v1  ;;  %v32_v7 = vld [vmem:[%s832_s1] sm:$0xff]  ;;  %v33_v14 = vld [vmem:[%s832_s1 + $0x8] sm:$0xff]  ;;  %v34_v47 = vld [vmem:[%s832_s1 + $0x10] sm:$0xff] }
   0x2   :  { %9 = vst [vmem:[#allocation2] sm:$0x1] %v8_v0  ;;  %v45_v5 = vshrl.u32 %v44_v3, 7  ;;  %v40_v9 = vcombine.high %v32_v7, %v32_v7  ;;  %v89_v26 = vcombine.high %v33_v14, %v33_v14  ;;  %v16_v38 = vld [vmem:[%s833_s0] sm:$0xff]  ;;  %v17_v46 = vld [vmem:[%s833_s0 + $0x8] sm:$0xff]  ;;  %v18_v58 = vld [vmem:[%s833_s0 + $0x10] sm:$0xff] }
   0x3   :  { %v43_v4 = vunpack.c.0.s8 %v42_v2 }
   0x4   :  { %v720_v19 = vsub.s32 0, %v45_v5 }
   0x5   :  { %v708_v6 = vsub.s32 %v43_v4, %v45_v5 }
   0x7   :  { %v47_v8 = vrot.slane %v32_v7, %v708_v6  ;;  %v54_v11 = vrot.slane %v40_v9, %v708_v6  ;;  %v96_v21 = vrot.slane %v33_v14, %v708_v6  ;;  %v103_v36 = vrot.slane %v89_v26, %v708_v6 }
   0x8   :  { %v145_v59 = vrot.slane %v34_v47, %v708_v6  ;;  %v138_v9 = vcombine.high %v34_v47, %v34_v47 }
   0x9   :  { %v55_v10 = vcombine.high %v47_v8, %v47_v8  ;;  %v63_v12 = vrot.slane %v47_v8, %v708_v6  ;;  %v56_v15 = vcombine.high %v54_v11, %v54_v11  ;;  %v70_v22 = vrot.slane %v54_v11, %v708_v6  ;;  %v19_v8 = vld [vmem:[%s833_s0 + $0x18] sm:$0xff] }
   0xa   :  { %v104_v31 = vcombine.high %v96_v21, %v96_v21  ;;  %v112_v39 = vrot.slane %v96_v21, %v708_v6  ;;  %v105_v48 = vcombine.high %v103_v36, %v103_v36  ;;  %v119_v60 = vrot.slane %v103_v36, %v708_v6 }
   0xb   :  { %v77_v13 = vrot.slane %v55_v10, %v708_v6  ;;  %v85_v16 = vcombine.high %v63_v12, %v63_v12  ;;  %v237_v18 = vpack.i.b16 %v63_v12, %v63_v12  ;;  %v84_v23 = vrot.slane %v56_v15, %v708_v6 }
   0xc   :  { %v86_v29 = vcombine.high %v70_v22, %v70_v22  ;;  %v265_v34 = vpack.i.b16 %v70_v22, %v70_v22  ;;  %v126_v40 = vrot.slane %v104_v31, %v708_v6  ;;  %v134_v50 = vcombine.high %v112_v39, %v112_v39 }
   0xd   :  { %v87_v17 = vcombine.high %v77_v13, %v77_v13  ;;  %v244_v20 = vpack.i.b16 %v77_v13, %v77_v13  ;;  %v251_v24 = vpack.i.b16 %v85_v16, %v85_v16  ;;  %v242_v27 = vrot.slane %v237_v18, %v720_v19 }
   0xe   :  { %v88_v30 = vcombine.high %v84_v23, %v84_v23  ;;  %v272_v35 = vpack.i.b16 %v84_v23, %v84_v23  ;;  %v279_v41 = vpack.i.b16 %v86_v29, %v86_v29  ;;  %v270_v42 = vrot.slane %v265_v34, %v720_v19 }
   0xf   :  { %v258_v25 = vpack.i.b16 %v87_v17, %v87_v17  ;;  %v249_v28 = vrot.slane %v244_v20, %v720_v19  ;;  %v256_v32 = vrot.slane %v251_v24, %v720_v19  ;;  %v136_v51 = vcombine.high %v126_v40, %v126_v40  ;;  %v20_v24 = vld [vmem:[%s833_s0 + $0x20] sm:$0xff] }
  0x10   :  { %v277_v43 = vrot.slane %v272_v35, %v720_v19  ;;  %v286_v44 = vpack.i.b16 %v88_v30, %v88_v30  ;;  %v293_v52 = vpack.i.b16 %v112_v39, %v112_v39  ;;  %v300_v53 = vpack.i.b16 %v126_v40, %v126_v40  ;;  %v35_v40 = vld [vmem:[%s832_s1 + $0x18] sm:$0xff] }
  0x11   :  { %v263_v33 = vrot.slane %v258_v25, %v720_v19  ;;  %v657_v37 = vcombine.low %v242_v27, %v249_v28  ;;  %v284_v54 = vrot.slane %v279_v41, %v720_v19  ;;  %v133_v63 = vrot.slane %v105_v48, %v708_v6 }
  0x12   :  { %v291_v55 = vrot.slane %v286_v44, %v720_v19  ;;  %v659_v56 = vcombine.low %v270_v42, %v277_v43  ;;  %v298_v0 = vrot.slane %v293_v52, %v720_v19  ;;  %v307_v1 = vpack.i.b16 %v134_v50, %v134_v50 }
  0x13   :  { %v658_v45 = vcombine.low %v256_v32, %v263_v33  ;;  %v556_v49 = vmul.bf16 %v657_v37, %v16_v38  ;;  %v314_v2 = vpack.i.b16 %v136_v51, %v136_v51  ;;  %v305_v3 = vrot.slane %v300_v53, %v720_v19  ;;  %v21_v38 = vld [vmem:[%s833_s0 + $0x28] sm:$0xff]  ;;  %v22_v53 = vld [vmem:[%s833_s0 + $0x30] sm:$0xff] }
  0x14   :  { %v660_v4 = vcombine.low %v284_v54, %v291_v55  ;;  %v558_v5 = vmul.bf16 %v659_v56, %v18_v58  ;;  %v153_v10 = vcombine.high %v145_v59, %v145_v59  ;;  %v135_v11 = vcombine.high %v119_v60, %v119_v60 }
  0x15   :  { %v557_v57 = vmul.bf16 %v658_v45, %v17_v46  ;;  %v572_v61 = vunpack.c.l.bf16 %v556_v49  ;;  %v573_v62 = vunpack.c.h.bf16 %v556_v49  ;;  %v137_v12 = vcombine.high %v133_v63, %v133_v63 }
  0x16   :  { %v312_v15 = vrot.slane %v307_v1, %v720_v19  ;;  %v319_v16 = vrot.slane %v314_v2, %v720_v19  ;;  %v321_v17 = vpack.i.b16 %v119_v60, %v119_v60  ;;  %v328_v18 = vpack.i.b16 %v133_v63, %v133_v63 }
  0x17   :  { %v574_v7 = vunpack.c.l.bf16 %v557_v57  ;;  %v575_v13 = vunpack.c.h.bf16 %v557_v57  ;;  %v604_v14 = vadd.f32 %v573_v62, %v572_v61  ;;  %v661_v20 = vcombine.low %v298_v0, %v305_v3  ;;  %v23_v3 = vld [vmem:[%s833_s0 + $0x38] sm:$0xff] }
  0x18   :  { %v559_v21 = vmul.bf16 %v660_v4, %v19_v8  ;;  %v576_v22 = vunpack.c.l.bf16 %v558_v5  ;;  %v152_v25 = vrot.slane %v138_v9, %v708_v6  ;;  %v161_v26 = vrot.slane %v145_v59, %v708_v6 }
  0x19   :  { %v605_v23 = vadd.f32 %v604_v14, %v574_v7  ;;  %v175_v27 = vrot.slane %v153_v10, %v708_v6  ;;  %v577_v28 = vunpack.c.h.bf16 %v558_v5  ;;  %v326_v30 = vrot.slane %v321_v17, %v720_v19 }
  0x1a   :  { %v333_v31 = vrot.slane %v328_v18, %v720_v19  ;;  %v335_v32 = vpack.i.b16 %v135_v11, %v135_v11  ;;  %v342_v33 = vpack.i.b16 %v137_v12, %v137_v12  ;;  %v662_v34 = vcombine.low %v312_v15, %v319_v16 }
  0x1b   :  { %v606_v29 = vadd.f32 %v605_v23, %v575_v13  ;;  %v560_v35 = vmul.bf16 %v661_v20, %v20_v24  ;;  %v578_v36 = vunpack.c.l.bf16 %v559_v21  ;;  %v154_v39 = vcombine.high %v152_v25, %v152_v25  ;;  %v24_v20 = vld [vmem:[%s833_s0 + $0x40] sm:$0xff] }
  0x1c   :  { %v183_v41 = vcombine.high %v161_v26, %v161_v26  ;;  %v185_v42 = vcombine.high %v175_v27, %v175_v27  ;;  %v579_v43 = vunpack.c.h.bf16 %v559_v21  ;;  %v340_v45 = vrot.slane %v335_v32, %v720_v19 }
  0x1d   :  { %v607_v37 = vadd.f32 %v606_v29, %v576_v22  ;;  %v347_v46 = vrot.slane %v342_v33, %v720_v19  ;;  %v349_v47 = vpack.i.b16 %v161_v26, %v161_v26  ;;  %v356_v48 = vpack.i.b16 %v175_v27, %v175_v27 }
  0x1e   :  { %v663_v49 = vcombine.low %v326_v30, %v333_v31  ;;  %v561_v50 = vmul.bf16 %v662_v34, %v21_v38  ;;  %v580_v51 = vunpack.c.l.bf16 %v560_v35  ;;  %v194_v54 = vrot.slane %v35_v40, %v708_v6  ;;  %v25_v34 = vld [vmem:[%s833_s0 + $0x48] sm:$0xff] }
  0x1f   :  { %v608_v44 = vadd.f32 %v607_v37, %v577_v28  ;;  %v168_v55 = vrot.slane %v152_v25, %v708_v6  ;;  %v182_v56 = vrot.slane %v154_v39, %v708_v6  ;;  %v581_v57 = vunpack.c.h.bf16 %v560_v35 }
  0x20   :  { %v354_v59 = vrot.slane %v349_v47, %v720_v19  ;;  %v361_v60 = vrot.slane %v356_v48, %v720_v19  ;;  %v363_v61 = vpack.i.b16 %v183_v41, %v183_v41  ;;  %v370_v62 = vpack.i.b16 %v185_v42, %v185_v42  ;;  %v26_v48 = vld [vmem:[%s833_s0 + $0x50] sm:$0xff] }
  0x21   :  { %v609_v52 = vadd.f32 %v608_v44, %v578_v36  ;;  %v664_v63 = vcombine.low %v340_v45, %v347_v46  ;;  %v562_v0 = vmul.bf16 %v663_v49, %v22_v53  ;;  %v582_v1 = vunpack.c.l.bf16 %v561_v50 }
  0x22   :  { %v187_v4 = vcombine.high %v35_v40, %v35_v40  ;;  %v202_v5 = vcombine.high %v194_v54, %v194_v54  ;;  %v184_v7 = vcombine.high %v168_v55, %v168_v55  ;;  %v186_v8 = vcombine.high %v182_v56, %v182_v56 }
  0x23   :  { %v610_v58 = vadd.f32 %v609_v52, %v579_v43  ;;  %v583_v9 = vunpack.c.h.bf16 %v561_v50  ;;  %v368_v11 = vrot.slane %v363_v61, %v720_v19  ;;  %v375_v12 = vrot.slane %v370_v62, %v720_v19  ;;  %v27_v61 = vld [vmem:[%s833_s0 + $0x58] sm:$0xff] }
  0x24   :  { %v377_v13 = vpack.i.b16 %v168_v55, %v168_v55  ;;  %v384_v14 = vpack.i.b16 %v182_v56, %v182_v56  ;;  %v665_v15 = vcombine.low %v354_v59, %v361_v60  ;;  %v563_v16 = vmul.bf16 %v664_v63, %v23_v3 }
  0x25   :  { %v611_v2 = vadd.f32 %v610_v58, %v580_v51  ;;  %v584_v17 = vunpack.c.l.bf16 %v562_v0  ;;  %v201_v21 = vrot.slane %v187_v4, %v708_v6  ;;  %v210_v22 = vrot.slane %v194_v54, %v708_v6 }
  0x26   :  { %v224_v23 = vrot.slane %v202_v5, %v708_v6  ;;  %v585_v24 = vunpack.c.h.bf16 %v562_v0  ;;  %v382_v26 = vrot.slane %v377_v13, %v720_v19  ;;  %v389_v27 = vrot.slane %v384_v14, %v720_v19 }
  0x27   :  { %v612_v10 = vadd.f32 %v611_v2, %v581_v57  ;;  %v391_v28 = vpack.i.b16 %v184_v7, %v184_v7  ;;  %v398_v29 = vpack.i.b16 %v186_v8, %v186_v8  ;;  %v666_v30 = vcombine.low %v368_v11, %v375_v12 }
  0x28   :  { %v564_v31 = vmul.bf16 %v665_v15, %v24_v20  ;;  %v586_v32 = vunpack.c.l.bf16 %v563_v16  ;;  %v203_v35 = vcombine.high %v201_v21, %v201_v21  ;;  %v232_v36 = vcombine.high %v210_v22, %v210_v22 }
  0x29   :  { %v613_v18 = vadd.f32 %v612_v10, %v582_v1  ;;  %v234_v37 = vcombine.high %v224_v23, %v224_v23  ;;  %v587_v38 = vunpack.c.h.bf16 %v563_v16  ;;  %v396_v40 = vrot.slane %v391_v28, %v720_v19  ;;  %v28_v10 = vld [vmem:[%s833_s0 + $0x60] sm:$0xff] }
  0x2a   :  { %v403_v41 = vrot.slane %v398_v29, %v720_v19  ;;  %v405_v42 = vpack.i.b16 %v210_v22, %v210_v22  ;;  %v412_v43 = vpack.i.b16 %v224_v23, %v224_v23  ;;  %v667_v44 = vcombine.low %v382_v26, %v389_v27  ;;  %v29_v22 = vld [vmem:[%s833_s0 + $0x68] sm:$0xff] }
  0x2b   :  { %v614_v25 = vadd.f32 %v613_v18, %v583_v9  ;;  %v565_v45 = vmul.bf16 %v666_v30, %v25_v34  ;;  %v588_v46 = vunpack.c.l.bf16 %v564_v31  ;;  %v217_v49 = vrot.slane %v201_v21, %v708_v6 }
  0x2c   :  { %v231_v50 = vrot.slane %v203_v35, %v708_v6  ;;  %v589_v51 = vunpack.c.h.bf16 %v564_v31  ;;  %v410_v53 = vrot.slane %v405_v42, %v720_v19  ;;  %v417_v54 = vrot.slane %v412_v43, %v720_v19  ;;  %v30_v31 = vld [vmem:[%s833_s0 + $0x70] sm:$0xff] }
  0x2d   :  { %v615_v33 = vadd.f32 %v614_v25, %v584_v17  ;;  %v419_v55 = vpack.i.b16 %v232_v36, %v232_v36  ;;  %v426_v56 = vpack.i.b16 %v234_v37, %v234_v37  ;;  %v668_v57 = vcombine.low %v396_v40, %v403_v41 }
  0x2e   :  { %v566_v58 = vmul.bf16 %v667_v44, %v26_v48  ;;  %v590_v59 = vunpack.c.l.bf16 %v565_v45  ;;  %v233_v62 = vcombine.high %v217_v49, %v217_v49  ;;  %v235_v63 = vcombine.high %v231_v50, %v231_v50 }
  0x2f   :  { %v616_v39 = vadd.f32 %v615_v33, %v585_v24  ;;  %v591_v0 = vunpack.c.h.bf16 %v565_v45  ;;  %v424_v1 = vrot.slane %v419_v55, %v720_v19  ;;  %v431_v2 = vrot.slane %v426_v56, %v720_v19 }
  0x30   :  { %v433_v3 = vpack.i.b16 %v217_v49, %v217_v49  ;;  %v440_v4 = vpack.i.b16 %v231_v50, %v231_v50  ;;  %v669_v5 = vcombine.low %v410_v53, %v417_v54  ;;  %v567_v7 = vmul.bf16 %v668_v57, %v27_v61 }
  0x31   :  { %v617_v47 = vadd.f32 %v616_v39, %v586_v32  ;;  %v592_v8 = vunpack.c.l.bf16 %v566_v58  ;;  %v593_v11 = vunpack.c.h.bf16 %v566_v58  ;;  %v447_v15 = vpack.i.b16 %v233_v62, %v233_v62 }
  0x32   :  { %v438_v13 = vrot.slane %v433_v3, %v720_v19  ;;  %v445_v14 = vrot.slane %v440_v4, %v720_v19  ;;  %v454_v16 = vpack.i.b16 %v235_v63, %v235_v63  ;;  %v670_v17 = vcombine.low %v424_v1, %v431_v2 }
  0x33   :  { %v618_v52 = vadd.f32 %v617_v47, %v587_v38  ;;  %v568_v18 = vmul.bf16 %v669_v5, %v28_v10  ;;  %v594_v20 = vunpack.c.l.bf16 %v567_v7  ;;  %v595_v23 = vunpack.c.h.bf16 %v567_v7  ;;  %v31_v38 = vld [vmem:[%s833_s0 + $0x78] sm:$0xff] }
  0x34   :  { %v452_v25 = vrot.slane %v447_v15, %v720_v19  ;;  %v459_v26 = vrot.slane %v454_v16, %v720_v19  ;;  %v671_v27 = vcombine.low %v438_v13, %v445_v14  ;;  %v569_v28 = vmul.bf16 %v670_v17, %v29_v22 }
  0x35   :  { %v619_v60 = vadd.f32 %v618_v52, %v588_v46  ;;  %v596_v29 = vunpack.c.l.bf16 %v568_v18  ;;  %v597_v32 = vunpack.c.h.bf16 %v568_v18 }
  0x36   :  { %v672_v34 = vcombine.low %v452_v25, %v459_v26  ;;  %v570_v35 = vmul.bf16 %v671_v27, %v30_v31  ;;  %v598_v36 = vunpack.c.l.bf16 %v569_v28  ;;  %v599_v39 = vunpack.c.h.bf16 %v569_v28 }
  0x37   :  { %v620_v6 = vadd.f32 %v619_v60, %v589_v51  ;;  %v673_v51 = vld [vmem:[#allocation2] ss:$0 sm:$0xff] }
  0x38   :  { %v571_v40 = vmul.bf16 %v672_v34, %v31_v38  ;;  %v600_v41 = vunpack.c.l.bf16 %v570_v35  ;;  %v601_v43 = vunpack.c.h.bf16 %v570_v35 }
  0x39   :  { %v621_v9 = vadd.f32 %v620_v6, %v590_v59 }
  0x3a   :  { %v602_v45 = vunpack.c.l.bf16 %v571_v40  ;;  %v603_v47 = vunpack.c.h.bf16 %v571_v40 }
  0x3b   :  { %v622_v12 = vadd.f32 %v621_v9, %v591_v0 }
  0x3d   :  { %v623_v21 = vadd.f32 %v622_v12, %v592_v8 }
  0x3f   :  { %v624_v24 = vadd.f32 %v623_v21, %v593_v11 }
  0x41   :  { %v625_v30 = vadd.f32 %v624_v24, %v594_v20 }
  0x43   :  { %v626_v33 = vadd.f32 %v625_v30, %v595_v23 }
  0x45   :  { %v627_v37 = vadd.f32 %v626_v33, %v596_v29 }
  0x47   :  { %v628_v19 = vadd.f32 %v627_v37, %v597_v32 }
  0x49   :  { %v629_v42 = vadd.f32 %v628_v19, %v598_v36 }
  0x4b   :  { %v630_v44 = vadd.f32 %v629_v42, %v599_v39 }
  0x4d   :  { %v631_v46 = vadd.f32 %v630_v44, %v600_v41 }
  0x4f   :  { %v632_v48 = vadd.f32 %v631_v46, %v601_v43 }
  0x51   :  { %v633_v49 = vadd.f32 %v632_v48, %v602_v45 }
  0x53   :  { %v634_v50 = vadd.f32 %v633_v49, %v603_v47 }
  0x55   :  { %635 = vadd.xlane.f32.xlu0 %v634_v50 }
  0xde   :  { %v636_v52 = vpop.xlane.xlu0 %635 }
  0xdf   :  { %v644_v53 = vadd.f32 %v673_v51, %v636_v52 }
  0xe1   :  { %v674_v54 = vmul.f32 -1.442695, %v644_v53 }
  0xe3   :  { %680 = vpow2.f32 %v674_v54 }
  0xf0   :  { %v681_v55 = vpop.eup %680 }
  0xf1   :  { %v648_v56 = vadd.f32 1.0, %v681_v55 }
  0xf3   :  { %682 = vrcp.f32 %v648_v56 }
 0x100   :  { %v683_v57 = vpop.eup %682 }
 0x101   :  { %652 = vst.msk [vmem:[%s834_s3] sm:$0xff] %vm651_vm0, %v683_v57 }

</bundles_post_ra>
